<compile_context>
chip_gen: v7x
topology: tpu7x:2x2x1
jax: 0.10.0
libtpu: 0.0.40
codegen_flags: <defaults>
</compile_context>

<pallas_src>
import jax
import jax.numpy as jnp
from jax.experimental import pallas as pl
from jax.experimental.pallas import tpu as pltpu


# ----------------------------------------------------------------------------
# Kernel 1: fused conv1(3x3, pad 1) + bias + relu + maxpool2
#                 -> conv2(3x3, pad 1) + bias + relu + maxpool2
# for a block of B images.  Output: FC-ready packed activation (B, 7, 512).
# ----------------------------------------------------------------------------
def conv_stack_kernel(patch_ref, w1_ref, b1_ref, w2_ref, b2_ref, mask_ref, o_ref):
    B = patch_ref.shape[0]

    # ---- conv1 + pool1: one MXU dot over the whole image block ---------------
    # patch_ref: (B, 32, 8, 16) = (image, j_parity*16 + padded_row, col, 4x4 window tap)
    lhs1 = patch_ref[...].reshape(B * 32 * 8, 16)
    d1 = jnp.dot(lhs1, w1_ref[...], preferred_element_type=jnp.float32)   # (B*256, 128)
    d1 = d1.reshape(B, 2, 16, 8, 128)
    # output lane = 32 * pool_position + channel; max over the 4 pool positions.
    mx = jnp.maximum(jnp.maximum(d1[..., 0:32], d1[..., 32:64]),
                     jnp.maximum(d1[..., 64:96], d1[..., 96:128]))        # (B,2,16,8,32)
    # bias + relu in f32, then zero the spatial padding rows/cols (they are conv2's
    # zero padding, so they must be exactly 0, not relu(bias)).
    y1 = jnp.maximum(mx + b1_ref[...], 0.0) * mask_ref[...][None, None]
    y1 = y1.astype(jnp.bfloat16)                                          # (B,2,16,8,32)

    # y1[b, pj, ip, jj, c] = pooled conv1 activation at row ip-1, col 2*jj+pj,
    # channel c (rows 0,15 and col 7 are the zero border for conv2).
    peven = y1[:, 0]            # conv1 cols 0,2,..,12  -> padded cols 1,3,..,15(=0)
    podd = y1[:, 1]             # conv1 cols 1,3,..,13  -> padded cols 2,4,..,14,(x)
    zc = jnp.zeros((B, 16, 1, 32), jnp.bfloat16)
    col0 = jnp.concatenate([zc, podd[:, :, 0:7, :]], axis=2)   # padded cols 2jj
    col1 = peven                                               # padded cols 2jj+1
    col2 = podd                                                # padded cols 2jj+2
    col3 = jnp.concatenate([peven[:, :, 1:8, :], zc], axis=2)  # padded cols 2jj+3

    # ---- conv2 + pool2: 3 MXU dots (one per kernel row), K = 4 cols x 32 ch ---
    acc = jnp.zeros((B * 14 * 8, 128), jnp.float32)
    for kh in range(3):
        lhs2 = jnp.concatenate(
            [col0[:, kh:kh + 14], col1[:, kh:kh + 14],
             col2[:, kh:kh + 14], col3[:, kh:kh + 14]], axis=-1)          # (B,14,8,128)
        acc = acc + jnp.dot(lhs2.reshape(B * 14 * 8, 128), w2_ref[kh],
                            preferred_element_type=jnp.float32)
    acc = acc.reshape(B, 14, 8, 128)
    # output lanes 0:64 / 64:128 hold the even / odd output column of each pair.
    cp = jnp.maximum(acc[..., 0:64], acc[..., 64:128])                    # column pool
    rp = jnp.max(cp.reshape(B, 7, 2, 8, 64), axis=2)                      # row pool
    q = jnp.maximum(rp + b2_ref[...], 0.0).astype(jnp.bfloat16)           # (B,7,8,64)

    # ---- pack for the FC: 7 rows x 4 col-pairs x (64 | 64) channels ----------
    zcol = jnp.zeros((B, 7, 64), jnp.bfloat16)
    pieces = []
    for g in range(4):
        pieces.append(q[:, :, 2 * g, :])
        pieces.append(q[:, :, 2 * g + 1, :] if 2 * g + 1 < 7 else zcol)
    o_ref[...] = jnp.concatenate(pieces, axis=-1)                          # (B,7,512)


def conv_stack(x_nchw, pp, *, block_images=8):
    """Runs conv1+pool1+conv2+pool2 fused.  Returns ((Npad,7,512) bf16, Npad)."""
    N = x_nchw.shape[0]
    assert x_nchw.shape[1:] == (1, 28, 28), "this script assumes 28x28 1-channel input"
    B = min(block_images, N)
    n_blk = -(-N // B)
    Npad = n_blk * B

    x = x_nchw[:, 0]                                     # (N, 28, 28)
    if Npad != N:
        x = jnp.pad(x, ((0, Npad - N), (0, 0), (0, 0)))
    xpad = jnp.pad(x, ((0, 0), (1, 1), (1, 1)))          # (Npad, 30, 30)

    # Pool-window im2col: win[n, i, j, 4*di+dj] = xpad[n, 2i+di, 2j+dj]
    taps = []
    for di in range(4):
        for dj in range(4):
            taps.append(xpad[:, di:di + 28:2, dj:dj + 28:2])
    win = jnp.stack(taps, axis=-1)                       # (Npad, 14, 14, 16)
    win = win.reshape(Npad, 14, 7, 2, 16)                # j -> (jj, j%2)
    win = jnp.transpose(win, (0, 3, 1, 2, 4))            # (Npad, pj, i, jj, 16)
    win = jnp.pad(win, ((0, 0), (0, 0), (1, 1), (0, 1), (0, 0)))  # rows 14->16, cols 7->8
    patches = win.reshape(Npad, 32, 8, 16).astype(jnp.bfloat16)

    out = pl.pallas_call(
        conv_stack_kernel,
        out_shape=jax.ShapeDtypeStruct((Npad, 7, 512), jnp.bfloat16),
        grid=(n_blk,),
        in_specs=[
            pl.BlockSpec((B, 32, 8, 16), lambda n: (n, 0, 0, 0)),
            pl.BlockSpec((16, 128), lambda n: (0, 0)),
            pl.BlockSpec((1, 32), lambda n: (0, 0)),
            pl.BlockSpec((3, 128, 128), lambda n: (0, 0, 0)),
            pl.BlockSpec((1, 64), lambda n: (0, 0)),
            pl.BlockSpec((16, 8, 32), lambda n: (0, 0, 0)),
        ],
        out_specs=pl.BlockSpec((B, 7, 512), lambda n: (n, 0, 0)),
        compiler_params=pltpu.CompilerParams(
            dimension_semantics=("parallel",),
            vmem_limit_bytes=32 * 1024 * 1024),
    )(patches, pp["w1"], pp["b1"], pp["w2"], pp["b2"], pp["mask"])
    return out, Npad


# ----------------------------------------------------------------------------
# Kernel 2: fused fc1 + ReLU + (dropout identity) + fc2, tiled over batch.
# ----------------------------------------------------------------------------
def fc_kernel(x_ref, w1_ref, b1_ref, w2_ref, b2_ref, o_ref):
    h = jnp.dot(x_ref[...], w1_ref[...], preferred_element_type=jnp.float32)
    h = jnp.maximum(h + b1_ref[...], 0.0)
    # TODO(synk): Dropout(p=0.25) is implemented as eval-mode identity (no RNG mask).
    out = jnp.dot(h.astype(jnp.bfloat16), w2_ref[...],
                  preferred_element_type=jnp.float32)
    o_ref[...] = out + b2_ref[...]


def fc_forward(flat, pp, *, fc_tile=256):
    Nf, K = flat.shape
    TM = min(fc_tile, Nf)
    n_blk = -(-Nf // TM)
    Npad = n_blk * TM
    if Npad != Nf:
        flat = jnp.pad(flat, ((0, Npad - Nf), (0, 0)))
    out = pl.pallas_call(
        fc_kernel,
        out_shape=jax.ShapeDtypeStruct((Npad, 128), jnp.float32),
        grid=(n_blk,),
        in_specs=[
            pl.BlockSpec((TM, K), lambda i: (i, 0)),
            pl.BlockSpec(pp["w_fc1"].shape, lambda i: (0, 0)),   # weights stay resident
            pl.BlockSpec(pp["b_fc1"].shape, lambda i: (0, 0)),
            pl.BlockSpec(pp["w_fc2"].shape, lambda i: (0, 0)),
            pl.BlockSpec(pp["b_fc2"].shape, lambda i: (0, 0)),
        ],
        out_specs=pl.BlockSpec((TM, 128), lambda i: (i, 0)),
        compiler_params=pltpu.CompilerParams(
            dimension_semantics=("parallel",),
            vmem_limit_bytes=32 * 1024 * 1024),
    )(flat, pp["w_fc1"], pp["b_fc1"], pp["w_fc2"], pp["b_fc2"])
    return out[:Nf]


# ----------------------------------------------------------------------------
# Full forward pass (mirrors CNN.forward); expects prepared (packed) params.
# ----------------------------------------------------------------------------
def cnn_forward(x_nchw, pp):
    N = x_nchw.shape[0]
    y2, Npad = conv_stack(x_nchw, pp)                 # (Npad, 7, 512) bf16
    # AdaptiveAvgPool2d((7,7)) is an exact identity for 28x28 inputs (7x7 feature map).
    flat = y2.reshape(Npad, 7 * 512)                  # packed (h, col-pair, 2x64ch) order
    out = fc_forward(flat, pp)                        # (Npad, 128) f32
    return out[:N, :10]


# ----------------------------------------------------------------------------
# Parameters: PyTorch-layout init + one-time preparation (fold pooling / parity /
# flatten order into the weight layouts, pre-cast MXU operands to bf16).
# ----------------------------------------------------------------------------
def init_params(key):
    ks = jax.random.split(key, 8)

    def normal(k, shape, scale):
        return scale * jax.random.normal(k, shape, jnp.float32)

    return {
        "conv1_w": normal(ks[0], (32, 1, 3, 3), 0.10),       # Conv2d(1, 32, 3, padding=1)
        "conv1_b": normal(ks[1], (32,), 0.10),
        "conv2_w": normal(ks[2], (64, 32, 3, 3), 0.05),      # Conv2d(32, 64, 3, padding=1)
        "conv2_b": normal(ks[3], (64,), 0.05),
        "fc1_w":   normal(ks[4], (128, 64 * 7 * 7), 0.02),   # Linear(3136, 128)
        "fc1_b":   normal(ks[5], (128,), 0.02),
        "fc2_w":   normal(ks[6], (10, 128), 0.05),           # Linear(128, 10)
        "fc2_b":   normal(ks[7], (10,), 0.05),
    }


def prepare_params(p):
    f32, bf16 = jnp.float32, jnp.bfloat16

    # conv1: (32,1,3,3) -> pool-window matmul weights (16, 128).
    # LHS tap = 4*di + dj (4x4 window of a 2x2 pool window); output lane = 32*pos + c.
    w1t = jnp.transpose(p["conv1_w"], (2, 3, 1, 0))[:, :, 0, :]   # (kh, kw, c)
    W1 = jnp.zeros((16, 128), f32)
    for pr in range(2):
        for pc in range(2):
            pos = 2 * pr + pc
            for kh in range(3):
                for kw in range(3):
                    W1 = W1.at[4 * (pr + kh) + (pc + kw),
                               32 * pos:32 * pos + 32].set(w1t[kh, kw])
    b1 = p["conv1_b"].reshape(1, 32).astype(f32)

    # conv2: (64,32,3,3) -> 3 kernel-row groups of (128,128).
    # LHS lane = 32*dc + cin (dc = column offset within a column pair, 0..3);
    # output lane = 64*pc + cout (pc = output column parity within the pair).
    W2 = jnp.zeros((3, 128, 128), f32)
    for kh in range(3):
        for dc in range(4):
            for pc in range(2):
                kw = dc - pc
                if 0 <= kw <= 2:
                    blk = jnp.transpose(p["conv2_w"][:, :, kh, kw])   # (cin, cout)
                    W2 = W2.at[kh, 32 * dc:32 * dc + 32,
                               64 * pc:64 * pc + 64].set(blk)
    b2 = p["conv2_b"].reshape(1, 64).astype(f32)

    # Spatial-padding mask for the conv1 output (rows 0/15 and col 7 stay exactly 0).
    rows_ok = (jnp.arange(16) >= 1) & (jnp.arange(16) <= 14)
    cols_ok = jnp.arange(8) < 7
    mask = (rows_ok[:, None] & cols_ok[None, :]).astype(f32)          # (16, 8)
    mask = jnp.broadcast_to(mask[:, :, None], (16, 8, 32))

    # fc1: reorder K from PyTorch (c,h,w) flatten order to the packed
    # (h, col-pair, [64ch of even col | 64ch of odd col]) order -> (3584, 128).
    wf1 = p["fc1_w"].reshape(128, 64, 7, 7)            # (o, c, h, w)
    wf1 = jnp.transpose(wf1, (2, 3, 1, 0))             # (h, w, c, o)
    wf1 = jnp.pad(wf1, ((0, 0), (0, 1), (0, 0), (0, 0)))   # w: 7 -> 8 (w=7 slot is zero)
    wf1 = wf1.reshape(7, 4, 2 * 64, 128).reshape(7 * 4 * 128, 128)
    b_fc1 = p["fc1_b"].reshape(1, 128).astype(f32)

    # fc2: (10,128) -> (128,128) with the 10 outputs padded to 128 lanes.
    wf2 = jnp.pad(p["fc2_w"].T, ((0, 0), (0, 118)))
    b_fc2 = jnp.pad(p["fc2_b"], (0, 118)).reshape(1, 128).astype(f32)

    return {"w1": W1.astype(bf16), "b1": b1,
            "w2": W2.astype(bf16), "b2": b2,
            "mask": mask,
            "w_fc1": wf1.astype(bf16), "b_fc1": b_fc1,
            "w_fc2": wf2.astype(bf16), "b_fc2": b_fc2}


# ----------------------------------------------------------------------------
# Pure-JAX reference (f32) for a correctness check.
# ----------------------------------------------------------------------------
def cnn_reference(x_nchw, p):
    x = jnp.transpose(x_nchw, (0, 2, 3, 1))

    def conv_relu(x, w_pt, b):
        w = jnp.transpose(w_pt, (2, 3, 1, 0))                  # HWIO
        y = jax.lax.conv_general_dilated(
            x, w, (1, 1), "SAME", dimension_numbers=("NHWC", "HWIO", "NHWC"))
        return jax.nn.relu(y + b)

    def pool(x):
        N, H, W, C = x.shape
        return x.reshape(N, H // 2, 2, W // 2, 2, C).max(axis=(2, 4))

    x = pool(conv_relu(x, p["conv1_w"], p["conv1_b"]))
    x = pool(conv_relu(x, p["conv2_w"], p["conv2_b"]))
    flat = jnp.transpose(x, (0, 3, 1, 2)).reshape(x.shape[0], -1)
    h = jax.nn.relu(flat @ p["fc1_w"].T + p["fc1_b"])
    return h @ p["fc2_w"].T + p["fc2_b"]


if __name__ == "__main__":
    key = jax.random.PRNGKey(0)
    pkey, xkey = jax.random.split(key)
    params = init_params(pkey)
    prepared = prepare_params(params)

    # NCHW input (PyTorch convention); MNIST-sized so the 7x7 adaptive pool is identity.
    x = jax.random.normal(xkey, (2, 1, 28, 28), jnp.float32)

    fwd = jax.jit(cnn_forward)
    out = jax.block_until_ready(fwd(x, prepared))
    assert out.shape == (2, 10) and out.dtype == jnp.float32

    ref = cnn_reference(x, params)
    assert jnp.allclose(out, ref, rtol=5e-2, atol=5e-2), float(jnp.max(jnp.abs(out - ref)))
    print("KERNEL_OK")
</pallas_src>

<mosaic_0001>
module attributes {stable_mosaic.version = 11 : i64} {
  func.func @conv_stack_kernel(%arg0: i32, %arg1: memref<2x32x8x16xbf16, #tpu.memory_space<vmem>>, %arg2: memref<16x128xbf16, #tpu.memory_space<vmem>>, %arg3: memref<1x32xf32, #tpu.memory_space<vmem>>, %arg4: memref<3x128x128xbf16, #tpu.memory_space<vmem>>, %arg5: memref<1x64xf32, #tpu.memory_space<vmem>>, %arg6: memref<16x8x32xf32, #tpu.memory_space<vmem>>, %arg7: memref<2x7x512xbf16, #tpu.memory_space<vmem>>) attributes {dimension_semantics = [#tpu.dimension_semantics<parallel>], iteration_bounds = array<i64: 1>, scalar_prefetch = 0 : i64, scratch_operands = 0 : i64, tpu.core_type = #tpu.core_type<tc>, window_params = [{transform_indices = @transform_0, window_bounds = array<i64: 2, 32, 8, 16>}, {pipeline_mode = #tpu.pipeline_mode<synchronous>, transform_indices = @transform_1, window_bounds = array<i64: 16, 128>}, {pipeline_mode = #tpu.pipeline_mode<synchronous>, transform_indices = @transform_2, window_bounds = array<i64: 1, 32>}, {pipeline_mode = #tpu.pipeline_mode<synchronous>, transform_indices = @transform_3, window_bounds = array<i64: 3, 128, 128>}, {pipeline_mode = #tpu.pipeline_mode<synchronous>, transform_indices = @transform_4, window_bounds = array<i64: 1, 64>}, {pipeline_mode = #tpu.pipeline_mode<synchronous>, transform_indices = @transform_5, window_bounds = array<i64: 16, 8, 32>}, {transform_indices = @transform_6, window_bounds = array<i64: 2, 7, 512>}]} {
    %c0 = arith.constant 0 : index
    %c0_0 = arith.constant 0 : index
    %c0_1 = arith.constant 0 : index
    %c0_2 = arith.constant 0 : index
    %0 = vector.load %arg1[%c0, %c0_0, %c0_1, %c0_2] : memref<2x32x8x16xbf16, #tpu.memory_space<vmem>>, vector<2x32x8x16xbf16>
    %1 = vector.shape_cast %0 : vector<2x32x8x16xbf16> to vector<512x16xbf16>
    %c0_3 = arith.constant 0 : index
    %c0_4 = arith.constant 0 : index
    %2 = vector.load %arg2[%c0_3, %c0_4] : memref<16x128xbf16, #tpu.memory_space<vmem>>, vector<16x128xbf16>
    %cst = arith.constant dense<0.000000e+00> : vector<512x128xf32>
    %3 = tpu.matmul %1, %2, %cst {dimension_numbers = #tpu.dot_dimension_numbers<[1], [0], [0], [1], [0, 0, 1, 1], [], []>} : vector<512x16xbf16>, vector<16x128xbf16>, vector<512x128xf32> -> vector<512x128xf32>
    %4 = vector.shape_cast %3 : vector<512x128xf32> to vector<2x2x16x8x128xf32>
    %5 = vector.extract_strided_slice %4 {offsets = [0, 0, 0, 0, 0], sizes = [2, 2, 16, 8, 32], strides = [1, 1, 1, 1, 1]} : vector<2x2x16x8x128xf32> to vector<2x2x16x8x32xf32>
    %6 = vector.extract_strided_slice %4 {offsets = [0, 0, 0, 0, 32], sizes = [2, 2, 16, 8, 32], strides = [1, 1, 1, 1, 1]} : vector<2x2x16x8x128xf32> to vector<2x2x16x8x32xf32>
    %7 = arith.maximumf %5, %6 : vector<2x2x16x8x32xf32>
    %8 = vector.extract_strided_slice %4 {offsets = [0, 0, 0, 0, 64], sizes = [2, 2, 16, 8, 32], strides = [1, 1, 1, 1, 1]} : vector<2x2x16x8x128xf32> to vector<2x2x16x8x32xf32>
    %9 = vector.extract_strided_slice %4 {offsets = [0, 0, 0, 0, 96], sizes = [2, 2, 16, 8, 32], strides = [1, 1, 1, 1, 1]} : vector<2x2x16x8x128xf32> to vector<2x2x16x8x32xf32>
    %10 = arith.maximumf %8, %9 : vector<2x2x16x8x32xf32>
    %11 = arith.maximumf %7, %10 : vector<2x2x16x8x32xf32>
    %c0_5 = arith.constant 0 : index
    %c0_6 = arith.constant 0 : index
    %12 = vector.load %arg3[%c0_5, %c0_6] : memref<1x32xf32, #tpu.memory_space<vmem>>, vector<1x32xf32>
    %13 = vector.shape_cast %12 : vector<1x32xf32> to vector<1x1x1x1x32xf32>
    %14 = vector.broadcast %13 : vector<1x1x1x1x32xf32> to vector<2x2x16x8x32xf32>
    %15 = arith.addf %11, %14 : vector<2x2x16x8x32xf32>
    %cst_7 = arith.constant 0.000000e+00 : f32
    %16 = vector.broadcast %cst_7 : f32 to vector<2x2x16x8x32xf32>
    %17 = arith.maximumf %15, %16 : vector<2x2x16x8x32xf32>
    %c0_8 = arith.constant 0 : index
    %c0_9 = arith.constant 0 : index
    %c0_10 = arith.constant 0 : index
    %18 = vector.load %arg6[%c0_8, %c0_9, %c0_10] : memref<16x8x32xf32, #tpu.memory_space<vmem>>, vector<16x8x32xf32>
    %19 = vector.shape_cast %18 : vector<16x8x32xf32> to vector<1x1x16x8x32xf32>
    %20 = vector.broadcast %19 : vector<1x1x16x8x32xf32> to vector<2x2x16x8x32xf32>
    %21 = arith.mulf %17, %20 : vector<2x2x16x8x32xf32>
    %22 = arith.truncf %21 : vector<2x2x16x8x32xf32> to vector<2x2x16x8x32xbf16>
    %23 = vector.extract_strided_slice %22 {offsets = [0, 0, 0, 0, 0], sizes = [2, 1, 16, 8, 32], strides = [1, 1, 1, 1, 1]} : vector<2x2x16x8x32xbf16> to vector<2x1x16x8x32xbf16>
    %24 = vector.shape_cast %23 : vector<2x1x16x8x32xbf16> to vector<2x16x8x32xbf16>
    %25 = vector.extract_strided_slice %22 {offsets = [0, 1, 0, 0, 0], sizes = [2, 1, 16, 8, 32], strides = [1, 1, 1, 1, 1]} : vector<2x2x16x8x32xbf16> to vector<2x1x16x8x32xbf16>
    %26 = vector.shape_cast %25 : vector<2x1x16x8x32xbf16> to vector<2x16x8x32xbf16>
    %cst_11 = arith.constant 0.000000e+00 : bf16
    %27 = vector.broadcast %cst_11 : bf16 to vector<2x16x1x32xbf16>
    %28 = vector.extract_strided_slice %26 {offsets = [0, 0, 0, 0], sizes = [2, 16, 7, 32], strides = [1, 1, 1, 1]} : vector<2x16x8x32xbf16> to vector<2x16x7x32xbf16>
    %29 = tpu.concatenate %27, %28 in 2 : vector<2x16x1x32xbf16>, vector<2x16x7x32xbf16> -> vector<2x16x8x32xbf16>
    %30 = vector.extract_strided_slice %24 {offsets = [0, 0, 1, 0], sizes = [2, 16, 7, 32], strides = [1, 1, 1, 1]} : vector<2x16x8x32xbf16> to vector<2x16x7x32xbf16>
    %31 = tpu.concatenate %30, %27 in 2 : vector<2x16x7x32xbf16>, vector<2x16x1x32xbf16> -> vector<2x16x8x32xbf16>
    %cst_12 = arith.constant 0.000000e+00 : f32
    %32 = vector.broadcast %cst_12 : f32 to vector<224x128xf32>
    %33 = vector.extract_strided_slice %29 {offsets = [0, 0, 0, 0], sizes = [2, 14, 8, 32], strides = [1, 1, 1, 1]} : vector<2x16x8x32xbf16> to vector<2x14x8x32xbf16>
    %34 = vector.extract_strided_slice %24 {offsets = [0, 0, 0, 0], sizes = [2, 14, 8, 32], strides = [1, 1, 1, 1]} : vector<2x16x8x32xbf16> to vector<2x14x8x32xbf16>
    %35 = vector.extract_strided_slice %26 {offsets = [0, 0, 0, 0], sizes = [2, 14, 8, 32], strides = [1, 1, 1, 1]} : vector<2x16x8x32xbf16> to vector<2x14x8x32xbf16>
    %36 = vector.extract_strided_slice %31 {offsets = [0, 0, 0, 0], sizes = [2, 14, 8, 32], strides = [1, 1, 1, 1]} : vector<2x16x8x32xbf16> to vector<2x14x8x32xbf16>
    %37 = tpu.concatenate %33, %34, %35, %36 in 3 : vector<2x14x8x32xbf16>, vector<2x14x8x32xbf16>, vector<2x14x8x32xbf16>, vector<2x14x8x32xbf16> -> vector<2x14x8x128xbf16>
    %38 = vector.shape_cast %37 : vector<2x14x8x128xbf16> to vector<224x128xbf16>
    %c0_13 = arith.constant 0 : index
    %c0_14 = arith.constant 0 : index
    %c0_15 = arith.constant 0 : index
    %39 = vector.load %arg4[%c0_13, %c0_14, %c0_15] : memref<3x128x128xbf16, #tpu.memory_space<vmem>>, vector<1x128x128xbf16>
    %40 = vector.shape_cast %39 : vector<1x128x128xbf16> to vector<128x128xbf16>
    %cst_16 = arith.constant dense<0.000000e+00> : vector<224x128xf32>
    %41 = tpu.matmul %38, %40, %cst_16 {dimension_numbers = #tpu.dot_dimension_numbers<[1], [0], [0], [1], [0, 0, 1, 1], [], []>} : vector<224x128xbf16>, vector<128x128xbf16>, vector<224x128xf32> -> vector<224x128xf32>
    %42 = arith.addf %32, %41 : vector<224x128xf32>
    %43 = vector.extract_strided_slice %29 {offsets = [0, 1, 0, 0], sizes = [2, 14, 8, 32], strides = [1, 1, 1, 1]} : vector<2x16x8x32xbf16> to vector<2x14x8x32xbf16>
    %44 = vector.extract_strided_slice %24 {offsets = [0, 1, 0, 0], sizes = [2, 14, 8, 32], strides = [1, 1, 1, 1]} : vector<2x16x8x32xbf16> to vector<2x14x8x32xbf16>
    %45 = vector.extract_strided_slice %26 {offsets = [0, 1, 0, 0], sizes = [2, 14, 8, 32], strides = [1, 1, 1, 1]} : vector<2x16x8x32xbf16> to vector<2x14x8x32xbf16>
    %46 = vector.extract_strided_slice %31 {offsets = [0, 1, 0, 0], sizes = [2, 14, 8, 32], strides = [1, 1, 1, 1]} : vector<2x16x8x32xbf16> to vector<2x14x8x32xbf16>
    %47 = tpu.concatenate %43, %44, %45, %46 in 3 : vector<2x14x8x32xbf16>, vector<2x14x8x32xbf16>, vector<2x14x8x32xbf16>, vector<2x14x8x32xbf16> -> vector<2x14x8x128xbf16>
    %48 = vector.shape_cast %47 : vector<2x14x8x128xbf16> to vector<224x128xbf16>
    %c1 = arith.constant 1 : index
    %c0_17 = arith.constant 0 : index
    %c0_18 = arith.constant 0 : index
    %49 = vector.load %arg4[%c1, %c0_17, %c0_18] : memref<3x128x128xbf16, #tpu.memory_space<vmem>>, vector<1x128x128xbf16>
    %50 = vector.shape_cast %49 : vector<1x128x128xbf16> to vector<128x128xbf16>
    %cst_19 = arith.constant dense<0.000000e+00> : vector<224x128xf32>
    %51 = tpu.matmul %48, %50, %cst_19 {dimension_numbers = #tpu.dot_dimension_numbers<[1], [0], [0], [1], [0, 0, 1, 1], [], []>} : vector<224x128xbf16>, vector<128x128xbf16>, vector<224x128xf32> -> vector<224x128xf32>
    %52 = arith.addf %42, %51 : vector<224x128xf32>
    %53 = vector.extract_strided_slice %29 {offsets = [0, 2, 0, 0], sizes = [2, 14, 8, 32], strides = [1, 1, 1, 1]} : vector<2x16x8x32xbf16> to vector<2x14x8x32xbf16>
    %54 = vector.extract_strided_slice %24 {offsets = [0, 2, 0, 0], sizes = [2, 14, 8, 32], strides = [1, 1, 1, 1]} : vector<2x16x8x32xbf16> to vector<2x14x8x32xbf16>
    %55 = vector.extract_strided_slice %26 {offsets = [0, 2, 0, 0], sizes = [2, 14, 8, 32], strides = [1, 1, 1, 1]} : vector<2x16x8x32xbf16> to vector<2x14x8x32xbf16>
    %56 = vector.extract_strided_slice %31 {offsets = [0, 2, 0, 0], sizes = [2, 14, 8, 32], strides = [1, 1, 1, 1]} : vector<2x16x8x32xbf16> to vector<2x14x8x32xbf16>
    %57 = tpu.concatenate %53, %54, %55, %56 in 3 : vector<2x14x8x32xbf16>, vector<2x14x8x32xbf16>, vector<2x14x8x32xbf16>, vector<2x14x8x32xbf16> -> vector<2x14x8x128xbf16>
    %58 = vector.shape_cast %57 : vector<2x14x8x128xbf16> to vector<224x128xbf16>
    %c2 = arith.constant 2 : index
    %c0_20 = arith.constant 0 : index
    %c0_21 = arith.constant 0 : index
    %59 = vector.load %arg4[%c2, %c0_20, %c0_21] : memref<3x128x128xbf16, #tpu.memory_space<vmem>>, vector<1x128x128xbf16>
    %60 = vector.shape_cast %59 : vector<1x128x128xbf16> to vector<128x128xbf16>
    %cst_22 = arith.constant dense<0.000000e+00> : vector<224x128xf32>
    %61 = tpu.matmul %58, %60, %cst_22 {dimension_numbers = #tpu.dot_dimension_numbers<[1], [0], [0], [1], [0, 0, 1, 1], [], []>} : vector<224x128xbf16>, vector<128x128xbf16>, vector<224x128xf32> -> vector<224x128xf32>
    %62 = arith.addf %52, %61 : vector<224x128xf32>
    %63 = vector.shape_cast %62 : vector<224x128xf32> to vector<2x14x8x128xf32>
    %64 = vector.extract_strided_slice %63 {offsets = [0, 0, 0, 0], sizes = [2, 14, 8, 64], strides = [1, 1, 1, 1]} : vector<2x14x8x128xf32> to vector<2x14x8x64xf32>
    %65 = vector.extract_strided_slice %63 {offsets = [0, 0, 0, 64], sizes = [2, 14, 8, 64], strides = [1, 1, 1, 1]} : vector<2x14x8x128xf32> to vector<2x14x8x64xf32>
    %66 = arith.maximumf %64, %65 : vector<2x14x8x64xf32>
    %67 = vector.shape_cast %66 : vector<2x14x8x64xf32> to vector<2x7x2x8x64xf32>
    %cst_23 = arith.constant dense<0xFF800000> : vector<2x7x8x64xf32>
    %68 = vector.multi_reduction <maximumf>, %67, %cst_23 [2] : vector<2x7x2x8x64xf32> to vector<2x7x8x64xf32>
    %c0_24 = arith.constant 0 : index
    %c0_25 = arith.constant 0 : index
    %69 = vector.load %arg5[%c0_24, %c0_25] : memref<1x64xf32, #tpu.memory_space<vmem>>, vector<1x64xf32>
    %70 = vector.shape_cast %69 : vector<1x64xf32> to vector<1x1x1x64xf32>
    %71 = vector.broadcast %70 : vector<1x1x1x64xf32> to vector<2x7x8x64xf32>
    %72 = arith.addf %68, %71 : vector<2x7x8x64xf32>
    %cst_26 = arith.constant 0.000000e+00 : f32
    %73 = vector.broadcast %cst_26 : f32 to vector<2x7x8x64xf32>
    %74 = arith.maximumf %72, %73 : vector<2x7x8x64xf32>
    %75 = arith.truncf %74 : vector<2x7x8x64xf32> to vector<2x7x8x64xbf16>
    %cst_27 = arith.constant 0.000000e+00 : bf16
    %76 = vector.broadcast %cst_27 : bf16 to vector<2x7x64xbf16>
    %77 = vector.extract_strided_slice %75 {offsets = [0, 0, 0, 0], sizes = [2, 7, 1, 64], strides = [1, 1, 1, 1]} : vector<2x7x8x64xbf16> to vector<2x7x1x64xbf16>
    %78 = vector.shape_cast %77 : vector<2x7x1x64xbf16> to vector<2x7x64xbf16>
    %79 = vector.extract_strided_slice %75 {offsets = [0, 0, 1, 0], sizes = [2, 7, 1, 64], strides = [1, 1, 1, 1]} : vector<2x7x8x64xbf16> to vector<2x7x1x64xbf16>
    %80 = vector.shape_cast %79 : vector<2x7x1x64xbf16> to vector<2x7x64xbf16>
    %81 = vector.extract_strided_slice %75 {offsets = [0, 0, 2, 0], sizes = [2, 7, 1, 64], strides = [1, 1, 1, 1]} : vector<2x7x8x64xbf16> to vector<2x7x1x64xbf16>
    %82 = vector.shape_cast %81 : vector<2x7x1x64xbf16> to vector<2x7x64xbf16>
    %83 = vector.extract_strided_slice %75 {offsets = [0, 0, 3, 0], sizes = [2, 7, 1, 64], strides = [1, 1, 1, 1]} : vector<2x7x8x64xbf16> to vector<2x7x1x64xbf16>
    %84 = vector.shape_cast %83 : vector<2x7x1x64xbf16> to vector<2x7x64xbf16>
    %85 = vector.extract_strided_slice %75 {offsets = [0, 0, 4, 0], sizes = [2, 7, 1, 64], strides = [1, 1, 1, 1]} : vector<2x7x8x64xbf16> to vector<2x7x1x64xbf16>
    %86 = vector.shape_cast %85 : vector<2x7x1x64xbf16> to vector<2x7x64xbf16>
    %87 = vector.extract_strided_slice %75 {offsets = [0, 0, 5, 0], sizes = [2, 7, 1, 64], strides = [1, 1, 1, 1]} : vector<2x7x8x64xbf16> to vector<2x7x1x64xbf16>
    %88 = vector.shape_cast %87 : vector<2x7x1x64xbf16> to vector<2x7x64xbf16>
    %89 = vector.extract_strided_slice %75 {offsets = [0, 0, 6, 0], sizes = [2, 7, 1, 64], strides = [1, 1, 1, 1]} : vector<2x7x8x64xbf16> to vector<2x7x1x64xbf16>
    %90 = vector.shape_cast %89 : vector<2x7x1x64xbf16> to vector<2x7x64xbf16>
    %91 = tpu.concatenate %78, %80, %82, %84, %86, %88, %90, %76 in 2 : vector<2x7x64xbf16>, vector<2x7x64xbf16>, vector<2x7x64xbf16>, vector<2x7x64xbf16>, vector<2x7x64xbf16>, vector<2x7x64xbf16>, vector<2x7x64xbf16>, vector<2x7x64xbf16> -> vector<2x7x512xbf16>
    %c0_28 = arith.constant 0 : index
    %c0_29 = arith.constant 0 : index
    %c0_30 = arith.constant 0 : index
    %92 = vector.load %arg7[%c0_28, %c0_29, %c0_30] : memref<2x7x512xbf16, #tpu.memory_space<vmem>>, vector<2x7x512xbf16>
    tpu.vector_store %arg7[%c0_28, %c0_29, %c0_30], %91 {strides = array<i32>} : memref<2x7x512xbf16, #tpu.memory_space<vmem>>, vector<2x7x512xbf16>,
    return
  }
  func.func @transform_0(%arg0: i32) -> (i32, i32, i32, i32) {
    %c0_i32 = arith.constant 0 : i32
    %c0_i32_0 = arith.constant 0 : i32
    %c0_i32_1 = arith.constant 0 : i32
    %c0_i32_2 = arith.constant 0 : i32
    return %arg0, %c0_i32, %c0_i32_0, %c0_i32_1 : i32, i32, i32, i32
  }
  func.func @transform_1(%arg0: i32) -> (i32, i32) {
    %c0_i32 = arith.constant 0 : i32
    %c0_i32_0 = arith.constant 0 : i32
    %c0_i32_1 = arith.constant 0 : i32
    return %c0_i32, %c0_i32_0 : i32, i32
  }
  func.func @transform_2(%arg0: i32) -> (i32, i32) {
    %c0_i32 = arith.constant 0 : i32
    %c0_i32_0 = arith.constant 0 : i32
    %c0_i32_1 = arith.constant 0 : i32
    return %c0_i32, %c0_i32_0 : i32, i32
  }
  func.func @transform_3(%arg0: i32) -> (i32, i32, i32) {
    %c0_i32 = arith.constant 0 : i32
    %c0_i32_0 = arith.constant 0 : i32
    %c0_i32_1 = arith.constant 0 : i32
    %c0_i32_2 = arith.constant 0 : i32
    return %c0_i32, %c0_i32_0, %c0_i32_1 : i32, i32, i32
  }
  func.func @transform_4(%arg0: i32) -> (i32, i32) {
    %c0_i32 = arith.constant 0 : i32
    %c0_i32_0 = arith.constant 0 : i32
    %c0_i32_1 = arith.constant 0 : i32
    return %c0_i32, %c0_i32_0 : i32, i32
  }
  func.func @transform_5(%arg0: i32) -> (i32, i32, i32) {
    %c0_i32 = arith.constant 0 : i32
    %c0_i32_0 = arith.constant 0 : i32
    %c0_i32_1 = arith.constant 0 : i32
    %c0_i32_2 = arith.constant 0 : i32
    return %c0_i32, %c0_i32_0, %c0_i32_1 : i32, i32, i32
  }
  func.func @transform_6(%arg0: i32) -> (i32, i32, i32) {
    %c0_i32 = arith.constant 0 : i32
    %c0_i32_0 = arith.constant 0 : i32
    %c0_i32_1 = arith.constant 0 : i32
    return %arg0, %c0_i32, %c0_i32_0 : i32, i32, i32
  }
}

module attributes {stable_mosaic.version = 11 : i64} {
  func.func @fc_kernel(%arg0: i32, %arg1: memref<2x3584xbf16, #tpu.memory_space<vmem>>, %arg2: memref<3584x128xbf16, #tpu.memory_space<vmem>>, %arg3: memref<1x128xf32, #tpu.memory_space<vmem>>, %arg4: memref<128x128xbf16, #tpu.memory_space<vmem>>, %arg5: memref<1x128xf32, #tpu.memory_space<vmem>>, %arg6: memref<2x128xf32, #tpu.memory_space<vmem>>) attributes {dimension_semantics = [#tpu.dimension_semantics<parallel>], iteration_bounds = array<i64: 1>, scalar_prefetch = 0 : i64, scratch_operands = 0 : i64, tpu.core_type = #tpu.core_type<tc>, window_params = [{transform_indices = @transform_0, window_bounds = array<i64: 2, 3584>}, {pipeline_mode = #tpu.pipeline_mode<synchronous>, transform_indices = @transform_1, window_bounds = array<i64: 3584, 128>}, {pipeline_mode = #tpu.pipeline_mode<synchronous>, transform_indices = @transform_2, window_bounds = array<i64: 1, 128>}, {pipeline_mode = #tpu.pipeline_mode<synchronous>, transform_indices = @transform_3, window_bounds = array<i64: 128, 128>}, {pipeline_mode = #tpu.pipeline_mode<synchronous>, transform_indices = @transform_4, window_bounds = array<i64: 1, 128>}, {transform_indices = @transform_5, window_bounds = array<i64: 2, 128>}]} {
    %c0 = arith.constant 0 : index
    %c0_0 = arith.constant 0 : index
    %0 = vector.load %arg1[%c0, %c0_0] : memref<2x3584xbf16, #tpu.memory_space<vmem>>, vector<2x3584xbf16>
    %c0_1 = arith.constant 0 : index
    %c0_2 = arith.constant 0 : index
    %1 = vector.load %arg2[%c0_1, %c0_2] : memref<3584x128xbf16, #tpu.memory_space<vmem>>, vector<3584x128xbf16>
    %cst = arith.constant dense<0.000000e+00> : vector<2x128xf32>
    %2 = tpu.matmul %0, %1, %cst {dimension_numbers = #tpu.dot_dimension_numbers<[1], [0], [0], [1], [0, 0, 1, 1], [], []>} : vector<2x3584xbf16>, vector<3584x128xbf16>, vector<2x128xf32> -> vector<2x128xf32>
    %c0_3 = arith.constant 0 : index
    %c0_4 = arith.constant 0 : index
    %3 = vector.load %arg3[%c0_3, %c0_4] : memref<1x128xf32, #tpu.memory_space<vmem>>, vector<1x128xf32>
    %4 = vector.broadcast %3 : vector<1x128xf32> to vector<2x128xf32>
    %5 = arith.addf %2, %4 : vector<2x128xf32>
    %cst_5 = arith.constant 0.000000e+00 : f32
    %6 = vector.broadcast %cst_5 : f32 to vector<2x128xf32>
    %7 = arith.maximumf %5, %6 : vector<2x128xf32>
    %8 = arith.truncf %7 : vector<2x128xf32> to vector<2x128xbf16>
    %c0_6 = arith.constant 0 : index
    %c0_7 = arith.constant 0 : index
    %9 = vector.load %arg4[%c0_6, %c0_7] : memref<128x128xbf16, #tpu.memory_space<vmem>>, vector<128x128xbf16>
    %cst_8 = arith.constant dense<0.000000e+00> : vector<2x128xf32>
    %10 = tpu.matmul %8, %9, %cst_8 {dimension_numbers = #tpu.dot_dimension_numbers<[1], [0], [0], [1], [0, 0, 1, 1], [], []>} : vector<2x128xbf16>, vector<128x128xbf16>, vector<2x128xf32> -> vector<2x128xf32>
    %c0_9 = arith.constant 0 : index
    %c0_10 = arith.constant 0 : index
    %11 = vector.load %arg5[%c0_9, %c0_10] : memref<1x128xf32, #tpu.memory_space<vmem>>, vector<1x128xf32>
    %12 = vector.broadcast %11 : vector<1x128xf32> to vector<2x128xf32>
    %13 = arith.addf %10, %12 : vector<2x128xf32>
    %c0_11 = arith.constant 0 : index
    %c0_12 = arith.constant 0 : index
    %14 = vector.load %arg6[%c0_11, %c0_12] : memref<2x128xf32, #tpu.memory_space<vmem>>, vector<2x128xf32>
    tpu.vector_store %arg6[%c0_11, %c0_12], %13 {strides = array<i32>} : memref<2x128xf32, #tpu.memory_space<vmem>>, vector<2x128xf32>,
    return
  }
  func.func @transform_0(%arg0: i32) -> (i32, i32) {
    %c0_i32 = arith.constant 0 : i32
    %c0_i32_0 = arith.constant 0 : i32
    return %arg0, %c0_i32 : i32, i32
  }
  func.func @transform_1(%arg0: i32) -> (i32, i32) {
    %c0_i32 = arith.constant 0 : i32
    %c0_i32_0 = arith.constant 0 : i32
    %c0_i32_1 = arith.constant 0 : i32
    return %c0_i32, %c0_i32_0 : i32, i32
  }
  func.func @transform_2(%arg0: i32) -> (i32, i32) {
    %c0_i32 = arith.constant 0 : i32
    %c0_i32_0 = arith.constant 0 : i32
    %c0_i32_1 = arith.constant 0 : i32
    return %c0_i32, %c0_i32_0 : i32, i32
  }
  func.func @transform_3(%arg0: i32) -> (i32, i32) {
    %c0_i32 = arith.constant 0 : i32
    %c0_i32_0 = arith.constant 0 : i32
    %c0_i32_1 = arith.constant 0 : i32
    return %c0_i32, %c0_i32_0 : i32, i32
  }
  func.func @transform_4(%arg0: i32) -> (i32, i32) {
    %c0_i32 = arith.constant 0 : i32
    %c0_i32_0 = arith.constant 0 : i32
    %c0_i32_1 = arith.constant 0 : i32
    return %c0_i32, %c0_i32_0 : i32, i32
  }
  func.func @transform_5(%arg0: i32) -> (i32, i32) {
    %c0_i32 = arith.constant 0 : i32
    %c0_i32_0 = arith.constant 0 : i32
    return %arg0, %c0_i32 : i32, i32
  }
}

</mosaic_0001>

<bundles_post_ra>
// kernel: cnn_forward.3
= control target key start
LH: loop header
LB: loop body
LE: loop exit
PB: predicated region body
PF: predicated region fallthrough
CT: control target
= control target key end

     0   :  { %v489_v28 = vlaneseq  ;;  %v3551_v36 = vmov 1966171168   ;;  %s4348_s0 = inlined_call_operand.vmem [shape: bf16[2,3584], index: 0, kind: input, shape index: {}]   ;;  %s4349_s1 = inlined_call_operand.vmem [shape: bf16[3584,128], index: 1, kind: input, shape index: {}]   ;;  %s4350_s2 = inlined_call_operand.vmem [shape: f32[1,128], index: 2, kind: input, shape index: {}]   ;;  %s4351_s3 = inlined_call_operand.vmem [shape: bf16[128,128], index: 3, kind: input, shape index: {}]   ;;  %s4352_s4 = inlined_call_operand.vmem [shape: f32[1,128], index: 4, kind: input, shape index: {}]   ;;  %s4353_s5 = inlined_call_operand.hbm [shape: f32[2,128], index: 5, kind: output, shape index: {}]  }
   0x1   :  { %v3292_v0 = vld [vmem:[%s4349_s1 + $0x40] sm:$0xff]   ;;  %v3296_v4 = vld [vmem:[%s4349_s1 + $0x48] sm:$0xff]   ;;  %v3300_v8 = vld [vmem:[%s4349_s1 + $0x50] sm:$0xff]   ;;  %v487_v37 = vunpack.c.l.s4 %v3551_v36 }
   0x2   :  { %v3293_v1 = vld [vmem:[%s4349_s1 + $0xc0] sm:$0xff]   ;;  %2951 = vmatprep.subr.bf16.mxu0 %v3292_v0  ;;  %v3297_v5 = vld [vmem:[%s4349_s1 + $0xc8] sm:$0xff]   ;;  %v3301_v9 = vld [vmem:[%s4349_s1 + $0xd0] sm:$0xff]   ;;  %v490_v33 = vshrl.u32 %v489_v28, 7 }
   0x3   :  { %v3294_v2 = vld [vmem:[%s4349_s1] sm:$0xff]   ;;  %2973 = vmatprep.subr.bf16.mxu1 %v3293_v1  ;;  %v3298_v6 = vld [vmem:[%s4349_s1 + $0x8] sm:$0xff]   ;;  %v3302_v10 = vld [vmem:[%s4349_s1 + $0x10] sm:$0xff]   ;;  %v488_v40 = vunpack.c.0.s8 %v487_v37 }
   0x4   :  { %v3295_v3 = vld [vmem:[%s4349_s1 + $0x80] sm:$0xff]   ;;  %2952 = vmatpush3.bf16.msra.mxu0 %v3294_v2  ;;  %v3299_v7 = vld [vmem:[%s4349_s1 + $0x88] sm:$0xff]   ;;  %v3303_v11 = vld [vmem:[%s4349_s1 + $0x90] sm:$0xff]  }
   0x5   :  { %2974 = vmatpush3.bf16.msra.mxu1 %v3295_v3  ;;  %2953 = vmatprep.subr.bf16.mxu0 %v3296_v4  ;;  %v3304_v12 = vld [vmem:[%s4349_s1 + $0x58] sm:$0xff]   ;;  %v3308_v16 = vld [vmem:[%s4349_s1 + $0x60] sm:$0xff]   ;;  %v3312_v20 = vld [vmem:[%s4349_s1 + $0x68] sm:$0xff]   ;;  %v3690_v41 = vsub.s32 %v488_v40, %v490_v33 }
   0x6   :  { %2975 = vmatprep.subr.bf16.mxu1 %v3297_v5  ;;  %v3305_v13 = vld [vmem:[%s4349_s1 + $0xd8] sm:$0xff]   ;;  %v3309_v17 = vld [vmem:[%s4349_s1 + $0xe0] sm:$0xff]   ;;  %v3313_v21 = vld [vmem:[%s4349_s1 + $0xe8] sm:$0xff]  }
   0x7   :  { %v3306_v14 = vld [vmem:[%s4349_s1 + $0x18] sm:$0xff]   ;;  %v3310_v18 = vld [vmem:[%s4349_s1 + $0x20] sm:$0xff]   ;;  %v3314_v22 = vld [vmem:[%s4349_s1 + $0x28] sm:$0xff]  }
   0x8   :  { %2954 = vmatpush3.bf16.msra.mxu0 %v3298_v6  ;;  %v3307_v15 = vld [vmem:[%s4349_s1 + $0x98] sm:$0xff]   ;;  %v3311_v19 = vld [vmem:[%s4349_s1 + $0xa0] sm:$0xff]   ;;  %v3315_v23 = vld [vmem:[%s4349_s1 + $0xa8] sm:$0xff]  }
   0x9   :  { %2976 = vmatpush3.bf16.msra.mxu1 %v3299_v7  ;;  %2955 = vmatprep.subr.bf16.mxu0 %v3300_v8  ;;  %v3316_v24 = vld [vmem:[%s4349_s1 + $0x70] sm:$0xff]   ;;  %v3320_v29 = vld [vmem:[%s4349_s1 + $0x78] sm:$0xff]   ;;  %v22_v34 = vld [vmem:[%s4348_s0] sm:$0xff] }
   0xa   :  { %2977 = vmatprep.subr.bf16.mxu1 %v3301_v9  ;;  %v3317_v25 = vld [vmem:[%s4349_s1 + $0xf0] sm:$0xff]   ;;  %v3321_v30 = vld [vmem:[%s4349_s1 + $0xf8] sm:$0xff]   ;;  %v3325_v35 = vld [vmem:[%s4349_s1 + $0x140] sm:$0xff]   ;;  %v485_v39 = vcombine.high %v22_v34, %v22_v34  ;;  %v492_v42 = vrot.slane %v22_v34, %v3690_v41 }
   0xb   :  { %v3318_v26 = vld [vmem:[%s4349_s1 + $0x30] sm:$0xff]   ;;  %v3322_v31 = vld [vmem:[%s4349_s1 + $0x38] sm:$0xff]   ;;  %v3326_v38 = vld [vmem:[%s4349_s1 + $0x1c0] sm:$0xff]  }
   0xc   :  { %2956 = vmatpush3.bf16.msra.mxu0 %v3302_v10  ;;  %v3319_v27 = vld [vmem:[%s4349_s1 + $0xb0] sm:$0xff]   ;;  %v3323_v32 = vld [vmem:[%s4349_s1 + $0xb8] sm:$0xff]   ;;  %v3694_v43 = vrot.slane %v485_v39, %v3690_v41  ;;  %v500_v44 = vcombine.high %v492_v42, %v492_v42  ;;  %v508_v45 = vrot.slane %v492_v42, %v3690_v41  ;;  %v3327_v47 = vld [vmem:[%s4349_s1 + $0x100] sm:$0xff]  }
   0xd   :  { %2978 = vmatpush3.bf16.msra.mxu1 %v3303_v11  ;;  %2957 = vmatprep.subr.bf16.mxu0 %v3304_v12  ;;  %v3328_v49 = vld [vmem:[%s4349_s1 + $0x180] sm:$0xff]   ;;  %v3329_v52 = vld [vmem:[%s4349_s1 + $0x148] sm:$0xff]   ;;  %v3333_v58 = vld [vmem:[%s4349_s1 + $0x150] sm:$0xff]  }
   0xe   :  { %2979 = vmatprep.subr.bf16.mxu1 %v3305_v13  ;;  %v501_v46 = vcombine.high %v3694_v43, %v3694_v43  ;;  %v522_v48 = vrot.slane %v500_v44, %v3690_v41  ;;  %v530_v51 = vcombine.high %v508_v45, %v508_v45  ;;  %v3330_v54 = vld [vmem:[%s4349_s1 + $0x1c8] sm:$0xff]   ;;  %v3334_v59 = vld [vmem:[%s4349_s1 + $0x1d0] sm:$0xff]   ;;  %v3337_v62 = vld [vmem:[%s4349_s1 + $0x158] sm:$0xff]  }
   0xf   :  { %v3331_v55 = vld [vmem:[%s4349_s1 + $0x108] sm:$0xff]   ;;  %v3335_v60 = vld [vmem:[%s4349_s1 + $0x110] sm:$0xff]   ;;  %v3338_v63 = vld [vmem:[%s4349_s1 + $0x1d8] sm:$0xff]  }
  0x10   :  { %2958 = vmatpush3.bf16.msra.mxu0 %v3306_v14  ;;  %v529_v50 = vrot.slane %v501_v46, %v3690_v41  ;;  %2060 = vmatprep.mubr.bf16.mxu0 %v522_v48  ;;  %v532_v53 = vcombine.high %v522_v48, %v522_v48  ;;  %v3332_v57 = vld [vmem:[%s4349_s1 + $0x188] sm:$0xff]   ;;  %v3336_v61 = vld [vmem:[%s4349_s1 + $0x190] sm:$0xff]   ;;  %v3339_v0 = vld [vmem:[%s4349_s1 + $0x118] sm:$0xff]  }
  0x11   :  { %2980 = vmatpush3.bf16.msra.mxu1 %v3307_v15  ;;  %2959 = vmatprep.subr.bf16.mxu0 %v3308_v16  ;;  %v3340_v1 = vld [vmem:[%s4349_s1 + $0x198] sm:$0xff]   ;;  %v3341_v2 = vld [vmem:[%s4349_s1 + $0x160] sm:$0xff]   ;;  %v3345_v6 = vld [vmem:[%s4349_s1 + $0x168] sm:$0xff]  }
  0x12   :  { %2981 = vmatprep.subr.bf16.mxu1 %v3309_v17  ;;  %v533_v56 = vcombine.high %v529_v50, %v529_v50  ;;  %2100 = vmatprep.mubr.bf16.mxu1 %v532_v53  ;;  %v3342_v3 = vld [vmem:[%s4349_s1 + $0x1e0] sm:$0xff]   ;;  %v3346_v7 = vld [vmem:[%s4349_s1 + $0x1e8] sm:$0xff]   ;;  %v3349_v10 = vld [vmem:[%s4349_s1 + $0x170] sm:$0xff]  }
  0x13   :  { %v3343_v4 = vld [vmem:[%s4349_s1 + $0x120] sm:$0xff]   ;;  %v3347_v8 = vld [vmem:[%s4349_s1 + $0x128] sm:$0xff]   ;;  %v3350_v11 = vld [vmem:[%s4349_s1 + $0x1f0] sm:$0xff]  }
  0x14   :  { %2960 = vmatpush3.bf16.msra.mxu0 %v3310_v18  ;;  %v3344_v5 = vld [vmem:[%s4349_s1 + $0x1a0] sm:$0xff]   ;;  %v3348_v9 = vld [vmem:[%s4349_s1 + $0x1a8] sm:$0xff]   ;;  %v3351_v12 = vld [vmem:[%s4349_s1 + $0x130] sm:$0xff]   ;;  %v515_v18 = vrot.slane %v3694_v43, %v3690_v41 }
  0x15   :  { %2982 = vmatpush3.bf16.msra.mxu1 %v3311_v19  ;;  %2961 = vmatprep.subr.bf16.mxu0 %v3312_v20  ;;  %v3352_v13 = vld [vmem:[%s4349_s1 + $0x1b0] sm:$0xff]   ;;  %v3353_v14 = vld [vmem:[%s4349_s1 + $0x178] sm:$0xff]   ;;  %v3357_v19 = vld [vmem:[%s4349_s1 + $0x240] sm:$0xff]  }
  0x16   :  { %2983 = vmatprep.subr.bf16.mxu1 %v3313_v21  ;;  %v3354_v15 = vld [vmem:[%s4349_s1 + $0x1f8] sm:$0xff]   ;;  %v3358_v20 = vld [vmem:[%s4349_s1 + $0x2c0] sm:$0xff]   ;;  %v3365_v28 = vld [vmem:[%s4349_s1 + $0x250] sm:$0xff]  }
  0x17   :  { %v3355_v16 = vld [vmem:[%s4349_s1 + $0x138] sm:$0xff]   ;;  %v3359_v21 = vld [vmem:[%s4349_s1 + $0x200] sm:$0xff]   ;;  %v3377_v40 = vld [vmem:[%s4349_s1 + $0x268] sm:$0xff]  }
  0x18   :  { %2962 = vmatpush3.bf16.msra.mxu0 %v3314_v22  ;;  %v3356_v17 = vld [vmem:[%s4349_s1 + $0x1b8] sm:$0xff]   ;;  %v3360_v22 = vld [vmem:[%s4349_s1 + $0x280] sm:$0xff]   ;;  %v3378_v42 = vld [vmem:[%s4349_s1 + $0x2e8] sm:$0xff]  }
  0x19   :  { %2984 = vmatpush3.bf16.msra.mxu1 %v3315_v23  ;;  %2963 = vmatprep.subr.bf16.mxu0 %v3316_v24  ;;  %v531_v23 = vcombine.high %v515_v18, %v515_v18  ;;  %v3361_v24 = vld [vmem:[%s4349_s1 + $0x248] sm:$0xff]   ;;  %v3370_v33 = vld [vmem:[%s4349_s1 + $0x2d8] sm:$0xff]   ;;  %v3373_v36 = vld [vmem:[%s4349_s1 + $0x260] sm:$0xff]  }
  0x1a   :  { %2985 = vmatprep.subr.bf16.mxu1 %v3317_v25  ;;  %v3362_v25 = vld [vmem:[%s4349_s1 + $0x2c8] sm:$0xff]   ;;  %v3371_v34 = vld [vmem:[%s4349_s1 + $0x218] sm:$0xff]   ;;  %v3374_v37 = vld [vmem:[%s4349_s1 + $0x2e0] sm:$0xff]  }
  0x1b   :  { %v3376_v39 = vld [vmem:[%s4349_s1 + $0x2a0] sm:$0xff]   ;;  %v3379_v43 = vld [vmem:[%s4349_s1 + $0x228] sm:$0xff]  }
  0x1c   :  { %2964 = vmatpush3.bf16.msra.mxu0 %v3318_v26  ;;  %v3363_v26 = vld [vmem:[%s4349_s1 + $0x208] sm:$0xff]  }
  0x1d   :  { %2986 = vmatpush3.bf16.msra.mxu1 %v3319_v27  ;;  %2965 = vmatprep.subr.bf16.mxu0 %v3320_v29  ;;  %v3364_v27 = vld [vmem:[%s4349_s1 + $0x288] sm:$0xff]   ;;  %v3366_v29 = vld [vmem:[%s4349_s1 + $0x2d0] sm:$0xff]  }
  0x1e   :  { %2987 = vmatprep.subr.bf16.mxu1 %v3321_v30  ;;  %v3367_v30 = vld [vmem:[%s4349_s1 + $0x210] sm:$0xff]   ;;  %v3380_v44 = vld [vmem:[%s4349_s1 + $0x2a8] sm:$0xff]  }
  0x1f   :  { %v23_v46 = vld [vmem:[%s4348_s0 + $0x8] sm:$0xff] }
  0x20   :  { %2966 = vmatpush3.bf16.msra.mxu0 %v3322_v31  ;;  %v3368_v31 = vld [vmem:[%s4349_s1 + $0x290] sm:$0xff]   ;;  %v541_v48 = vrot.slane %v23_v46, %v3690_v41 }
  0x21   :  { %2988 = vmatpush3.bf16.msra.mxu1 %v3323_v32  ;;  %2995 = vmatprep.subr.bf16.mxu0 %v3325_v35  ;;  %v3369_v32 = vld [vmem:[%s4349_s1 + $0x258] sm:$0xff]  }
  0x22   :  { %3017 = vmatprep.subr.bf16.mxu1 %v3326_v38  ;;  %v3372_v35 = vld [vmem:[%s4349_s1 + $0x298] sm:$0xff]   ;;  %v3375_v38 = vld [vmem:[%s4349_s1 + $0x220] sm:$0xff]  }
  0x23   :  { %2061 = vmatmul.mubr.bf16.vlgmr.msra.gmra.mrb[0].mxu0 %v508_v45  ;;  %v3381_v45 = vld [vmem:[%s4349_s1 + $0x270] sm:$0xff]  }
  0x24   :  { %2996 = vmatpush3.bf16.msra.mxu0 %v3327_v47  ;;  %2101 = vmatmul.mubr.bf16.vlgmr.msra.gmra.mrb[0].mxu1 %v530_v51  ;;  %v3382_v47 = vld [vmem:[%s4349_s1 + $0x2f0] sm:$0xff]  }
  0x25   :  { %2997 = vmatprep.subr.bf16.mxu0 %v3329_v52  ;;  %3018 = vmatpush3.bf16.msra.mxu1 %v3328_v49  ;;  %v534_v49 = vcombine.high %v23_v46, %v23_v46  ;;  %v3384_v51 = vld [vmem:[%s4349_s1 + $0x2b0] sm:$0xff]   ;;  %v549_v52 = vcombine.high %v541_v48, %v541_v48 }
  0x26   :  { %2140 = vmatprep.mubr.bf16.mxu0 %v529_v50  ;;  %3019 = vmatprep.subr.bf16.mxu1 %v3330_v54  ;;  %v3383_v50 = vld [vmem:[%s4349_s1 + $0x230] sm:$0xff]   ;;  %v3385_v54 = vld [vmem:[%s4349_s1 + $0x278] sm:$0xff]  }
  0x27   :  { %2180 = vmatprep.mubr.bf16.mxu1 %v533_v56  ;;  %v3882_v53 = vrot.slane %v534_v49, %v3690_v41  ;;  %v571_v56 = vrot.slane %v549_v52, %v3690_v41  ;;  %v3432_v46 = vld [vmem:[%s4349_s1 + $0x410] sm:$0xff]   ;;  %v3435_v49 = vld [vmem:[%s4349_s1 + $0x4d8] sm:$0xff]   ;;  %v3438_v52 = vld [vmem:[%s4349_s1 + $0x460] sm:$0xff]  }
  0x28   :  { %2998 = vmatpush3.bf16.msra.mxu0 %v3331_v55  ;;  %v3386_v55 = vld [vmem:[%s4349_s1 + $0x2f8] sm:$0xff]  }
  0x29   :  { %2999 = vmatprep.subr.bf16.mxu0 %v3333_v58  ;;  %3020 = vmatpush3.bf16.msra.mxu1 %v3332_v57  ;;  %v550_v57 = vcombine.high %v3882_v53, %v3882_v53  ;;  %v3387_v58 = vld [vmem:[%s4349_s1 + $0x238] sm:$0xff]  }
  0x2a   :  { %3021 = vmatprep.subr.bf16.mxu1 %v3334_v59  ;;  %v3388_v59 = vld [vmem:[%s4349_s1 + $0x2b8] sm:$0xff]  }
  0x2c   :  { %3000 = vmatpush3.bf16.msra.mxu0 %v3335_v60  ;;  %v581_v60 = vcombine.high %v571_v56, %v571_v56 }
  0x2d   :  { %3001 = vmatprep.subr.bf16.mxu0 %v3337_v62  ;;  %3022 = vmatpush3.bf16.msra.mxu1 %v3336_v61  ;;  %v557_v61 = vrot.slane %v541_v48, %v3690_v41  ;;  %v3389_v62 = vld [vmem:[%s4349_s1 + $0x340] sm:$0xff]   ;;  %v3434_v48 = vld [vmem:[%s4349_s1 + $0x458] sm:$0xff]  }
  0x2e   :  { %3023 = vmatprep.subr.bf16.mxu1 %v3338_v63  ;;  %v3390_v63 = vld [vmem:[%s4349_s1 + $0x3c0] sm:$0xff]  }
  0x30   :  { %3002 = vmatpush3.bf16.msra.mxu0 %v3339_v0  ;;  %v578_v0 = vrot.slane %v550_v57, %v3690_v41  ;;  %v3443_v57 = vld [vmem:[%s4349_s1 + $0x4e8] sm:$0xff]  }
  0x31   :  { %3003 = vmatprep.subr.bf16.mxu0 %v3341_v2  ;;  %3024 = vmatpush3.bf16.msra.mxu1 %v3340_v1  ;;  %v3391_v1 = vld [vmem:[%s4349_s1 + $0x300] sm:$0xff]  }
  0x32   :  { %3025 = vmatprep.subr.bf16.mxu1 %v3342_v3  ;;  %v3392_v2 = vld [vmem:[%s4349_s1 + $0x380] sm:$0xff]   ;;  %v579_v3 = vcombine.high %v557_v61, %v557_v61 }
  0x34   :  { %3004 = vmatpush3.bf16.msra.mxu0 %v3343_v4  ;;  %v3393_v4 = vld [vmem:[%s4349_s1 + $0x348] sm:$0xff]  }
  0x35   :  { %3005 = vmatprep.subr.bf16.mxu0 %v3345_v6  ;;  %3026 = vmatpush3.bf16.msra.mxu1 %v3344_v5  ;;  %v3394_v5 = vld [vmem:[%s4349_s1 + $0x3c8] sm:$0xff]   ;;  %v582_v6 = vcombine.high %v578_v0, %v578_v0 }
  0x36   :  { %3027 = vmatprep.subr.bf16.mxu1 %v3346_v7  ;;  %v3395_v7 = vld [vmem:[%s4349_s1 + $0x308] sm:$0xff]  }
  0x38   :  { %3006 = vmatpush3.bf16.msra.mxu0 %v3347_v8  ;;  %v3396_v8 = vld [vmem:[%s4349_s1 + $0x388] sm:$0xff]  }
  0x39   :  { %3007 = vmatprep.subr.bf16.mxu0 %v3349_v10  ;;  %3028 = vmatpush3.bf16.msra.mxu1 %v3348_v9  ;;  %v3397_v9 = vld [vmem:[%s4349_s1 + $0x350] sm:$0xff]  }
  0x3a   :  { %3029 = vmatprep.subr.bf16.mxu1 %v3350_v11  ;;  %v3398_v10 = vld [vmem:[%s4349_s1 + $0x3d0] sm:$0xff]  }
  0x3b   :  { %v3399_v11 = vld [vmem:[%s4349_s1 + $0x310] sm:$0xff]  }
  0x3c   :  { %3008 = vmatpush3.bf16.msra.mxu0 %v3351_v12  ;;  %v3400_v12 = vld [vmem:[%s4349_s1 + $0x390] sm:$0xff]  }
  0x3d   :  { %3009 = vmatprep.subr.bf16.mxu0 %v3353_v14  ;;  %3030 = vmatpush3.bf16.msra.mxu1 %v3352_v13  ;;  %v3401_v13 = vld [vmem:[%s4349_s1 + $0x358] sm:$0xff]  }
  0x3e   :  { %3031 = vmatprep.subr.bf16.mxu1 %v3354_v15  ;;  %v3402_v14 = vld [vmem:[%s4349_s1 + $0x3d8] sm:$0xff]  }
  0x3f   :  { %v3403_v15 = vld [vmem:[%s4349_s1 + $0x318] sm:$0xff]  }
  0x40   :  { %3010 = vmatpush3.bf16.msra.mxu0 %v3355_v16  ;;  %v3404_v16 = vld [vmem:[%s4349_s1 + $0x398] sm:$0xff]  }
  0x41   :  { %3039 = vmatprep.subr.bf16.mxu0 %v3357_v19  ;;  %3032 = vmatpush3.bf16.msra.mxu1 %v3356_v17  ;;  %v3405_v17 = vld [vmem:[%s4349_s1 + $0x360] sm:$0xff]  }
  0x42   :  { %3061 = vmatprep.subr.bf16.mxu1 %v3358_v20  ;;  %v3407_v19 = vld [vmem:[%s4349_s1 + $0x320] sm:$0xff]  }
  0x43   :  { %2141 = vmatmul.mubr.bf16.vlgmr.msra.gmra.mrb[4].mxu0 %v515_v18  ;;  %v3406_v18 = vld [vmem:[%s4349_s1 + $0x3e0] sm:$0xff]  }
  0x44   :  { %3040 = vmatpush3.bf16.msra.mxu0 %v3359_v21  ;;  %2181 = vmatmul.mubr.bf16.vlgmr.msra.gmra.mrb[4].mxu1 %v531_v23  ;;  %v3408_v20 = vld [vmem:[%s4349_s1 + $0x3a0] sm:$0xff]   ;;  %v3409_v21 = vld [vmem:[%s4349_s1 + $0x368] sm:$0xff]  }
  0x45   :  { %3041 = vmatprep.subr.bf16.mxu0 %v3361_v24  ;;  %3062 = vmatpush3.bf16.msra.mxu1 %v3360_v22  ;;  %v3410_v22 = vld [vmem:[%s4349_s1 + $0x3e8] sm:$0xff]  }
  0x46   :  { %3063 = vmatprep.subr.bf16.mxu1 %v3362_v25  ;;  %2220 = vmatprep.mubr.bf16.mxu0 %v571_v56  ;;  %v3411_v23 = vld [vmem:[%s4349_s1 + $0x328] sm:$0xff]   ;;  %v3413_v25 = vld [vmem:[%s4349_s1 + $0x370] sm:$0xff]  }
  0x47   :  { %2260 = vmatprep.mubr.bf16.mxu1 %v581_v60  ;;  %v3412_v24 = vld [vmem:[%s4349_s1 + $0x3a8] sm:$0xff]   ;;  %v3446_v60 = vld [vmem:[%s4349_s1 + $0x470] sm:$0xff]  }
  0x48   :  { %3042 = vmatpush3.bf16.msra.mxu0 %v3363_v26  ;;  %v3414_v26 = vld [vmem:[%s4349_s1 + $0x3f0] sm:$0xff]   ;;  %v3442_v56 = vld [vmem:[%s4349_s1 + $0x468] sm:$0xff]  }
  0x49   :  { %3043 = vmatprep.subr.bf16.mxu0 %v3365_v28  ;;  %3064 = vmatpush3.bf16.msra.mxu1 %v3364_v27  ;;  %v3415_v27 = vld [vmem:[%s4349_s1 + $0x330] sm:$0xff]  }
  0x4a   :  { %3065 = vmatprep.subr.bf16.mxu1 %v3366_v29  ;;  %v3416_v28 = vld [vmem:[%s4349_s1 + $0x3b0] sm:$0xff]   ;;  %v3417_v29 = vld [vmem:[%s4349_s1 + $0x378] sm:$0xff]  }
  0x4c   :  { %3044 = vmatpush3.bf16.msra.mxu0 %v3367_v30  ;;  %v3418_v30 = vld [vmem:[%s4349_s1 + $0x3f8] sm:$0xff]  }
  0x4d   :  { %3045 = vmatprep.subr.bf16.mxu0 %v3369_v32  ;;  %3066 = vmatpush3.bf16.msra.mxu1 %v3368_v31  ;;  %v3419_v31 = vld [vmem:[%s4349_s1 + $0x338] sm:$0xff]  }
  0x4e   :  { %3067 = vmatprep.subr.bf16.mxu1 %v3370_v33  ;;  %v3420_v32 = vld [vmem:[%s4349_s1 + $0x3b8] sm:$0xff]   ;;  %v564_v33 = vrot.slane %v3882_v53, %v3690_v41  ;;  %v3439_v53 = vld [vmem:[%s4349_s1 + $0x4e0] sm:$0xff]  }
  0x50   :  { %3046 = vmatpush3.bf16.msra.mxu0 %v3371_v34  ;;  %v3422_v34 = vld [vmem:[%s4349_s1 + $0x440] sm:$0xff]  }
  0x51   :  { %3047 = vmatprep.subr.bf16.mxu0 %v3373_v36  ;;  %3068 = vmatpush3.bf16.msra.mxu1 %v3372_v35  ;;  %v3423_v35 = vld [vmem:[%s4349_s1 + $0x4c0] sm:$0xff]  }
  0x52   :  { %3069 = vmatprep.subr.bf16.mxu1 %v3374_v37  ;;  %v3424_v36 = vld [vmem:[%s4349_s1 + $0x400] sm:$0xff]  }
  0x53   :  { %v3425_v37 = vld [vmem:[%s4349_s1 + $0x480] sm:$0xff]  }
  0x54   :  { %3048 = vmatpush3.bf16.msra.mxu0 %v3375_v38  ;;  %v580_v38 = vcombine.high %v564_v33, %v564_v33 }
  0x55   :  { %3049 = vmatprep.subr.bf16.mxu0 %v3377_v40  ;;  %3070 = vmatpush3.bf16.msra.mxu1 %v3376_v39  ;;  %v3426_v39 = vld [vmem:[%s4349_s1 + $0x448] sm:$0xff]  }
  0x56   :  { %3071 = vmatprep.subr.bf16.mxu1 %v3378_v42  ;;  %v3427_v40 = vld [vmem:[%s4349_s1 + $0x4c8] sm:$0xff]  }
  0x57   :  { %v3428_v42 = vld [vmem:[%s4349_s1 + $0x408] sm:$0xff]  }
  0x58   :  { %3050 = vmatpush3.bf16.msra.mxu0 %v3379_v43  ;;  %v3429_v43 = vld [vmem:[%s4349_s1 + $0x488] sm:$0xff]  }
  0x59   :  { %3051 = vmatprep.subr.bf16.mxu0 %v3381_v45  ;;  %3072 = vmatpush3.bf16.msra.mxu1 %v3380_v44  ;;  %v3430_v44 = vld [vmem:[%s4349_s1 + $0x450] sm:$0xff]  }
  0x5a   :  { %3073 = vmatprep.subr.bf16.mxu1 %v3382_v47  ;;  %v3431_v45 = vld [vmem:[%s4349_s1 + $0x4d0] sm:$0xff]  }
  0x5b   :  { %v3433_v47 = vld [vmem:[%s4349_s1 + $0x490] sm:$0xff]  }
  0x5c   :  { %3052 = vmatpush3.bf16.msra.mxu0 %v3383_v50  ;;  %v3436_v50 = vld [vmem:[%s4349_s1 + $0x418] sm:$0xff]  }
  0x5d   :  { %3053 = vmatprep.subr.bf16.mxu0 %v3385_v54  ;;  %3074 = vmatpush3.bf16.msra.mxu1 %v3384_v51  ;;  %v3437_v51 = vld [vmem:[%s4349_s1 + $0x498] sm:$0xff]   ;;  %v3440_v54 = vld [vmem:[%s4349_s1 + $0x420] sm:$0xff]  }
  0x5e   :  { %3075 = vmatprep.subr.bf16.mxu1 %v3386_v55  ;;  %v3441_v55 = vld [vmem:[%s4349_s1 + $0x4a0] sm:$0xff]  }
  0x60   :  { %3054 = vmatpush3.bf16.msra.mxu0 %v3387_v58  ;;  %v3444_v58 = vld [vmem:[%s4349_s1 + $0x428] sm:$0xff]  }
  0x61   :  { %3083 = vmatprep.subr.bf16.mxu0 %v3389_v62  ;;  %3076 = vmatpush3.bf16.msra.mxu1 %v3388_v59  ;;  %v3445_v59 = vld [vmem:[%s4349_s1 + $0x4a8] sm:$0xff]   ;;  %v3447_v62 = vld [vmem:[%s4349_s1 + $0x4f0] sm:$0xff]  }
  0x62   :  { %3105 = vmatprep.subr.bf16.mxu1 %v3390_v63 }
  0x63   :  { %2221 = vmatmul.mubr.bf16.vlgmr.msra.gmra.mrb[8].mxu0 %v557_v61  ;;  %v24_v61 = vld [vmem:[%s4348_s0 + $0x10] sm:$0xff] }
  0x64   :  { %3084 = vmatpush3.bf16.msra.mxu0 %v3391_v1  ;;  %2300 = vmatprep.mubr.bf16.mxu0 %v578_v0  ;;  %v590_v63 = vrot.slane %v24_v61, %v3690_v41  ;;  %v583_v0 = vcombine.high %v24_v61, %v24_v61  ;;  %v3448_v1 = vld [vmem:[%s4349_s1 + $0x430] sm:$0xff]  }
  0x65   :  { %2261 = vmatmul.mubr.bf16.vlgmr.msra.gmra.mrb[8].mxu1 %v579_v3  ;;  %3085 = vmatprep.subr.bf16.mxu0 %v3393_v4  ;;  %v3497_v61 = vld [vmem:[%s4349_s1 + $0x610] sm:$0xff]  }
  0x66   :  { %3106 = vmatpush3.bf16.msra.mxu1 %v3392_v2  ;;  %2340 = vmatprep.mubr.bf16.mxu1 %v582_v6  ;;  %v3449_v2 = vld [vmem:[%s4349_s1 + $0x4b0] sm:$0xff]   ;;  %v598_v3 = vcombine.high %v590_v63, %v590_v63  ;;  %v4088_v4 = vrot.slane %v583_v0, %v3690_v41  ;;  %v3451_v6 = vld [vmem:[%s4349_s1 + $0x4f8] sm:$0xff]  }
  0x67   :  { %3107 = vmatprep.subr.bf16.mxu1 %v3394_v5  ;;  %v3450_v5 = vld [vmem:[%s4349_s1 + $0x478] sm:$0xff]  }
  0x68   :  { %3086 = vmatpush3.bf16.msra.mxu0 %v3395_v7  ;;  %v620_v7 = vrot.slane %v598_v3, %v3690_v41  ;;  %v3500_v0 = vld [vmem:[%s4349_s1 + $0x6d8] sm:$0xff]   ;;  %v3503_v3 = vld [vmem:[%s4349_s1 + $0x660] sm:$0xff]  }
  0x69   :  { %3087 = vmatprep.subr.bf16.mxu0 %v3397_v9  ;;  %v3452_v9 = vld [vmem:[%s4349_s1 + $0x438] sm:$0xff]  }
  0x6a   :  { %3108 = vmatpush3.bf16.msra.mxu1 %v3396_v8  ;;  %v599_v8 = vcombine.high %v4088_v4, %v4088_v4 }
  0x6b   :  { %3109 = vmatprep.subr.bf16.mxu1 %v3398_v10  ;;  %v3453_v10 = vld [vmem:[%s4349_s1 + $0x4b8] sm:$0xff]  }
  0x6c   :  { %3088 = vmatpush3.bf16.msra.mxu0 %v3399_v11  ;;  %v630_v11 = vcombine.high %v620_v7, %v620_v7 }
  0x6d   :  { %3089 = vmatprep.subr.bf16.mxu0 %v3401_v13  ;;  %v3454_v13 = vld [vmem:[%s4349_s1 + $0x540] sm:$0xff]  }
  0x6e   :  { %3110 = vmatpush3.bf16.msra.mxu1 %v3400_v12  ;;  %v606_v12 = vrot.slane %v590_v63, %v3690_v41  ;;  %v3499_v63 = vld [vmem:[%s4349_s1 + $0x658] sm:$0xff]  }
  0x6f   :  { %3111 = vmatprep.subr.bf16.mxu1 %v3402_v14  ;;  %v3455_v14 = vld [vmem:[%s4349_s1 + $0x5c0] sm:$0xff]  }
  0x70   :  { %3090 = vmatpush3.bf16.msra.mxu0 %v3403_v15  ;;  %v627_v15 = vrot.slane %v599_v8, %v3690_v41  ;;  %v3508_v8 = vld [vmem:[%s4349_s1 + $0x6e8] sm:$0xff]  }
  0x71   :  { %3091 = vmatprep.subr.bf16.mxu0 %v3405_v17  ;;  %v3457_v17 = vld [vmem:[%s4349_s1 + $0x580] sm:$0xff]  }
  0x72   :  { %3112 = vmatpush3.bf16.msra.mxu1 %v3404_v16  ;;  %v3456_v16 = vld [vmem:[%s4349_s1 + $0x500] sm:$0xff]  }
  0x73   :  { %3113 = vmatprep.subr.bf16.mxu1 %v3406_v18  ;;  %v628_v18 = vcombine.high %v606_v12, %v606_v12 }
  0x74   :  { %3092 = vmatpush3.bf16.msra.mxu0 %v3407_v19  ;;  %v3458_v19 = vld [vmem:[%s4349_s1 + $0x548] sm:$0xff]  }
  0x75   :  { %3093 = vmatprep.subr.bf16.mxu0 %v3409_v21  ;;  %v631_v21 = vcombine.high %v627_v15, %v627_v15 }
  0x76   :  { %3114 = vmatpush3.bf16.msra.mxu1 %v3408_v20  ;;  %v3459_v20 = vld [vmem:[%s4349_s1 + $0x5c8] sm:$0xff]  }
  0x77   :  { %3115 = vmatprep.subr.bf16.mxu1 %v3410_v22  ;;  %v3460_v22 = vld [vmem:[%s4349_s1 + $0x508] sm:$0xff]  }
  0x78   :  { %3094 = vmatpush3.bf16.msra.mxu0 %v3411_v23  ;;  %v3461_v23 = vld [vmem:[%s4349_s1 + $0x588] sm:$0xff]  }
  0x79   :  { %3095 = vmatprep.subr.bf16.mxu0 %v3413_v25  ;;  %v3463_v25 = vld [vmem:[%s4349_s1 + $0x5d0] sm:$0xff]  }
  0x7a   :  { %3116 = vmatpush3.bf16.msra.mxu1 %v3412_v24  ;;  %v3462_v24 = vld [vmem:[%s4349_s1 + $0x550] sm:$0xff]  }
  0x7b   :  { %3117 = vmatprep.subr.bf16.mxu1 %v3414_v26  ;;  %v3464_v26 = vld [vmem:[%s4349_s1 + $0x510] sm:$0xff]  }
  0x7c   :  { %3096 = vmatpush3.bf16.msra.mxu0 %v3415_v27  ;;  %v3465_v27 = vld [vmem:[%s4349_s1 + $0x590] sm:$0xff]  }
  0x7d   :  { %3097 = vmatprep.subr.bf16.mxu0 %v3417_v29  ;;  %v3467_v29 = vld [vmem:[%s4349_s1 + $0x5d8] sm:$0xff]  }
  0x7e   :  { %3118 = vmatpush3.bf16.msra.mxu1 %v3416_v28  ;;  %v3466_v28 = vld [vmem:[%s4349_s1 + $0x558] sm:$0xff]  }
  0x7f   :  { %3119 = vmatprep.subr.bf16.mxu1 %v3418_v30  ;;  %v3468_v30 = vld [vmem:[%s4349_s1 + $0x518] sm:$0xff]  }
  0x80   :  { %3098 = vmatpush3.bf16.msra.mxu0 %v3419_v31  ;;  %v3469_v31 = vld [vmem:[%s4349_s1 + $0x598] sm:$0xff]  }
  0x81   :  { %3127 = vmatprep.subr.bf16.mxu0 %v3422_v34  ;;  %v3472_v34 = vld [vmem:[%s4349_s1 + $0x520] sm:$0xff]  }
  0x82   :  { %3120 = vmatpush3.bf16.msra.mxu1 %v3420_v32  ;;  %v3470_v32 = vld [vmem:[%s4349_s1 + $0x560] sm:$0xff]  }
  0x83   :  { %2301 = vmatmul.mubr.bf16.vlgmr.msra.gmra.mrb[12].mxu0 %v564_v33  ;;  %3149 = vmatprep.subr.bf16.mxu1 %v3423_v35  ;;  %v3471_v33 = vld [vmem:[%s4349_s1 + $0x5e0] sm:$0xff]  }
  0x84   :  { %3128 = vmatpush3.bf16.msra.mxu0 %v3424_v36  ;;  %2380 = vmatprep.mubr.bf16.mxu0 %v620_v7  ;;  %v3473_v35 = vld [vmem:[%s4349_s1 + $0x5a0] sm:$0xff]   ;;  %v3474_v36 = vld [vmem:[%s4349_s1 + $0x568] sm:$0xff]  }
  0x85   :  { %2341 = vmatmul.mubr.bf16.vlgmr.msra.gmra.mrb[12].mxu1 %v580_v38  ;;  %3129 = vmatprep.subr.bf16.mxu0 %v3426_v39  ;;  %v3476_v38 = vld [vmem:[%s4349_s1 + $0x528] sm:$0xff]  }
  0x86   :  { %3150 = vmatpush3.bf16.msra.mxu1 %v3425_v37  ;;  %2420 = vmatprep.mubr.bf16.mxu1 %v630_v11  ;;  %v3475_v37 = vld [vmem:[%s4349_s1 + $0x5e8] sm:$0xff]   ;;  %v3511_v11 = vld [vmem:[%s4349_s1 + $0x670] sm:$0xff]  }
  0x87   :  { %3151 = vmatprep.subr.bf16.mxu1 %v3427_v40  ;;  %v3477_v39 = vld [vmem:[%s4349_s1 + $0x5a8] sm:$0xff]   ;;  %v3478_v40 = vld [vmem:[%s4349_s1 + $0x570] sm:$0xff]  }
  0x88   :  { %3130 = vmatpush3.bf16.msra.mxu0 %v3428_v42  ;;  %v3479_v42 = vld [vmem:[%s4349_s1 + $0x5f0] sm:$0xff]   ;;  %v3507_v7 = vld [vmem:[%s4349_s1 + $0x668] sm:$0xff]  }
  0x89   :  { %3131 = vmatprep.subr.bf16.mxu0 %v3430_v44  ;;  %v3481_v44 = vld [vmem:[%s4349_s1 + $0x5b0] sm:$0xff]  }
  0x8a   :  { %3152 = vmatpush3.bf16.msra.mxu1 %v3429_v43  ;;  %v3480_v43 = vld [vmem:[%s4349_s1 + $0x530] sm:$0xff]  }
  0x8b   :  { %3153 = vmatprep.subr.bf16.mxu1 %v3431_v45  ;;  %v3482_v45 = vld [vmem:[%s4349_s1 + $0x578] sm:$0xff]  }
  0x8c   :  { %3132 = vmatpush3.bf16.msra.mxu0 %v3432_v46  ;;  %v3483_v46 = vld [vmem:[%s4349_s1 + $0x5f8] sm:$0xff]  }
  0x8d   :  { %3133 = vmatprep.subr.bf16.mxu0 %v3434_v48  ;;  %v3485_v48 = vld [vmem:[%s4349_s1 + $0x5b8] sm:$0xff]  }
  0x8e   :  { %3154 = vmatpush3.bf16.msra.mxu1 %v3433_v47  ;;  %v3484_v47 = vld [vmem:[%s4349_s1 + $0x538] sm:$0xff]  }
  0x8f   :  { %3155 = vmatprep.subr.bf16.mxu1 %v3435_v49  ;;  %v613_v49 = vrot.slane %v4088_v4, %v3690_v41  ;;  %v3504_v4 = vld [vmem:[%s4349_s1 + $0x6e0] sm:$0xff]  }
  0x90   :  { %3134 = vmatpush3.bf16.msra.mxu0 %v3436_v50  ;;  %v3487_v50 = vld [vmem:[%s4349_s1 + $0x640] sm:$0xff]  }
  0x91   :  { %3135 = vmatprep.subr.bf16.mxu0 %v3438_v52  ;;  %v3489_v52 = vld [vmem:[%s4349_s1 + $0x600] sm:$0xff]  }
  0x92   :  { %3156 = vmatpush3.bf16.msra.mxu1 %v3437_v51  ;;  %v3488_v51 = vld [vmem:[%s4349_s1 + $0x6c0] sm:$0xff]  }
  0x93   :  { %3157 = vmatprep.subr.bf16.mxu1 %v3439_v53  ;;  %v3490_v53 = vld [vmem:[%s4349_s1 + $0x680] sm:$0xff]  }
  0x94   :  { %3136 = vmatpush3.bf16.msra.mxu0 %v3440_v54  ;;  %v629_v54 = vcombine.high %v613_v49, %v613_v49 }
  0x95   :  { %3137 = vmatprep.subr.bf16.mxu0 %v3442_v56  ;;  %v3492_v56 = vld [vmem:[%s4349_s1 + $0x6c8] sm:$0xff]  }
  0x96   :  { %3158 = vmatpush3.bf16.msra.mxu1 %v3441_v55  ;;  %v3491_v55 = vld [vmem:[%s4349_s1 + $0x648] sm:$0xff]  }
  0x97   :  { %3159 = vmatprep.subr.bf16.mxu1 %v3443_v57  ;;  %v3493_v57 = vld [vmem:[%s4349_s1 + $0x608] sm:$0xff]  }
  0x98   :  { %3138 = vmatpush3.bf16.msra.mxu0 %v3444_v58  ;;  %v3494_v58 = vld [vmem:[%s4349_s1 + $0x688] sm:$0xff]  }
  0x99   :  { %3139 = vmatprep.subr.bf16.mxu0 %v3446_v60  ;;  %v3496_v60 = vld [vmem:[%s4349_s1 + $0x6d0] sm:$0xff]  }
  0x9a   :  { %3160 = vmatpush3.bf16.msra.mxu1 %v3445_v59  ;;  %v3495_v59 = vld [vmem:[%s4349_s1 + $0x650] sm:$0xff]  }
  0x9b   :  { %3161 = vmatprep.subr.bf16.mxu1 %v3447_v62  ;;  %v3498_v62 = vld [vmem:[%s4349_s1 + $0x690] sm:$0xff]  }
  0x9c   :  { %3140 = vmatpush3.bf16.msra.mxu0 %v3448_v1  ;;  %v3501_v1 = vld [vmem:[%s4349_s1 + $0x618] sm:$0xff]  }
  0x9d   :  { %3141 = vmatprep.subr.bf16.mxu0 %v3450_v5  ;;  %v3505_v5 = vld [vmem:[%s4349_s1 + $0x620] sm:$0xff]  }
  0x9e   :  { %3162 = vmatpush3.bf16.msra.mxu1 %v3449_v2  ;;  %v3502_v2 = vld [vmem:[%s4349_s1 + $0x698] sm:$0xff]  }
  0x9f   :  { %3163 = vmatprep.subr.bf16.mxu1 %v3451_v6  ;;  %v3506_v6 = vld [vmem:[%s4349_s1 + $0x6a0] sm:$0xff]  }
  0xa0   :  { %3142 = vmatpush3.bf16.msra.mxu0 %v3452_v9  ;;  %v3509_v9 = vld [vmem:[%s4349_s1 + $0x628] sm:$0xff]  }
  0xa1   :  { %3171 = vmatprep.subr.bf16.mxu0 %v3454_v13  ;;  %v3513_v13 = vld [vmem:[%s4349_s1 + $0x630] sm:$0xff]  }
  0xa2   :  { %3164 = vmatpush3.bf16.msra.mxu1 %v3453_v10  ;;  %v3510_v10 = vld [vmem:[%s4349_s1 + $0x6a8] sm:$0xff]  }
  0xa3   :  { %2381 = vmatmul.mubr.bf16.vlgmr.msra.gmra.mrb[16].mxu0 %v606_v12  ;;  %3193 = vmatprep.subr.bf16.mxu1 %v3455_v14  ;;  %v3512_v12 = vld [vmem:[%s4349_s1 + $0x6f0] sm:$0xff]   ;;  %v2717_v14 = vld.sshfl [vmem:[%s4348_s0 + $0x18] sm:$0x33 pattern:$0x75316420] }
  0xa4   :  { %3172 = vmatpush3.bf16.msra.mxu0 %v3456_v16  ;;  %2460 = vmatprep.mubr.bf16.mxu0 %v627_v15  ;;  %v3515_v15 = vld [vmem:[%s4349_s1 + $0x678] sm:$0xff]   ;;  %v639_v16 = vcombine.high %v2717_v14, %v2717_v14 }
  0xa5   :  { %2421 = vmatmul.mubr.bf16.vlgmr.msra.gmra.mrb[16].mxu1 %v628_v18  ;;  %3173 = vmatprep.subr.bf16.mxu0 %v3458_v19  ;;  %v3516_v18 = vld [vmem:[%s4349_s1 + $0x6f8] sm:$0xff]  }
  0xa6   :  { %3194 = vmatpush3.bf16.msra.mxu1 %v3457_v17  ;;  %2500 = vmatprep.mubr.bf16.mxu1 %v631_v21  ;;  %v3514_v17 = vld [vmem:[%s4349_s1 + $0x6b0] sm:$0xff]   ;;  %v653_v19 = vrot.slane %v639_v16, %v3690_v41  ;;  %v3517_v21 = vld [vmem:[%s4349_s1 + $0x638] sm:$0xff]  }
  0xa7   :  { %3195 = vmatprep.subr.bf16.mxu1 %v3459_v20 }
  0xa8   :  { %3174 = vmatpush3.bf16.msra.mxu0 %v3460_v22  ;;  %v655_v20 = vcombine.high %v653_v19, %v653_v19 }
  0xa9   :  { %3175 = vmatprep.subr.bf16.mxu0 %v3462_v24 }
  0xaa   :  { %3196 = vmatpush3.bf16.msra.mxu1 %v3461_v23 }
  0xab   :  { %3197 = vmatprep.subr.bf16.mxu1 %v3463_v25 }
  0xac   :  { %3176 = vmatpush3.bf16.msra.mxu0 %v3464_v26 }
  0xad   :  { %3177 = vmatprep.subr.bf16.mxu0 %v3466_v28 }
  0xae   :  { %3198 = vmatpush3.bf16.msra.mxu1 %v3465_v27 }
  0xaf   :  { %3199 = vmatprep.subr.bf16.mxu1 %v3467_v29 }
  0xb0   :  { %3178 = vmatpush3.bf16.msra.mxu0 %v3468_v30 }
  0xb1   :  { %3179 = vmatprep.subr.bf16.mxu0 %v3470_v32 }
  0xb2   :  { %3200 = vmatpush3.bf16.msra.mxu1 %v3469_v31 }
  0xb3   :  { %3201 = vmatprep.subr.bf16.mxu1 %v3471_v33 }
  0xb4   :  { %3180 = vmatpush3.bf16.msra.mxu0 %v3472_v34 }
  0xb5   :  { %3181 = vmatprep.subr.bf16.mxu0 %v3474_v36 }
  0xb6   :  { %3202 = vmatpush3.bf16.msra.mxu1 %v3473_v35 }
  0xb7   :  { %3203 = vmatprep.subr.bf16.mxu1 %v3475_v37 }
  0xb8   :  { %3182 = vmatpush3.bf16.msra.mxu0 %v3476_v38 }
  0xb9   :  { %3183 = vmatprep.subr.bf16.mxu0 %v3478_v40 }
  0xba   :  { %3204 = vmatpush3.bf16.msra.mxu1 %v3477_v39 }
  0xbb   :  { %3205 = vmatprep.subr.bf16.mxu1 %v3479_v42 }
  0xbc   :  { %3184 = vmatpush3.bf16.msra.mxu0 %v3480_v43 }
  0xbd   :  { %3185 = vmatprep.subr.bf16.mxu0 %v3482_v45 }
  0xbe   :  { %3206 = vmatpush3.bf16.msra.mxu1 %v3481_v44 }
  0xbf   :  { %3207 = vmatprep.subr.bf16.mxu1 %v3483_v46 }
  0xc0   :  { %3186 = vmatpush3.bf16.msra.mxu0 %v3484_v47 }
  0xc1   :  { %3215 = vmatprep.subr.bf16.mxu0 %v3487_v50 }
  0xc2   :  { %3208 = vmatpush3.bf16.msra.mxu1 %v3485_v48 }
  0xc3   :  { %2461 = vmatmul.mubr.bf16.vlgmr.msra.gmra.mrb[20].mxu0 %v613_v49  ;;  %3237 = vmatprep.subr.bf16.mxu1 %v3488_v51 }
  0xc4   :  { %3216 = vmatpush3.bf16.msra.mxu0 %v3489_v52  ;;  %2540 = vmatprep.mubr.bf16.mxu0 %v653_v19 }
  0xc5   :  { %2501 = vmatmul.mubr.bf16.vlgmr.msra.gmra.mrb[20].mxu1 %v629_v54  ;;  %3217 = vmatprep.subr.bf16.mxu0 %v3491_v55 }
  0xc6   :  { %3238 = vmatpush3.bf16.msra.mxu1 %v3490_v53 }
  0xc7   :  { %3239 = vmatprep.subr.bf16.mxu1 %v3492_v56 }
  0xc8   :  { %3218 = vmatpush3.bf16.msra.mxu0 %v3493_v57 }
  0xc9   :  { %3219 = vmatprep.subr.bf16.mxu0 %v3495_v59 }
  0xca   :  { %3240 = vmatpush3.bf16.msra.mxu1 %v3494_v58 }
  0xcb   :  { %3241 = vmatprep.subr.bf16.mxu1 %v3496_v60 }
  0xcc   :  { %3220 = vmatpush3.bf16.msra.mxu0 %v3497_v61 }
  0xcd   :  { %3221 = vmatprep.subr.bf16.mxu0 %v3499_v63 }
  0xce   :  { %3242 = vmatpush3.bf16.msra.mxu1 %v3498_v62 }
  0xcf   :  { %3243 = vmatprep.subr.bf16.mxu1 %v3500_v0 }
  0xd0   :  { %3222 = vmatpush3.bf16.msra.mxu0 %v3501_v1 }
  0xd1   :  { %3223 = vmatprep.subr.bf16.mxu0 %v3503_v3 }
  0xd2   :  { %3244 = vmatpush3.bf16.msra.mxu1 %v3502_v2 }
  0xd3   :  { %3245 = vmatprep.subr.bf16.mxu1 %v3504_v4 }
  0xd4   :  { %3224 = vmatpush3.bf16.msra.mxu0 %v3505_v5 }
  0xd5   :  { %3225 = vmatprep.subr.bf16.mxu0 %v3507_v7 }
  0xd6   :  { %3246 = vmatpush3.bf16.msra.mxu1 %v3506_v6 }
  0xd7   :  { %3247 = vmatprep.subr.bf16.mxu1 %v3508_v8 }
  0xd8   :  { %3226 = vmatpush3.bf16.msra.mxu0 %v3509_v9 }
  0xd9   :  { %3227 = vmatprep.subr.bf16.mxu0 %v3511_v11 }
  0xda   :  { %3248 = vmatpush3.bf16.msra.mxu1 %v3510_v10 }
  0xdb   :  { %3249 = vmatprep.subr.bf16.mxu1 %v3512_v12 }
  0xdc   :  { %3228 = vmatpush3.bf16.msra.mxu0 %v3513_v13 }
  0xdd   :  { %10 = vsyncpa [#allocation3], 0  ;;  %3229 = vmatprep.subr.bf16.mxu0 %v3515_v15  ;;  %2580 = vmatprep.mubr.bf16.mxu1 %v655_v20  ;;  %v646_v22 = vrot.slane %v2717_v14, %v3690_v41  ;;  %v3518_v23 = vld [vmem:[%s4349_s1 + $0x6b8] sm:$0xff]   ;;  %v2716_v26 = vld [vmem:[%s4350_s2] ss:$0 sm:$0xff]  ;;  %v3552_v51 = vmov 0.0  }
  0xde   :  { %3250 = vmatpush3.bf16.msra.mxu1 %v3514_v17  ;;  %v3519_v50 = vld [vmem:[%s4351_s3] sm:$0xff]   ;;  %v3520_v52 = vld [vmem:[%s4351_s3 + $0x8] sm:$0xff]   ;;  %v3521_v53 = vld [vmem:[%s4351_s3 + $0x10] sm:$0xff]   ;;  %vm3553_vm0 = vmmov 0   ;;  %s3554_s15 = smov [#allocation2]  }
  0xdf   :  { %3251 = vmatprep.subr.bf16.mxu1 %v3516_v18  ;;  %v654_v24 = vcombine.high %v646_v22, %v646_v22  ;;  %v3522_v54 = vld [vmem:[%s4351_s3 + $0x18] sm:$0xff]   ;;  %v3523_v55 = vld [vmem:[%s4351_s3 + $0x20] sm:$0xff]   ;;  %v3524_v58 = vld [vmem:[%s4351_s3 + $0x28] sm:$0xff]   ;;  %s2708_s16 = sshll.u32 %s3554_s15, 4  ;;  %s2709_s16 = int_to_ptr.vmem [resolvable:$true] %s2708_s16 }
  0xe0   :  { %3230 = vmatpush3.bf16.msra.mxu0 %v3517_v21  ;;  %v3525_v4 = vld [vmem:[%s4351_s3 + $0x30] sm:$0xff]   ;;  %v3526_v6 = vld [vmem:[%s4351_s3 + $0x38] sm:$0xff]   ;;  %s3527_s17 = scalar_lea.vmem %s2709_s16, 32  ;;  %p3532_p1 = scmp.lt.s32.totalorder %s2709_s16, %s2709_s16 }
  0xe1   :  { %3268 = vmatprep.subr.bf16.mxu0 %v3552_v51  ;;  %p3528_p0 = scmp.ne.s32.totalorder %s2709_s16, %s3527_s17  ;;  %p3533_p2 = scmp.lt.s32.totalorder %s3527_s17, %s3527_s17 }
  0xe2   :  { %3252 = vmatpush3.bf16.msra.mxu1 %v3518_v23 }
  0xe3   :  { %2541 = vmatmul.mubr.bf16.vlgmr.msra.gmra.mrb[24].mxu0 %v646_v22  ;;  %p3534_p3 = por %p3533_p2, %p3532_p1 }
  0xe4   :  { %3269 = vmatpush3.bf16.msra.mxu0 %v3519_v50  ;;  %3284 = vmatprep.mubr.msk.bf16.mxu0 %vm3553_vm0, %v3552_v51 }
  0xe5   :  { %2581 = vmatmul.mubr.bf16.vlgmr.msra.gmra.mrb[24].mxu1 %v654_v24  ;;  %3270 = vmatprep.subr.bf16.mxu0 %v3552_v51  ;;  %p3535_p4 = pnand %p3534_p3, %p3528_p0 }
  0xe8   :  { %3271 = vmatpush3.bf16.msra.mxu0 %v3520_v52 }
  0xe9   :  { %3272 = vmatprep.subr.bf16.mxu0 %v3552_v51 }
  0xec   :  { %3273 = vmatpush3.bf16.msra.mxu0 %v3521_v53 }
  0xed   :  { %3274 = vmatprep.subr.bf16.mxu0 %v3552_v51 }
  0xf0   :  { %3275 = vmatpush3.bf16.msra.mxu0 %v3522_v54 }
  0xf1   :  { %3276 = vmatprep.subr.bf16.mxu0 %v3552_v51 }
  0xf4   :  { %3277 = vmatpush3.bf16.msra.mxu0 %v3523_v55 }
  0xf5   :  { %3278 = vmatprep.subr.bf16.mxu0 %v3552_v51 }
  0xf6   :  { %v2967_v25 = vpop.f32.mrb[0].mxu0 }
  0xf7   :  { %v2968_v27 = vpop.f32.mrb[1].mxu0  ;;  %v2989_v28 = vpop.f32.mrb[0].mxu1 }
  0xf8   :  { %v2969_v29 = vadd.f32 %v2968_v27, %v2967_v25  ;;  %v2970_v41 = vpop.f32.mrb[2].mxu0  ;;  %v2990_v30 = vpop.f32.mrb[1].mxu1  ;;  %3279 = vmatpush3.bf16.msra.mxu0 %v3524_v58 }
  0xf9   :  { %v2971_v31 = vpop.f32.mrb[3].mxu0  ;;  %v2991_v33 = vadd.f32 %v2990_v30, %v2989_v28  ;;  %v2992_v34 = vpop.f32.mrb[2].mxu1  ;;  %3280 = vmatprep.subr.bf16.mxu0 %v3552_v51 }
  0xfa   :  { %v2063_v32 = vadd.f32 %v2969_v29, %v2716_v26  ;;  %v2993_v35 = vpop.f32.mrb[3].mxu1 }
  0xfc   :  { %v2103_v36 = vadd.f32 %v2991_v33, %v2063_v32  ;;  %3281 = vmatpush3.bf16.msra.mxu0 %v3525_v4 }
  0xfd   :  { %3282 = vmatprep.subr.bf16.mxu0 %v3552_v51 }
 0x100   :  { %3283 = vmatpush3.bf16.msra.mxu0 %v3526_v6 }
 0x116   :  { %v3011_v37 = vpop.f32.mrb[4].mxu0 }
 0x117   :  { %v3012_v38 = vpop.f32.mrb[5].mxu0  ;;  %v3033_v39 = vpop.f32.mrb[4].mxu1 }
 0x118   :  { %v3013_v40 = vadd.f32 %v3012_v38, %v3011_v37  ;;  %v3014_v42 = vpop.f32.mrb[6].mxu0  ;;  %v3034_v43 = vpop.f32.mrb[5].mxu1 }
 0x119   :  { %v3015_v44 = vpop.f32.mrb[7].mxu0  ;;  %v3035_v46 = vadd.f32 %v3034_v43, %v3033_v39  ;;  %v3036_v47 = vpop.f32.mrb[6].mxu1 }
 0x11a   :  { %v2143_v45 = vadd.f32 %v3013_v40, %v2103_v36  ;;  %v3037_v48 = vpop.f32.mrb[7].mxu1 }
 0x11c   :  { %v2183_v49 = vadd.f32 %v3035_v46, %v2143_v45 }
 0x136   :  { %v3055_v56 = vpop.f32.mrb[8].mxu0 }
 0x137   :  { %v3056_v57 = vpop.f32.mrb[9].mxu0 }
 0x138   :  { %v3077_v59 = vpop.f32.mrb[8].mxu1  ;;  %v3057_v60 = vadd.f32 %v3056_v57, %v3055_v56  ;;  %v3058_v61 = vpop.f32.mrb[10].mxu0  ;;  %v2942_v57 = vld [vmem:[%s4352_s4] ss:$0 sm:$0xff] }
 0x139   :  { %v3078_v62 = vpop.f32.mrb[9].mxu1  ;;  %v3059_v63 = vpop.f32.mrb[11].mxu0 }
 0x13a   :  { %v2223_v0 = vadd.f32 %v3057_v60, %v2183_v49  ;;  %v3079_v1 = vadd.f32 %v3078_v62, %v3077_v59  ;;  %v3080_v2 = vpop.f32.mrb[10].mxu1 }
 0x13b   :  { %v3081_v3 = vpop.f32.mrb[11].mxu1 }
 0x13c   :  { %v2263_v5 = vadd.f32 %v3079_v1, %v2223_v0 }
 0x156   :  { %v3099_v7 = vpop.f32.mrb[12].mxu0 }
 0x157   :  { %v3100_v8 = vpop.f32.mrb[13].mxu0 }
 0x158   :  { %v3121_v9 = vpop.f32.mrb[12].mxu1  ;;  %v3101_v10 = vadd.f32 %v3100_v8, %v3099_v7  ;;  %v3102_v11 = vpop.f32.mrb[14].mxu0 }
 0x159   :  { %v3122_v12 = vpop.f32.mrb[13].mxu1  ;;  %v3103_v13 = vpop.f32.mrb[15].mxu0 }
 0x15a   :  { %v2303_v14 = vadd.f32 %v3101_v10, %v2263_v5  ;;  %v3123_v15 = vadd.f32 %v3122_v12, %v3121_v9  ;;  %v3124_v16 = vpop.f32.mrb[14].mxu1 }
 0x15b   :  { %v3125_v17 = vpop.f32.mrb[15].mxu1 }
 0x15c   :  { %v2343_v18 = vadd.f32 %v3123_v15, %v2303_v14 }
 0x176   :  { %v3143_v19 = vpop.f32.mrb[16].mxu0 }
 0x177   :  { %v3144_v20 = vpop.f32.mrb[17].mxu0 }
 0x178   :  { %v3165_v21 = vpop.f32.mrb[16].mxu1  ;;  %v3145_v22 = vadd.f32 %v3144_v20, %v3143_v19  ;;  %v3146_v23 = vpop.f32.mrb[18].mxu0 }
 0x179   :  { %v3166_v24 = vpop.f32.mrb[17].mxu1  ;;  %v3147_v25 = vpop.f32.mrb[19].mxu0 }
 0x17a   :  { %v2383_v26 = vadd.f32 %v3145_v22, %v2343_v18  ;;  %v3167_v27 = vadd.f32 %v3166_v24, %v3165_v21  ;;  %v3168_v28 = vpop.f32.mrb[18].mxu1 }
 0x17b   :  { %v3169_v29 = vpop.f32.mrb[19].mxu1 }
 0x17c   :  { %v2423_v41 = vadd.f32 %v3167_v27, %v2383_v26 }
 0x196   :  { %v3187_v30 = vpop.f32.mrb[20].mxu0 }
 0x197   :  { %v3188_v31 = vpop.f32.mrb[21].mxu0 }
 0x198   :  { %v3209_v32 = vpop.f32.mrb[20].mxu1  ;;  %v3189_v33 = vadd.f32 %v3188_v31, %v3187_v30  ;;  %v3190_v34 = vpop.f32.mrb[22].mxu0 }
 0x199   :  { %v3210_v35 = vpop.f32.mrb[21].mxu1  ;;  %v3191_v36 = vpop.f32.mrb[23].mxu0 }
 0x19a   :  { %v2463_v37 = vadd.f32 %v3189_v33, %v2423_v41  ;;  %v3211_v38 = vadd.f32 %v3210_v35, %v3209_v32  ;;  %v3212_v39 = vpop.f32.mrb[22].mxu1 }
 0x19b   :  { %v3213_v40 = vpop.f32.mrb[23].mxu1 }
 0x19c   :  { %v2503_v42 = vadd.f32 %v3211_v38, %v2463_v37 }
 0x1b6   :  { %v3231_v43 = vpop.f32.mrb[24].mxu0 }
 0x1b7   :  { %v3232_v44 = vpop.f32.mrb[25].mxu0 }
 0x1b8   :  { %v3253_v45 = vpop.f32.mrb[24].mxu1  ;;  %v3233_v46 = vadd.f32 %v3232_v44, %v3231_v43  ;;  %v3234_v47 = vpop.f32.mrb[26].mxu0 }
 0x1b9   :  { %v3254_v48 = vpop.f32.mrb[25].mxu1  ;;  %v3235_v49 = vpop.f32.mrb[27].mxu0 }
 0x1ba   :  { %v2543_v50 = vadd.f32 %v3233_v46, %v2503_v42  ;;  %v3255_v51 = vadd.f32 %v3254_v48, %v3253_v45  ;;  %v3256_v52 = vpop.f32.mrb[26].mxu1 }
 0x1bb   :  { %v3257_v53 = vpop.f32.mrb[27].mxu1 }
 0x1bc   :  { %v2583_v54 = vadd.f32 %v3255_v51, %v2543_v50 }
 0x1be   :  { %v2588_v55 = vmax.f32 %v2583_v54, 0.0 }
 0x1c0   :  { %v2589_v56 = vpack.c.bf16 %v2588_v55, %v2588_v55 }
 0x1c2   :  { %3285 = vmatmul.mubr.bf16.vlgmr.msra.gmra.mrb[28].mxu0 %v2589_v56 }
 0x295   :  { %v2695_v58 = vpop.f32.mrb[28].mxu0 }
 0x296   :  { %v2696_v59 = vadd.f32 %v2942_v57, %v2695_v58  ;;  %v3286_v60 = vpop.f32.mrb[29].mxu0 }
 0x297   :  { %v2698_v61 = vpop.f32.mrb[30].mxu0 }
 0x298   :  { %2701 = vst [vmem:[#allocation2] sm:$0x3] %v2696_v59  ;;  %v3287_v62 = vpop.f32.mrb[31].mxu0 }
 0x299   :  { %3538 = shalt.err (!%p3535_p4)
}
 0x29a   :  { %s3539_s4 = scalar_lea.hbm %s4353_s5, 32 }
 0x29b   :  { %p3540_p5 = scmp.ne.s32.totalorder %s4353_s5, %s3539_s4  ;;  %p3543_p6 = scmp.lt.u32.totalorder %s3539_s4, %s4353_s5 }
 0x29d   :  { %p3545_p7 = pnand %p3543_p6, %p3540_p5 }
 0x29f   :  { %3548 = shalt.err (!%p3545_p7)
}
 0x2a0   :  { %2711 = dma.vmem_to_hbm [thread:$0]  %s2709_s16, 32, %s4353_s5, [#allocation3]  }
 0x2a1   :  { %3549 = dma.done.wait [#allocation3], 32  }
 0x2a2   :  { %3550 = vsyncadd [#allocation3], 4294967264 }
 0x2a3   :  { %2715 = vsyncpa [#allocation3], 1 }

// kernel: cnn_forward.2
= control target key start
LH: loop header
LB: loop body
LE: loop exit
PB: predicated region body
PF: predicated region fallthrough
CT: control target
= control target key end

     0   :  { %vm256_vm0 = vcmask 130048   ;;  %s4574_s12 = smov 96   ;;  %s4576_s21 = smov 32   ;;  %vm2108_vm1 = vcmask 1043456   ;;  %vm2109_vm2 = vsmask.f32 3328  ;;  %s7111_s1 = inlined_call_operand.vmem [shape: bf16[16,128], index: 1, kind: input, shape index: {}]   ;;  %s7112_s0 = inlined_call_operand.vmem [shape: bf16[2,32,8,16], index: 0, kind: input, shape index: {}]   ;;  %s7113_s2 = inlined_call_operand.vmem [shape: f32[1,32], index: 2, kind: input, shape index: {}]   ;;  %s7114_s5 = inlined_call_operand.vmem [shape: f32[16,8,32], index: 5, kind: input, shape index: {}]   ;;  %s7115_s3 = inlined_call_operand.vmem [shape: bf16[3,128,128], index: 3, kind: input, shape index: {}]   ;;  %s7116_s4 = inlined_call_operand.vmem [shape: f32[1,64], index: 4, kind: input, shape index: {}]   ;;  %s7117_s6 = inlined_call_operand.vmem [shape: bf16[2,7,512], index: 6, kind: output, shape index: {}]  }
   0x1   :  { %v4494_v0 = vld [vmem:[%s7111_s1] sm:$0xff]   ;;  %v4496_v2 = vld [vmem:[%s7112_s0 + $0x8] sm:$0xff]   ;;  %v4497_v3 = vld [vmem:[%s7112_s0 + $0x10] sm:$0xff]   ;;  %vm1817_vm4 = vcmask 1040384   ;;  %vm1818_vm5 = vsmask.f32 256 }
   0x2   :  { %v4495_v1 = vld [vmem:[%s7112_s0] sm:$0xff]   ;;  %4221 = vmatprep.subr.bf16.mxu0 %v4494_v0  ;;  %v4498_v4 = vld [vmem:[%s7112_s0 + $0x18] sm:$0xff]   ;;  %v4500_v6 = vld [vmem:[%s7112_s0 + $0x28] sm:$0xff]   ;;  %vm2395_vm6 = vcmask 261120   ;;  %vm2480_vm8 = vcmask 523264   ;;  %vm2537_vm9 = vcmask 785408  }
   0x3   :  { %4222 = vmatpush3.bf16.msra.mxu0 %v4494_v0  ;;  %4223 = vmatprep.mubr.msk.bf16.mxu0 %vm256_vm0, %v4495_v1  ;;  %v4499_v5 = vld [vmem:[%s7112_s0 + $0x20] sm:$0xff]   ;;  %v4501_v7 = vld [vmem:[%s7112_s0 + $0x30] sm:$0xff]   ;;  %v4502_v8 = vld [vmem:[%s7112_s0 + $0x38] sm:$0xff]   ;;  %vm3699_vm10 = vcmask 1041409   ;;  %vm3702_vm11 = vcmask 1042434   ;;  %vm3705_vm12 = vcmask 1043459  }
   0x4   :  { %v4503_v9 = vld [vmem:[%s7112_s0 + $0x40] sm:$0xff]   ;;  %v4504_v10 = vld [vmem:[%s7112_s0 + $0x48] sm:$0xff]   ;;  %v4505_v11 = vld [vmem:[%s7112_s0 + $0x50] sm:$0xff]   ;;  %vm3708_vm13 = vcmask 1044484   ;;  %vm3711_vm14 = vcmask 1045509   ;;  %vm3714_vm15 = vcmask 1046534  }
   0x5   :  { %v4506_v12 = vld [vmem:[%s7112_s0 + $0x58] sm:$0xff]   ;;  %v4507_v13 = vld [vmem:[%s7112_s0 + $0x60] sm:$0xff]   ;;  %v4508_v14 = vld [vmem:[%s7112_s0 + $0x68] sm:$0xff]  }
   0x6   :  { %4224 = vmatmul.mubr.msk.bf16.vlgmr.msra.gmra.mrb[0].mxu0 %vm256_vm0, %v4496_v2  ;;  %v4509_v15 = vld [vmem:[%s7112_s0 + $0x70] sm:$0xff]   ;;  %v4510_v16 = vld [vmem:[%s7112_s0 + $0x78] sm:$0xff]   ;;  %v4511_v17 = vld [vmem:[%s7112_s0 + $0x80] sm:$0xff]  }
   0x7   :  { %4227 = vmatprep.mubr.msk.bf16.mxu0 %vm256_vm0, %v4497_v3  ;;  %v4512_v18 = vld [vmem:[%s7112_s0 + $0x88] sm:$0xff]   ;;  %v4513_v19 = vld [vmem:[%s7112_s0 + $0x90] sm:$0xff]   ;;  %v4514_v20 = vld [vmem:[%s7112_s0 + $0x98] sm:$0xff]  }
   0x8   :  { %v4515_v21 = vld [vmem:[%s7112_s0 + $0xa0] sm:$0xff]   ;;  %v4516_v22 = vld [vmem:[%s7112_s0 + $0xa8] sm:$0xff]   ;;  %v4517_v23 = vld [vmem:[%s7112_s0 + $0xb0] sm:$0xff]  }
   0x9   :  { %v4518_v24 = vld [vmem:[%s7112_s0 + $0xb8] sm:$0xff]   ;;  %v4519_v25 = vld [vmem:[%s7112_s0 + $0xc0] sm:$0xff]   ;;  %v4520_v26 = vld [vmem:[%s7112_s0 + $0xc8] sm:$0xff]  }
   0xa   :  { %v4521_v27 = vld [vmem:[%s7112_s0 + $0xd0] sm:$0xff]   ;;  %v4522_v28 = vld [vmem:[%s7112_s0 + $0xd8] sm:$0xff]   ;;  %v4523_v29 = vld [vmem:[%s7112_s0 + $0xe0] sm:$0xff]  }
   0xb   :  { %v4524_v30 = vld [vmem:[%s7112_s0 + $0xe8] sm:$0xff]   ;;  %v4525_v31 = vld [vmem:[%s7112_s0 + $0xf0] sm:$0xff]   ;;  %v4526_v32 = vld [vmem:[%s7112_s0 + $0xf8] sm:$0xff]   ;;  %s4575_s0 = smov 64  }
   0xc   :  { %vm5371_vm3 = vmand %vm2108_vm1, %vm2109_vm2  ;;  %vm3946_vm1 = vsmask.f32 7424 }
   0xd   :  { %vm6132_vm7 = vmand %vm1817_vm4, %vm1818_vm5 }
   0xe   :  { %4228 = vmatmul.mubr.msk.bf16.gmra.mrb[4].mxu0 %vm256_vm0, %v4498_v4 }
   0xf   :  { %4231 = vmatprep.mubr.msk.bf16.mxu0 %vm256_vm0, %v4499_v5 }
  0x16   :  { %4232 = vmatmul.mubr.msk.bf16.gmra.mrb[8].mxu0 %vm256_vm0, %v4500_v6 }
  0x17   :  { %4235 = vmatprep.mubr.msk.bf16.mxu0 %vm256_vm0, %v4501_v7 }
  0x1e   :  { %4236 = vmatmul.mubr.msk.bf16.gmra.mrb[12].mxu0 %vm256_vm0, %v4502_v8 }
  0x1f   :  { %4239 = vmatprep.mubr.msk.bf16.mxu0 %vm256_vm0, %v4503_v9 }
  0x26   :  { %4240 = vmatmul.mubr.msk.bf16.gmra.mrb[16].mxu0 %vm256_vm0, %v4504_v10 }
  0x27   :  { %4243 = vmatprep.mubr.msk.bf16.mxu0 %vm256_vm0, %v4505_v11 }
  0x2e   :  { %4244 = vmatmul.mubr.msk.bf16.gmra.mrb[20].mxu0 %vm256_vm0, %v4506_v12 }
  0x2f   :  { %4247 = vmatprep.mubr.msk.bf16.mxu0 %vm256_vm0, %v4507_v13 }
  0x36   :  { %4248 = vmatmul.mubr.msk.bf16.gmra.mrb[24].mxu0 %vm256_vm0, %v4508_v14 }
  0x37   :  { %4251 = vmatprep.mubr.msk.bf16.mxu0 %vm256_vm0, %v4509_v15 }
  0x3e   :  { %4252 = vmatmul.mubr.msk.bf16.gmra.mrb[28].mxu0 %vm256_vm0, %v4510_v16 }
  0x3f   :  { %4255 = vmatprep.mubr.msk.bf16.mxu0 %vm256_vm0, %v4511_v17 }
  0x46   :  { %4256 = vmatmul.mubr.msk.bf16.gmra.mrb[32].mxu0 %vm256_vm0, %v4512_v18 }
  0x47   :  { %4259 = vmatprep.mubr.msk.bf16.mxu0 %vm256_vm0, %v4513_v19 }
  0x4e   :  { %4260 = vmatmul.mubr.msk.bf16.gmra.mrb[36].mxu0 %vm256_vm0, %v4514_v20 }
  0x4f   :  { %4263 = vmatprep.mubr.msk.bf16.mxu0 %vm256_vm0, %v4515_v21 }
  0x56   :  { %4264 = vmatmul.mubr.msk.bf16.gmra.mrb[40].mxu0 %vm256_vm0, %v4516_v22 }
  0x57   :  { %4267 = vmatprep.mubr.msk.bf16.mxu0 %vm256_vm0, %v4517_v23 }
  0x5e   :  { %4268 = vmatmul.mubr.msk.bf16.gmra.mrb[44].mxu0 %vm256_vm0, %v4518_v24 }
  0x5f   :  { %4271 = vmatprep.mubr.msk.bf16.mxu0 %vm256_vm0, %v4519_v25 }
  0x66   :  { %4272 = vmatmul.mubr.msk.bf16.gmra.mrb[48].mxu0 %vm256_vm0, %v4520_v26 }
  0x67   :  { %4275 = vmatprep.mubr.msk.bf16.mxu0 %vm256_vm0, %v4521_v27 }
  0x6e   :  { %4276 = vmatmul.mubr.msk.bf16.gmra.mrb[52].mxu0 %vm256_vm0, %v4522_v28 }
  0x6f   :  { %4279 = vmatprep.mubr.msk.bf16.mxu0 %vm256_vm0, %v4523_v29 }
  0x76   :  { %4280 = vmatmul.mubr.msk.bf16.gmra.mrb[56].mxu0 %vm256_vm0, %v4524_v30 }
  0x77   :  { %4283 = vmatprep.mubr.msk.bf16.mxu0 %vm256_vm0, %v4525_v31 }
  0x7e   :  { %4284 = vmatmul.mubr.msk.bf16.gmra.mrb[60].mxu0 %vm256_vm0, %v4526_v32  ;;  %vm3945_vm0 = vcmask 1047556  }
  0x7f   :  { %vm3947_vm2 = vmand %vm3945_vm0, %vm3946_vm1 }
  0x80   :  { %vm7062_vm4 = vmor %vm3947_vm2, %vm5371_vm3 }
  0xd9   :  { %v4743_v33 = vpop.f32.mrb[0].mxu0 }
  0xda   :  { %710 = vrot.lane.b32.xlu0 %v4743_v33, %s4574_s12  ;;  %v4747_v34 = vpop.f32.mrb[1].mxu0 }
  0xdb   :  { %v4749_v35 = vpop.f32.mrb[2].mxu0 }
  0xdc   :  { %712 = vrot.lane.b32.xlu1 %v4749_v35, %s4574_s12  ;;  %v4753_v36 = vpop.f32.mrb[3].mxu0 }
  0xde   :  { %706 = vrot.lane.b32.xlu0 %v4747_v34, %s4574_s12 }
  0xe1   :  { %v4757_v37 = vpop.f32.mrb[4].mxu0 }
  0xe2   :  { %708 = vrot.lane.b32.xlu0 %v4753_v36, %s4574_s12  ;;  %718 = vrot.lane.b32.xlu1 %v4757_v37, %s4574_s12  ;;  %v4763_v38 = vpop.f32.mrb[5].mxu0 }
  0xe3   :  { %v4765_v39 = vpop.f32.mrb[6].mxu0 }
  0xe4   :  { %v4767_v40 = vpop.f32.mrb[7].mxu0 }
  0xe6   :  { %714 = vrot.lane.b32.xlu1 %v4763_v38, %s4574_s12  ;;  %720 = vrot.lane.b32.xlu0 %v4765_v39, %s4574_s12 }
  0xe9   :  { %v4773_v41 = vpop.f32.mrb[8].mxu0 }
  0xea   :  { %716 = vrot.lane.b32.xlu0 %v4767_v40, %s4574_s12  ;;  %726 = vrot.lane.b32.xlu1 %v4773_v41, %s4574_s12  ;;  %v4779_v42 = vpop.f32.mrb[9].mxu0 }
  0xeb   :  { %v4781_v43 = vpop.f32.mrb[10].mxu0 }
  0xec   :  { %v4783_v44 = vpop.f32.mrb[11].mxu0 }
  0xee   :  { %722 = vrot.lane.b32.xlu1 %v4779_v42, %s4574_s12  ;;  %728 = vrot.lane.b32.xlu0 %v4781_v43, %s4574_s12 }
  0xf1   :  { %v4789_v45 = vpop.f32.mrb[12].mxu0 }
  0xf2   :  { %724 = vrot.lane.b32.xlu0 %v4783_v44, %s4574_s12  ;;  %734 = vrot.lane.b32.xlu1 %v4789_v45, %s4574_s12  ;;  %v4795_v46 = vpop.f32.mrb[13].mxu0 }
  0xf3   :  { %v4797_v47 = vpop.f32.mrb[14].mxu0 }
  0xf4   :  { %v4799_v48 = vpop.f32.mrb[15].mxu0 }
  0xf6   :  { %730 = vrot.lane.b32.xlu1 %v4795_v46, %s4574_s12  ;;  %736 = vrot.lane.b32.xlu0 %v4797_v47, %s4574_s12 }
  0xf9   :  { %v4805_v49 = vpop.f32.mrb[16].mxu0 }
  0xfa   :  { %732 = vrot.lane.b32.xlu0 %v4799_v48, %s4574_s12  ;;  %742 = vrot.lane.b32.xlu1 %v4805_v49, %s4574_s12  ;;  %v4811_v50 = vpop.f32.mrb[17].mxu0 }
  0xfb   :  { %v4813_v51 = vpop.f32.mrb[18].mxu0 }
  0xfc   :  { %v4815_v52 = vpop.f32.mrb[19].mxu0 }
  0xfe   :  { %738 = vrot.lane.b32.xlu1 %v4811_v50, %s4574_s12  ;;  %744 = vrot.lane.b32.xlu0 %v4813_v51, %s4574_s12 }
 0x101   :  { %v4821_v53 = vpop.f32.mrb[20].mxu0 }
 0x102   :  { %740 = vrot.lane.b32.xlu0 %v4815_v52, %s4574_s12  ;;  %750 = vrot.lane.b32.xlu1 %v4821_v53, %s4574_s12  ;;  %v4827_v54 = vpop.f32.mrb[21].mxu0 }
 0x103   :  { %v4829_v55 = vpop.f32.mrb[22].mxu0 }
 0x104   :  { %v4831_v56 = vpop.f32.mrb[23].mxu0 }
 0x106   :  { %746 = vrot.lane.b32.xlu1 %v4827_v54, %s4574_s12  ;;  %752 = vrot.lane.b32.xlu0 %v4829_v55, %s4574_s12 }
 0x109   :  { %v4837_v57 = vpop.f32.mrb[24].mxu0 }
 0x10a   :  { %748 = vrot.lane.b32.xlu0 %v4831_v56, %s4574_s12  ;;  %758 = vrot.lane.b32.xlu1 %v4837_v57, %s4574_s12  ;;  %v4843_v58 = vpop.f32.mrb[25].mxu0 }
 0x10b   :  { %v4845_v59 = vpop.f32.mrb[26].mxu0 }
 0x10c   :  { %v4847_v60 = vpop.f32.mrb[27].mxu0 }
 0x10e   :  { %754 = vrot.lane.b32.xlu1 %v4843_v58, %s4574_s12  ;;  %760 = vrot.lane.b32.xlu0 %v4845_v59, %s4574_s12 }
 0x111   :  { %v4853_v61 = vpop.f32.mrb[28].mxu0 }
 0x112   :  { %756 = vrot.lane.b32.xlu0 %v4847_v60, %s4574_s12  ;;  %766 = vrot.lane.b32.xlu1 %v4853_v61, %s4574_s12  ;;  %v4859_v62 = vpop.f32.mrb[29].mxu0 }
 0x113   :  { %v4861_v63 = vpop.f32.mrb[30].mxu0 }
 0x114   :  { %7192 = vst [vmem:[#allocation2_spill] sm:$0xff] %v4861_v63  ;;  %v4863_v0 = vpop.f32.mrb[31].mxu0 }
 0x116   :  { %762 = vrot.lane.b32.xlu1 %v4859_v62, %s4574_s12  ;;  %764 = vrot.lane.b32.xlu0 %v4863_v0, %s4574_s12 }
 0x119   :  { %v4869_v1 = vpop.f32.mrb[32].mxu0 }
 0x11a   :  { %768 = vrot.lane.b32.xlu1 %v4861_v63, %s4574_s12  ;;  %v4873_v2 = vpop.f32.mrb[33].mxu0 }
 0x11b   :  { %770 = vrot.lane.b32.xlu0 %v4873_v2, %s4574_s12  ;;  %v4877_v3 = vpop.f32.mrb[34].mxu0 }
 0x11c   :  { %v4879_v4 = vpop.f32.mrb[35].mxu0 }
 0x11e   :  { %774 = vrot.lane.b32.xlu1 %v4869_v1, %s4574_s12 }
 0x11f   :  { %776 = vrot.lane.b32.xlu0 %v4877_v3, %s4574_s12 }
 0x121   :  { %v4885_v5 = vpop.f32.mrb[36].mxu0 }
 0x122   :  { %782 = vrot.lane.b32.xlu1 %v4885_v5, %s4574_s12  ;;  %v4889_v6 = vpop.f32.mrb[37].mxu0 }
 0x123   :  { %772 = vrot.lane.b32.xlu0 %v4879_v4, %s4574_s12  ;;  %v4893_v7 = vpop.f32.mrb[38].mxu0 }
 0x124   :  { %v4895_v8 = vpop.f32.mrb[39].mxu0 }
 0x126   :  { %778 = vrot.lane.b32.xlu1 %v4889_v6, %s4574_s12 }
 0x127   :  { %784 = vrot.lane.b32.xlu0 %v4893_v7, %s4574_s12 }
 0x129   :  { %v4901_v9 = vpop.f32.mrb[40].mxu0 }
 0x12a   :  { %790 = vrot.lane.b32.xlu1 %v4901_v9, %s4574_s12  ;;  %v4905_v10 = vpop.f32.mrb[41].mxu0 }
 0x12b   :  { %780 = vrot.lane.b32.xlu0 %v4895_v8, %s4574_s12  ;;  %v4909_v11 = vpop.f32.mrb[42].mxu0 }
 0x12c   :  { %v4911_v12 = vpop.f32.mrb[43].mxu0 }
 0x12e   :  { %786 = vrot.lane.b32.xlu1 %v4905_v10, %s4574_s12 }
 0x12f   :  { %792 = vrot.lane.b32.xlu0 %v4909_v11, %s4574_s12 }
 0x131   :  { %v4917_v13 = vpop.f32.mrb[44].mxu0 }
 0x132   :  { %798 = vrot.lane.b32.xlu1 %v4917_v13, %s4574_s12  ;;  %v4921_v14 = vpop.f32.mrb[45].mxu0 }
 0x133   :  { %788 = vrot.lane.b32.xlu0 %v4911_v12, %s4574_s12  ;;  %v4925_v15 = vpop.f32.mrb[46].mxu0 }
 0x134   :  { %7193 = vst [vmem:[#allocation3_spill] sm:$0xff] %v4925_v15  ;;  %v4927_v16 = vpop.f32.mrb[47].mxu0 }
 0x136   :  { %794 = vrot.lane.b32.xlu1 %v4921_v14, %s4574_s12 }
 0x137   :  { %800 = vrot.lane.b32.xlu0 %v4925_v15, %s4574_s12 }
 0x139   :  { %v4933_v17 = vpop.f32.mrb[48].mxu0 }
 0x13a   :  { %806 = vrot.lane.b32.xlu1 %v4933_v17, %s4574_s12  ;;  %v4937_v18 = vpop.f32.mrb[49].mxu0 }
 0x13b   :  { %796 = vrot.lane.b32.xlu0 %v4927_v16, %s4574_s12  ;;  %v4941_v19 = vpop.f32.mrb[50].mxu0 }
 0x13c   :  { %v4943_v20 = vpop.f32.mrb[51].mxu0 }
 0x13e   :  { %802 = vrot.lane.b32.xlu1 %v4937_v18, %s4574_s12 }
 0x13f   :  { %808 = vrot.lane.b32.xlu0 %v4941_v19, %s4574_s12 }
 0x141   :  { %v4949_v21 = vpop.f32.mrb[52].mxu0 }
 0x142   :  { %814 = vrot.lane.b32.xlu1 %v4949_v21, %s4574_s12  ;;  %v4953_v22 = vpop.f32.mrb[53].mxu0 }
 0x143   :  { %804 = vrot.lane.b32.xlu0 %v4943_v20, %s4574_s12  ;;  %v4957_v23 = vpop.f32.mrb[54].mxu0 }
 0x144   :  { %7194 = vst [vmem:[#allocation4_spill] sm:$0xff] %v4957_v23  ;;  %v4959_v24 = vpop.f32.mrb[55].mxu0 }
 0x145   :  { %7195 = vst [vmem:[#allocation5_spill] sm:$0xff] %v4959_v24 }
 0x146   :  { %810 = vrot.lane.b32.xlu1 %v4953_v22, %s4574_s12 }
 0x147   :  { %816 = vrot.lane.b32.xlu0 %v4957_v23, %s4574_s12 }
 0x149   :  { %v4965_v25 = vpop.f32.mrb[56].mxu0 }
 0x14a   :  { %7196 = vst [vmem:[#allocation6_spill] sm:$0xff] %v4965_v25  ;;  %822 = vrot.lane.b32.xlu1 %v4965_v25, %s4574_s12  ;;  %v4969_v26 = vpop.f32.mrb[57].mxu0 }
 0x14b   :  { %7197 = vst [vmem:[#allocation7_spill] sm:$0xff] %v4969_v26  ;;  %812 = vrot.lane.b32.xlu0 %v4959_v24, %s4574_s12  ;;  %v4973_v27 = vpop.f32.mrb[58].mxu0 }
 0x14c   :  { %7198 = vst [vmem:[#allocation8_spill] sm:$0xff] %v4973_v27  ;;  %v711_v28 = vpop.permute.xlu0 %710  ;;  %v4975_v29 = vpop.f32.mrb[59].mxu0 }
 0x14d   :  { %7199 = vst [vmem:[#allocation9_spill] sm:$0xff] %v4975_v29 }
 0x14e   :  { %v713_v30 = vpop.permute.xlu1 %712  ;;  %818 = vrot.lane.b32.xlu1 %v4969_v26, %s4574_s12 }
 0x14f   :  { %v4980_v31 = vmax.f32 %v4749_v35, %v713_v30  ;;  %824 = vrot.lane.b32.xlu0 %v4973_v27, %s4574_s12  ;;  %v4995_v30 = vmax.f32 %v4743_v33, %v711_v28 }
 0x150   :  { %v707_v32 = vpop.permute.xlu0 %706 }
 0x151   :  { %7200 = vst [vmem:[#allocation10_spill] sm:$0xff] %v4980_v31  ;;  %v4984_v15 = vpop.f32.mrb[60].mxu0  ;;  %v5007_v23 = vmax.f32 %v4747_v34, %v707_v32 }
 0x152   :  { %7201 = vst [vmem:[#allocation11_spill] sm:$0xff] %v4984_v15  ;;  %1032 = vrot.lane.b32.xlu1 %v4980_v31, %s4575_s0  ;;  %v4988_v63 = vpop.f32.mrb[61].mxu0 }
 0x153   :  { %7202 = vst [vmem:[#allocation12_spill] sm:$0xff] %v4988_v63  ;;  %820 = vrot.lane.b32.xlu0 %v4975_v29, %s4574_s12  ;;  %v4992_v24 = vpop.f32.mrb[62].mxu0  ;;  %7204 = vst [vmem:[#allocation14_spill] sm:$0xff] %v5007_v23 }
 0x154   :  { %7203 = vst [vmem:[#allocation13_spill] sm:$0xff] %v4992_v24  ;;  %v709_v26 = vpop.permute.xlu0 %708  ;;  %v719_v35 = vpop.permute.xlu1 %718 }
 0x155   :  { %v4997_v27 = vpop.f32.mrb[63].mxu0  ;;  %v5004_v31 = vmax.f32 %v4753_v36, %v709_v26  ;;  %v5025_v34 = vmax.f32 %v4757_v37, %v719_v35 }
 0x156   :  { %830 = vrot.lane.b32.xlu1 %v4984_v15, %s4574_s12 }
 0x157   :  { %1030 = vrot.lane.b32.xlu0 %v4995_v30, %s4575_s0 }
 0x158   :  { %v715_v25 = vpop.permute.xlu1 %714  ;;  %v721_v29 = vpop.permute.xlu0 %720 }
 0x159   :  { %v5018_v15 = vmax.f32 %v4763_v38, %v715_v25 }
 0x15a   :  { %1028 = vrot.lane.b32.xlu1 %v5004_v31, %s4575_s0 }
 0x15b   :  { %1026 = vrot.lane.b32.xlu0 %v5007_v23, %s4575_s0  ;;  %7205 = vst [vmem:[#allocation15_spill] sm:$0xff] %v5018_v15 }
 0x15c   :  { %v717_v33 = vpop.permute.xlu0 %716  ;;  %v727_v28 = vpop.permute.xlu1 %726 }
 0x15d   :  { %v5035_v38 = vmax.f32 %v4773_v41, %v727_v28 }
 0x15e   :  { %826 = vrot.lane.b32.xlu1 %v4988_v63, %s4574_s12  ;;  %v5028_v63 = vmax.f32 %v4765_v39, %v721_v29 }
 0x15f   :  { %828 = vrot.lane.b32.xlu0 %v4997_v27, %s4574_s12 }
 0x160   :  { %v723_v36 = vpop.permute.xlu1 %722  ;;  %v729_v26 = vpop.permute.xlu0 %728 }
 0x161   :  { %v5045_v37 = vmax.f32 %v4779_v42, %v723_v36  ;;  %v5048_v35 = vmax.f32 %v4781_v43, %v729_v26 }
 0x162   :  { %832 = vrot.lane.b32.xlu1 %v4992_v24, %s4574_s12 }
 0x163   :  { %1034 = vrot.lane.b32.xlu0 %v5018_v15, %s4575_s0  ;;  %v5038_v15 = vmax.f32 %v4767_v40, %v717_v33 }
 0x164   :  { %v725_v32 = vpop.permute.xlu0 %724  ;;  %v735_v23 = vpop.permute.xlu1 %734 }
 0x165   :  { %v5058_v28 = vmax.f32 %v4783_v44, %v725_v32  ;;  %v5068_v26 = vmax.f32 %v4789_v45, %v735_v23 }
 0x166   :  { %1038 = vrot.lane.b32.xlu1 %v5025_v34, %s4575_s0 }
 0x167   :  { %1040 = vrot.lane.b32.xlu0 %v5028_v63, %s4575_s0 }
 0x168   :  { %v731_v25 = vpop.permute.xlu1 %730  ;;  %v737_v24 = vpop.permute.xlu0 %736 }
 0x169   :  { %v5055_v40 = vmax.f32 %v4795_v46, %v731_v25  ;;  %v5078_v25 = vmax.f32 %v4797_v47, %v737_v24 }
 0x16a   :  { %1046 = vrot.lane.b32.xlu1 %v5035_v38, %s4575_s0 }
 0x16b   :  { %1036 = vrot.lane.b32.xlu0 %v5038_v15, %s4575_s0  ;;  %7206 = vst [vmem:[#allocation16_spill] sm:$0xff] %v5078_v25 }
 0x16c   :  { %v733_v39 = vpop.permute.xlu0 %732  ;;  %v743_v29 = vpop.permute.xlu1 %742 }
 0x16d   :  { %v5065_v42 = vmax.f32 %v4799_v48, %v733_v39  ;;  %v5075_v44 = vmax.f32 %v4805_v49, %v743_v29 }
 0x16e   :  { %1042 = vrot.lane.b32.xlu1 %v5045_v37, %s4575_s0 }
 0x16f   :  { %1048 = vrot.lane.b32.xlu0 %v5048_v35, %s4575_s0 }
 0x170   :  { %v739_v41 = vpop.permute.xlu1 %738  ;;  %v745_v33 = vpop.permute.xlu0 %744 }
 0x171   :  { %v5085_v45 = vmax.f32 %v4811_v50, %v739_v41  ;;  %v5088_v39 = vmax.f32 %v4813_v51, %v745_v33 }
 0x172   :  { %1050 = vrot.lane.b32.xlu1 %v5055_v40, %s4575_s0 }
 0x173   :  { %1044 = vrot.lane.b32.xlu0 %v5058_v28, %s4575_s0  ;;  %7207 = vst [vmem:[#allocation17_spill] sm:$0xff] %v5085_v45 }
 0x174   :  { %v741_v43 = vpop.permute.xlu0 %740  ;;  %v751_v36 = vpop.permute.xlu1 %750 }
 0x175   :  { %v5095_v47 = vmax.f32 %v4821_v53, %v751_v36  ;;  %v5098_v29 = vmax.f32 %v4815_v52, %v741_v43 }
 0x176   :  { %1052 = vrot.lane.b32.xlu1 %v5065_v42, %s4575_s0 }
 0x177   :  { %1054 = vrot.lane.b32.xlu0 %v5068_v26, %s4575_s0 }
 0x178   :  { %v747_v46 = vpop.permute.xlu1 %746  ;;  %v753_v32 = vpop.permute.xlu0 %752 }
 0x179   :  { %v5105_v50 = vmax.f32 %v4827_v54, %v747_v46  ;;  %v5108_v33 = vmax.f32 %v4829_v55, %v753_v32 }
 0x17a   :  { %1062 = vrot.lane.b32.xlu1 %v5075_v44, %s4575_s0 }
 0x17b   :  { %1056 = vrot.lane.b32.xlu0 %v5078_v25, %s4575_s0 }
 0x17c   :  { %v749_v48 = vpop.permute.xlu0 %748  ;;  %v759_v23 = vpop.permute.xlu1 %758 }
 0x17d   :  { %v5118_v36 = vmax.f32 %v4831_v56, %v749_v48  ;;  %v5130_v46 = vmax.f32 %v4837_v57, %v759_v23 }
 0x17e   :  { %1058 = vrot.lane.b32.xlu1 %v5085_v45, %s4575_s0 }
 0x17f   :  { %1064 = vrot.lane.b32.xlu0 %v5088_v39, %s4575_s0 }
 0x180   :  { %v755_v49 = vpop.permute.xlu1 %754  ;;  %v761_v24 = vpop.permute.xlu0 %760 }
 0x181   :  { %v5115_v52 = vmax.f32 %v4843_v58, %v755_v49  ;;  %v5125_v54 = vmax.f32 %v4845_v59, %v761_v24 }
 0x182   :  { %1070 = vrot.lane.b32.xlu1 %v5095_v47, %s4575_s0 }
 0x183   :  { %1060 = vrot.lane.b32.xlu0 %v5098_v29, %s4575_s0 }
 0x184   :  { %v757_v51 = vpop.permute.xlu0 %756  ;;  %v767_v41 = vpop.permute.xlu1 %766 }
 0x185   :  { %v5137_v56 = vmax.f32 %v4847_v60, %v757_v51  ;;  %v5147_v57 = vmax.f32 %v4853_v61, %v767_v41 }
 0x186   :  { %1066 = vrot.lane.b32.xlu1 %v5105_v50, %s4575_s0 }
 0x187   :  { %1072 = vrot.lane.b32.xlu0 %v5108_v33, %s4575_s0 }
 0x188   :  { %v763_v53 = vpop.permute.xlu1 %762  ;;  %v765_v43 = vpop.permute.xlu0 %764 }
 0x189   :  { %v5140_v48 = vmax.f32 %v4859_v62, %v763_v53  ;;  %v5150_v49 = vmax.f32 %v4863_v0, %v765_v43 }
 0x18a   :  { %1074 = vrot.lane.b32.xlu1 %v5115_v52, %s4575_s0 }
 0x18b   :  { %1068 = vrot.lane.b32.xlu0 %v5118_v36, %s4575_s0 }
 0x18c   :  { %v5127_v55 = vpop.permute.xlu1 %768 }
 0x18d   :  { %7208 = vst [vmem:[#allocation18_spill] sm:$0xff] %v5127_v55  ;;  %v771_v58 = vpop.permute.xlu0 %770 }
 0x18e   :  { %1080 = vrot.lane.b32.xlu1 %v5125_v54, %s4575_s0  ;;  %v5170_v53 = vmax.f32 %v4873_v2, %v771_v58 }
 0x18f   :  { %1078 = vrot.lane.b32.xlu0 %v5130_v46, %s4575_s0 }
 0x190   :  { %v775_v32 = vpop.permute.xlu1 %774  ;;  %7209 = vst [vmem:[#allocation19_spill] sm:$0xff] %v5170_v53 }
 0x191   :  { %v777_v59 = vpop.permute.xlu0 %776  ;;  %v5160_v51 = vmax.f32 %v4869_v1, %v775_v32 }
 0x192   :  { %1076 = vrot.lane.b32.xlu1 %v5137_v56, %s4575_s0  ;;  %v5180_v32 = vmax.f32 %v4877_v3, %v777_v59 }
 0x193   :  { %1082 = vrot.lane.b32.xlu0 %v5140_v48, %s4575_s0 }
 0x194   :  { %v783_v23 = vpop.permute.xlu1 %782 }
 0x195   :  { %v773_v60 = vpop.permute.xlu0 %772  ;;  %v5167_v0 = vmax.f32 %v4885_v5, %v783_v23 }
 0x196   :  { %1086 = vrot.lane.b32.xlu1 %v5147_v57, %s4575_s0  ;;  %v5157_v62 = vmax.f32 %v4879_v4, %v773_v60 }
 0x197   :  { %1084 = vrot.lane.b32.xlu0 %v5150_v49, %s4575_s0 }
 0x198   :  { %v779_v24 = vpop.permute.xlu1 %778 }
 0x199   :  { %v785_v61 = vpop.permute.xlu0 %784  ;;  %v5177_v1 = vmax.f32 %v4889_v6, %v779_v24 }
 0x19a   :  { %1092 = vrot.lane.b32.xlu1 %v5157_v62, %s4575_s0  ;;  %v5190_v23 = vmax.f32 %v4893_v7, %v785_v61 }
 0x19b   :  { %1094 = vrot.lane.b32.xlu0 %v5160_v51, %s4575_s0 }
 0x19c   :  { %v791_v41 = vpop.permute.xlu1 %790  ;;  %7211 = vst [vmem:[#allocation21_spill] sm:$0xff] %v5190_v23 }
 0x19d   :  { %v781_v4 = vpop.permute.xlu0 %780  ;;  %v5187_v2 = vmax.f32 %v4901_v9, %v791_v41 }
 0x19e   :  { %1102 = vrot.lane.b32.xlu1 %v5167_v0, %s4575_s0  ;;  %v5200_v60 = vmax.f32 %v4895_v8, %v781_v4 }
 0x19f   :  { %1090 = vrot.lane.b32.xlu0 %v5170_v53, %s4575_s0  ;;  %7210 = vst [vmem:[#allocation20_spill] sm:$0xff] %v5187_v2  ;;  %v7237_v53 = vld [vmem:[#allocation11_spill] sm:$0xff] }
 0x1a0   :  { %v787_v43 = vpop.permute.xlu1 %786  ;;  %7213 = vst [vmem:[#allocation23_spill] sm:$0xff] %v5200_v60 }
 0x1a1   :  { %v793_v5 = vpop.permute.xlu0 %792  ;;  %v5197_v3 = vmax.f32 %v4905_v10, %v787_v43 }
 0x1a2   :  { %1098 = vrot.lane.b32.xlu1 %v5177_v1, %s4575_s0  ;;  %v5212_v61 = vmax.f32 %v4909_v11, %v793_v5 }
 0x1a3   :  { %1096 = vrot.lane.b32.xlu0 %v5180_v32, %s4575_s0  ;;  %7212 = vst [vmem:[#allocation22_spill] sm:$0xff] %v5197_v3 }
 0x1a4   :  { %v799_v58 = vpop.permute.xlu1 %798  ;;  %7216 = vst [vmem:[#allocation26_spill] sm:$0xff] %v5212_v61 }
 0x1a5   :  { %v789_v6 = vpop.permute.xlu0 %788  ;;  %v5209_v7 = vmax.f32 %v4917_v13, %v799_v58 }
 0x1a6   :  { %1110 = vrot.lane.b32.xlu1 %v5187_v2, %s4575_s0  ;;  %v5222_v4 = vmax.f32 %v4911_v12, %v789_v6  ;;  %v4536_v2 = vld [vmem:[%s7115_s3 + $0x68] sm:$0xff]  }
 0x1a7   :  { %1104 = vrot.lane.b32.xlu0 %v5190_v23, %s4575_s0  ;;  %7215 = vst [vmem:[#allocation25_spill] sm:$0xff] %v5209_v7 }
 0x1a8   :  { %v795_v59 = vpop.permute.xlu1 %794  ;;  %7218 = vst [vmem:[#allocation28_spill] sm:$0xff] %v5222_v4 }
 0x1a9   :  { %v5202_v9 = vpop.permute.xlu0 %800  ;;  %v5219_v8 = vmax.f32 %v4921_v14, %v795_v59 }
 0x1aa   :  { %7214 = vst [vmem:[#allocation24_spill] sm:$0xff] %v5202_v9  ;;  %1106 = vrot.lane.b32.xlu1 %v5197_v3, %s4575_s0 }
 0x1ab   :  { %1100 = vrot.lane.b32.xlu0 %v5200_v60, %s4575_s0  ;;  %7217 = vst [vmem:[#allocation27_spill] sm:$0xff] %v5219_v8 }
 0x1ac   :  { %v807_v24 = vpop.permute.xlu1 %806 }
 0x1ad   :  { %v797_v10 = vpop.permute.xlu0 %796  ;;  %v5229_v11 = vmax.f32 %v4933_v17, %v807_v24 }
 0x1ae   :  { %1118 = vrot.lane.b32.xlu1 %v5209_v7, %s4575_s0  ;;  %v5232_v5 = vmax.f32 %v4927_v16, %v797_v10 }
 0x1af   :  { %1112 = vrot.lane.b32.xlu0 %v5212_v61, %s4575_s0  ;;  %7219 = vst [vmem:[#allocation29_spill] sm:$0xff] %v5229_v11 }
 0x1b0   :  { %v803_v41 = vpop.permute.xlu1 %802  ;;  %7220 = vst [vmem:[#allocation30_spill] sm:$0xff] %v5232_v5 }
 0x1b1   :  { %v809_v13 = vpop.permute.xlu0 %808  ;;  %v5239_v12 = vmax.f32 %v4937_v18, %v803_v41  ;;  %v7226_v41 = vld [vmem:[#allocation4_spill] sm:$0xff] }
 0x1b2   :  { %1114 = vrot.lane.b32.xlu1 %v5219_v8, %s4575_s0  ;;  %v5242_v6 = vmax.f32 %v4941_v19, %v809_v13 }
 0x1b3   :  { %1108 = vrot.lane.b32.xlu0 %v5222_v4, %s4575_s0  ;;  %7221 = vst [vmem:[#allocation31_spill] sm:$0xff] %v5239_v12 }
 0x1b4   :  { %v815_v43 = vpop.permute.xlu1 %814  ;;  %7222 = vst [vmem:[#allocation32_spill] sm:$0xff] %v5242_v6 }
 0x1b5   :  { %v805_v14 = vpop.permute.xlu0 %804  ;;  %v5249_v16 = vmax.f32 %v4949_v21, %v815_v43 }
 0x1b6   :  { %1126 = vrot.lane.b32.xlu1 %v5229_v11, %s4575_s0  ;;  %v5252_v24 = vmax.f32 %v4943_v20, %v805_v14  ;;  %v7228_v20 = vld [vmem:[#allocation6_spill] sm:$0xff] }
 0x1b7   :  { %1116 = vrot.lane.b32.xlu0 %v5232_v5, %s4575_s0  ;;  %7223 = vst [vmem:[#allocation33_spill] sm:$0xff] %v5249_v16 }
 0x1b8   :  { %v811_v58 = vpop.permute.xlu1 %810  ;;  %7224 = vst [vmem:[#allocation34_spill] sm:$0xff] %v5252_v24 }
 0x1b9   :  { %v817_v17 = vpop.permute.xlu0 %816  ;;  %v5259_v19 = vmax.f32 %v4953_v22, %v811_v58  ;;  %v7232_v22 = vld [vmem:[#allocation10_spill] sm:$0xff] }
 0x1ba   :  { %1122 = vrot.lane.b32.xlu1 %v5239_v12, %s4575_s0  ;;  %v5262_v13 = vmax.f32 %v7226_v41, %v817_v17  ;;  %v7230_v12 = vld [vmem:[#allocation5_spill] sm:$0xff]  ;;  %v5278_v17 = vld [vmem:[%s7113_s2] ss:$0 sm:$0xff] }
 0x1bb   :  { %1128 = vrot.lane.b32.xlu0 %v5242_v6, %s4575_s0  ;;  %7225 = vst [vmem:[#allocation35_spill] sm:$0xff] %v5259_v19 }
 0x1bc   :  { %v823_v59 = vpop.permute.xlu1 %822  ;;  %7227 = vst [vmem:[#allocation4_spill] sm:$0xff] %v5262_v13 }
 0x1bd   :  { %v813_v18 = vpop.permute.xlu0 %812  ;;  %v5269_v43 = vmax.f32 %v7228_v20, %v823_v59  ;;  %v7233_v59 = vld [vmem:[#allocation7_spill] sm:$0xff] }
 0x1be   :  { %1134 = vrot.lane.b32.xlu1 %v5249_v16, %s4575_s0  ;;  %v5272_v9 = vmax.f32 %v7230_v12, %v813_v18  ;;  %v7235_v12 = vld [vmem:[#allocation8_spill] sm:$0xff] }
 0x1bf   :  { %1124 = vrot.lane.b32.xlu0 %v5252_v24, %s4575_s0  ;;  %7229 = vst [vmem:[#allocation6_spill] sm:$0xff] %v5269_v43 }
 0x1c0   :  { %v819_v10 = vpop.permute.xlu1 %818  ;;  %7231 = vst [vmem:[#allocation5_spill] sm:$0xff] %v5272_v9 }
 0x1c1   :  { %v825_v21 = vpop.permute.xlu0 %824  ;;  %v5285_v41 = vmax.f32 %v7233_v59, %v819_v10 }
 0x1c2   :  { %1130 = vrot.lane.b32.xlu1 %v5259_v19, %s4575_s0  ;;  %v5288_v18 = vmax.f32 %v7235_v12, %v825_v21  ;;  %v7239_v21 = vld [vmem:[#allocation9_spill] sm:$0xff] }
 0x1c3   :  { %1136 = vrot.lane.b32.xlu0 %v5262_v13, %s4575_s0  ;;  %7234 = vst [vmem:[#allocation10_spill] sm:$0xff] %v5285_v41 }
 0x1c4   :  { %v1033_v14 = vpop.permute.xlu1 %1032  ;;  %7236 = vst [vmem:[#allocation7_spill] sm:$0xff] %v5288_v18 }
 0x1c5   :  { %v1221_v58 = vmax.f32 %v7232_v22, %v1033_v14  ;;  %v821_v55 = vpop.permute.xlu0 %820 }
 0x1c6   :  { %1142 = vrot.lane.b32.xlu1 %v5269_v43, %s4575_s0  ;;  %v5301_v12 = vmax.f32 %v7239_v21, %v821_v55  ;;  %v7242_v21 = vld [vmem:[#allocation12_spill] sm:$0xff] }
 0x1c7   :  { %1132 = vrot.lane.b32.xlu0 %v5272_v9, %s4575_s0  ;;  %v1292_v14 = vadd.f32 %v5278_v17, %v1221_v58 }
 0x1c8   :  { %v831_v20 = vpop.permute.xlu1 %830  ;;  %7240 = vst [vmem:[#allocation11_spill] sm:$0xff] %v5301_v12 }
 0x1c9   :  { %v1031_v22 = vpop.permute.xlu0 %1030  ;;  %v5297_v25 = vmax.f32 %v7237_v53, %v831_v20  ;;  %v1356_v9 = vmax.f32 %v1292_v14, 0.0  ;;  %v5314_v53 = vld [vmem:[%s7114_s5 + $0x18] sm:$0xff] }
 0x1ca   :  { %v1220_v45 = vmax.f32 %v4995_v30, %v1031_v22  ;;  %1138 = vrot.lane.b32.xlu1 %v5285_v41, %s4575_s0  ;;  %v5306_v30 = vld [vmem:[%s7114_s5 + $0x10] sm:$0xff] }
 0x1cb   :  { %1144 = vrot.lane.b32.xlu0 %v5288_v18, %s4575_s0  ;;  %7238 = vst [vmem:[#allocation8_spill] sm:$0xff] %v5297_v25 }
 0x1cc   :  { %v1291_v10 = vadd.f32 %v5278_v17, %v1220_v45  ;;  %v1029_v59 = vpop.permute.xlu1 %1028 }
 0x1cd   :  { %v1219_v58 = vmax.f32 %v5004_v31, %v1029_v59  ;;  %v5309_v22 = vpop.permute.xlu0 %1026  ;;  %v1436_v31 = vmul.f32 %v5314_v53, %v1356_v9 }
 0x1ce   :  { %7241 = vst [vmem:[#allocation9_spill] sm:$0xff] %v5309_v22  ;;  %v1355_v45 = vmax.f32 %v1291_v10, 0.0  ;;  %1150 = vrot.lane.b32.xlu1 %v5297_v25, %s4575_s0  ;;  %v5329_v10 = vld [vmem:[%s7114_s5 + $0x8] sm:$0xff] }
 0x1cf   :  { %v1290_v55 = vadd.f32 %v5278_v17, %v1219_v58  ;;  %1140 = vrot.lane.b32.xlu0 %v5301_v12, %s4575_s0 }
 0x1d0   :  { %v1435_v20 = vmul.f32 %v5306_v30, %v1355_v45  ;;  %v827_v14 = vpop.permute.xlu1 %826 }
 0x1d1   :  { %v1354_v59 = vmax.f32 %v1290_v55, 0.0  ;;  %v5324_v18 = vmax.f32 %v7242_v21, %v827_v14  ;;  %v829_v41 = vpop.permute.xlu0 %828  ;;  %v1500_v55 = vpack.c.bf16 %v1436_v31, %v1436_v31  ;;  %v7246_v21 = vld [vmem:[#allocation15_spill] sm:$0xff]  ;;  %v5350_v31 = vld [vmem:[%s7114_s5 + $0x20] sm:$0xff] }
 0x1d2   :  { %v1499_v43 = vpack.c.bf16 %v1435_v20, %v1435_v20  ;;  %v5332_v58 = vmax.f32 %v4997_v27, %v829_v41 }
 0x1d3   :  { %7243 = vst [vmem:[#allocation12_spill] sm:$0xff] %v5324_v18  ;;  %1146 = vrot.lane.b32.xlu1 %v5324_v18, %s4575_s0  ;;  %v1434_v20 = vmul.f32 %v5329_v10, %v1354_v59 }
 0x1d4   :  { %7244 = vst [vmem:[#allocation36_spill] sm:$0xff] %v5332_v58  ;;  %v5336_v45 = vpop.permute.xlu1 %832  ;;  %1148 = vrot.lane.b32.xlu0 %v5332_v58, %s4575_s0  ;;  %v1869_v9 = vshll.u32 %v1499_v43, 16 }
 0x1d5   :  { %7245 = vst [vmem:[#allocation37_spill] sm:$0xff] %v5336_v45  ;;  %v1035_v14 = vpop.permute.xlu0 %1034  ;;  %v1867_v45 = vshrl.u32 %v1499_v43, 16  ;;  %v5345_v18 = vpack.c.bf16 %v1434_v20, %v1434_v20  ;;  %v5361_v20 = vld [vmem:[%s7114_s5 + $0x30] sm:$0xff] }
 0x1d6   :  { %v1222_v25 = vmax.f32 %v7246_v21, %v1035_v14  ;;  %v1871_v12 = vrot.slane %v1869_v9, 1 }
 0x1d7   :  { %2177 = vrot.lane.b32.xlu1 %v1500_v55, %s4576_s21 }
 0x1d8   :  { %v1293_v27 = vadd.f32 %v5278_v17, %v1222_v25  ;;  %v1039_v41 = vpop.permute.xlu1 %1038  ;;  %2175 = vrot.lane.b32.xlu0 %v1499_v43, %s4576_s21  ;;  %v1872_v58 = vor.u32 %v1871_v12, %v1867_v45 }
 0x1d9   :  { %v1224_v59 = vmax.f32 %v5025_v34, %v1039_v41  ;;  %v1041_v14 = vpop.permute.xlu0 %1040 }
 0x1da   :  { %v1357_v9 = vmax.f32 %v1293_v27, 0.0  ;;  %v1225_v21 = vmax.f32 %v5028_v63, %v1041_v14  ;;  %v1876_v27 = vshll.u32 %v1500_v55, 16  ;;  %v5367_v63 = vld [vmem:[%s7114_s5 + $0x38] sm:$0xff] }
 0x1db   :  { %v1295_v25 = vadd.f32 %v5278_v17, %v1224_v59  ;;  %2173 = vrot.lane.b32.xlu1 %v5345_v18, %s4576_s21  ;;  %v7247_v59 = vmov 0 }
 0x1dc   :  { %v1437_v43 = vmul.f32 %v5350_v31, %v1357_v9  ;;  %v1296_v34 = vadd.f32 %v5278_v17, %v1225_v21  ;;  %v1047_v41 = vpop.permute.xlu1 %1046  ;;  %v7248_v59 = vsel %vm5371_vm3, 4294967295, %v7247_v59  ;;  %v1878_v16 = vrot.slane %v1876_v27, 1 }
 0x1dd   :  { %v1359_v13 = vmax.f32 %v1295_v25, 0.0  ;;  %v1228_v12 = vmax.f32 %v5035_v38, %v1047_v41  ;;  %v1037_v45 = vpop.permute.xlu0 %1036  ;;  %7249 = vst [vmem:[#allocation15_spill] sm:$0xff] %v7248_v59  ;;  %v2113_v25 = vsel %vm5371_vm3, %v1872_v58, 0 }
 0x1de   :  { %v1501_v14 = vpack.c.bf16 %v1437_v43, %v1437_v43  ;;  %v1360_v9 = vmax.f32 %v1296_v34, 0.0  ;;  %v1223_v21 = vmax.f32 %v5038_v15, %v1037_v45  ;;  %v5386_v15 = vld [vmem:[%s7114_s5 + $0x28] sm:$0xff]  ;;  %v1862_v34 = vshll.u32 %v5345_v18, 16 }
 0x1df   :  { %v1439_v22 = vmul.f32 %v5361_v20, %v1359_v13  ;;  %v1299_v19 = vadd.f32 %v5278_v17, %v1228_v12  ;;  %2343 = vrot.lane.b32.xlu1 %v2113_v25, %s4574_s12  ;;  %v1874_v25 = vshrl.u32 %v1500_v55, 16 }
 0x1e0   :  { %v1440_v38 = vmul.f32 %v5367_v63, %v1360_v9  ;;  %v1294_v41 = vadd.f32 %v5278_v17, %v1223_v21  ;;  %v1043_v24 = vpop.permute.xlu1 %1042  ;;  %v1883_v6 = vshll.u32 %v1501_v14, 16 }
 0x1e1   :  { %v1503_v43 = vpack.c.bf16 %v1439_v22, %v1439_v22  ;;  %v1226_v58 = vmax.f32 %v5045_v37, %v1043_v24  ;;  %v1049_v13 = vpop.permute.xlu0 %1048  ;;  %v1363_v9 = vmax.f32 %v1299_v19, 0.0  ;;  %v5394_v22 = vld [vmem:[%s7114_s5 + $0x50] sm:$0xff]  ;;  %v1879_v37 = vor.u32 %v1878_v16, %v1874_v25 }
 0x1e2   :  { %v1504_v12 = vpack.c.bf16 %v1440_v38, %v1440_v38  ;;  %v1358_v45 = vmax.f32 %v1294_v41, 0.0  ;;  %v1885_v21 = vrot.slane %v1883_v6, 1  ;;  %v1229_v38 = vmax.f32 %v5048_v35, %v1049_v13 }
 0x1e3   :  { %2183 = vrot.lane.b32.xlu0 %v1503_v43, %s4576_s21  ;;  %v1297_v24 = vadd.f32 %v5278_v17, %v1226_v58  ;;  %v1881_v19 = vshrl.u32 %v1501_v14, 16  ;;  %v1864_v41 = vrot.slane %v1862_v34, 1  ;;  %v1897_v6 = vshll.u32 %v1503_v43, 16 }
 0x1e4   :  { %v1438_v27 = vmul.f32 %v5386_v15, %v1358_v45  ;;  %v1051_v11 = vpop.permute.xlu1 %1050  ;;  %2185 = vrot.lane.b32.xlu1 %v1504_v12, %s4576_s21  ;;  %v1443_v7 = vmul.f32 %v5394_v22, %v1363_v9  ;;  %v1860_v45 = vshrl.u32 %v5345_v18, 16  ;;  %v1904_v4 = vshll.u32 %v1504_v12, 16 }
 0x1e5   :  { %v1045_v55 = vpop.permute.xlu0 %1044  ;;  %v1886_v8 = vor.u32 %v1885_v21, %v1881_v19  ;;  %v2114_v35 = vsel %vm5371_vm3, %v1879_v37, 0  ;;  %v1361_v16 = vmax.f32 %v1297_v24, 0.0  ;;  %v1300_v58 = vadd.f32 %v5278_v17, %v1229_v38 }
 0x1e6   :  { %v1502_v5 = vpack.c.bf16 %v1438_v27, %v1438_v27  ;;  %v1230_v13 = vmax.f32 %v5055_v40, %v1051_v11  ;;  %v1865_v25 = vor.u32 %v1864_v41, %v1860_v45  ;;  %v1227_v18 = vmax.f32 %v5058_v28, %v1045_v55 }
 0x1e7   :  { %2179 = vrot.lane.b32.xlu0 %v1501_v14, %s4576_s21  ;;  %v5413_v14 = vld [vmem:[%s7114_s5 + $0x40] sm:$0xff]  ;;  %v1899_v21 = vrot.slane %v1897_v6, 1  ;;  %v1507_v19 = vpack.c.bf16 %v1443_v7, %v1443_v7  ;;  %v2115_v37 = vsel %vm5371_vm3, %v1886_v8, 0  ;;  %v1906_v40 = vrot.slane %v1904_v4, 1  ;;  %v5432_v8 = vld [vmem:[%s7114_s5 + $0x58] sm:$0xff] }
 0x1e8   :  { %v5403_v61 = vpop.permute.xlu1 %1052  ;;  %2181 = vrot.lane.b32.xlu1 %v1502_v5, %s4576_s21  ;;  %v1890_v27 = vshll.u32 %v1502_v5, 16  ;;  %v1895_v38 = vshrl.u32 %v1503_v43, 16  ;;  %v1441_v28 = vmul.f32 %v5413_v14, %v1361_v16  ;;  %v1364_v55 = vmax.f32 %v1300_v58, 0.0 }
 0x1e9   :  { %v1055_v34 = vpop.permute.xlu0 %1054  ;;  %v2112_v7 = vsel %vm5371_vm3, %v1865_v25, 0  ;;  %v1902_v41 = vshrl.u32 %v1504_v12, 16  ;;  %v1301_v4 = vadd.f32 %v5278_v17, %v1230_v13  ;;  %v1298_v6 = vadd.f32 %v5278_v17, %v1227_v18  ;;  %v5440_v12 = vld [vmem:[%s7114_s5 + $0x70] sm:$0xff]  ;;  %v4527_v13 = vld [vmem:[%s7115_s3 + $0x40] sm:$0xff]  }
 0x1ea   :  { %v1232_v9 = vmax.f32 %v5068_v26, %v1055_v34  ;;  %v1900_v45 = vor.u32 %v1899_v21, %v1895_v38  ;;  %v1892_v43 = vrot.slane %v1890_v27, 1  ;;  %v1925_v58 = vshll.u32 %v1507_v19, 16  ;;  %4287 = vmatprep.subr.bf16.mxu1 %v4527_v13  ;;  %v5459_v38 = vld [vmem:[%s7114_s5 + $0x48] sm:$0xff] }
 0x1eb   :  { %2345 = vrot.lane.b32.xlu0 %v2114_v35, %s4574_s12  ;;  %v1907_v16 = vor.u32 %v1906_v40, %v1902_v41  ;;  %v1444_v25 = vmul.f32 %v5432_v8, %v1364_v55  ;;  %v1505_v21 = vpack.c.bf16 %v1441_v28, %v1441_v28  ;;  %v1365_v27 = vmax.f32 %v1301_v4, 0.0  ;;  %4288 = vmatpush3.bf16.msra.mxu1 %v4527_v13  ;;  %v4529_v41 = vld [vmem:[%s7115_s3 + $0x80] sm:$0xff]  }
 0x1ec   :  { %v1303_v11 = vadd.f32 %v5278_v17, %v1232_v9  ;;  %v5421_v24 = vpop.permute.xlu1 %1062  ;;  %2347 = vrot.lane.b32.xlu1 %v2115_v37, %s4574_s12  ;;  %v1888_v9 = vshrl.u32 %v1502_v5, 16  ;;  %v1362_v37 = vmax.f32 %v1298_v6, 0.0  ;;  %v2117_v40 = vsel %vm5371_vm3, %v1900_v45, 0  ;;  %v5471_v4 = vld [vmem:[%s7114_s5 + $0x60] sm:$0xff]  ;;  %4375 = vmatprep.subr.bf16.mxu0 %v4529_v41 }
 0x1ed   :  { %v5425_v26 = vpop.permute.xlu0 %1056  ;;  %v2118_v5 = vsel %vm5371_vm3, %v1907_v16, 0  ;;  %v1508_v16 = vpack.c.bf16 %v1444_v25, %v1444_v25  ;;  %v1911_v13 = vshll.u32 %v1505_v21, 16  ;;  %4376 = vmatpush3.bf16.msra.mxu0 %v4529_v41  ;;  %v1231_v25 = vmax.f32 %v5065_v42, %v5403_v61  ;;  %v4533_v42 = vld [vmem:[%s7115_s3 + $0x90] sm:$0xff]  }
 0x1ee   :  { %7250 = vst [vmem:[#allocation38_spill] sm:$0xff] %v5425_v26  ;;  %v1367_v35 = vmax.f32 %v1303_v11, 0.0  ;;  %v4528_v11 = vld [vmem:[%s7115_s3 + $0x48] sm:$0xff]   ;;  %v1893_v28 = vor.u32 %v1892_v43, %v1888_v9  ;;  %v4530_v43 = vld [vmem:[%s7115_s3 + $0x50] sm:$0xff]   ;;  %v1445_v9 = vmul.f32 %v5471_v4, %v1365_v27 }
 0x1ef   :  { %2341 = vrot.lane.b32.xlu0 %v2112_v7, %s4574_s12  ;;  %v1927_v7 = vrot.slane %v1925_v58, 1  ;;  %4289 = vmatprep.subr.bf16.mxu1 %v4528_v11  ;;  %v1442_v58 = vmul.f32 %v5459_v38, %v1362_v37 }
 0x1f0   :  { %v5442_v34 = vpop.permute.xlu1 %1058  ;;  %2191 = vrot.lane.b32.xlu1 %v1507_v19, %s4576_s21  ;;  %v1447_v55 = vmul.f32 %v5440_v12, %v1367_v35  ;;  %v1923_v35 = vshrl.u32 %v1507_v19, 16  ;;  %4290 = vmatpush3.bf16.msra.mxu1 %v4528_v11  ;;  %v4531_v19 = vld [vmem:[%s7115_s3 + $0x88] sm:$0xff]   ;;  %v5502_v61 = vpack.c.bf16 %v1445_v9, %v1445_v9  ;;  %v4534_v9 = vld [vmem:[%s7115_s3 + $0x60] sm:$0xff]  }
 0x1f1   :  { %7251 = vst [vmem:[#allocation39_spill] sm:$0xff] %v5442_v34  ;;  %v5449_v18 = vpop.permute.xlu0 %1064  ;;  %4291 = vmatprep.subr.bf16.mxu1 %v4530_v43  ;;  %4377 = vmatprep.subr.bf16.mxu0 %v4531_v19  ;;  %v5497_v11 = vpack.c.bf16 %v1442_v58, %v1442_v58 }
 0x1f2   :  { %v1928_v34 = vor.u32 %v1927_v7, %v1923_v35  ;;  %v1932_v7 = vshll.u32 %v1508_v16, 16  ;;  %4378 = vmatpush3.bf16.msra.mxu0 %v4531_v19 }
 0x1f3   :  { %2351 = vrot.lane.b32.xlu0 %v2117_v40, %s4574_s12  ;;  %v1511_v40 = vpack.c.bf16 %v1447_v55, %v1447_v55  ;;  %v4532_v55 = vld [vmem:[%s7115_s3 + $0x58] sm:$0xff]   ;;  %4379 = vmatprep.subr.bf16.mxu0 %v4533_v42 }
 0x1f4   :  { %v5473_v6 = vpop.permute.xlu1 %1070  ;;  %2353 = vrot.lane.b32.xlu1 %v2118_v5, %s4574_s12  ;;  %v2116_v5 = vsel %vm5371_vm3, %v1893_v28, 0  ;;  %v1913_v28 = vrot.slane %v1911_v13, 1  ;;  %v2121_v41 = vsel %vm5371_vm3, %v1928_v34, 0  ;;  %4292 = vmatpush3.bf16.msra.mxu1 %v4530_v43  ;;  %v1909_v13 = vshrl.u32 %v1505_v21, 16 }
 0x1f5   :  { %v1061_v45 = vpop.permute.xlu0 %1060  ;;  %v1953_v35 = vshll.u32 %v1511_v40, 16  ;;  %4293 = vmatprep.subr.bf16.mxu1 %v4532_v55  ;;  %v1934_v3 = vrot.slane %v1932_v7, 1  ;;  %v1918_v43 = vshll.u32 %v5497_v11, 16  ;;  %v5530_v7 = vld [vmem:[%s7114_s5 + $0x68] sm:$0xff] }
 0x1f6   :  { %v1235_v19 = vmax.f32 %v5098_v29, %v1061_v45  ;;  %v1914_v34 = vor.u32 %v1913_v28, %v1909_v13  ;;  %4380 = vmatpush3.bf16.msra.mxu0 %v4533_v42  ;;  %v1930_v28 = vshrl.u32 %v1508_v16, 16  ;;  %v1236_v42 = vmax.f32 %v5075_v44, %v5421_v24 }
 0x1f7   :  { %2187 = vrot.lane.b32.xlu0 %v1505_v21, %s4576_s21  ;;  %v1955_v29 = vrot.slane %v1953_v35, 1  ;;  %v1939_v21 = vshll.u32 %v5502_v61, 16  ;;  %v1920_v23 = vrot.slane %v1918_v43, 1 }
 0x1f8   :  { %v5489_v37 = vpop.permute.xlu1 %1066  ;;  %2349 = vrot.lane.b32.xlu1 %v2116_v5, %s4574_s12  ;;  %v1302_v5 = vadd.f32 %v5278_v17, %v1231_v25  ;;  %v4535_v25 = vld [vmem:[%s7115_s3 + $0x98] sm:$0xff]   ;;  %4294 = vmatpush3.bf16.msra.mxu1 %v4532_v55  ;;  %v1306_v35 = vadd.f32 %v5278_v17, %v1235_v19  ;;  %v1951_v55 = vshrl.u32 %v1511_v40, 16  ;;  %v1935_v60 = vor.u32 %v1934_v3, %v1930_v28 }
 0x1f9   :  { %v5492_v27 = vpop.permute.xlu0 %1072  ;;  %4295 = vmatprep.subr.bf16.mxu1 %v4534_v9  ;;  %4381 = vmatprep.subr.bf16.mxu0 %v4535_v25  ;;  %v1941_v24 = vrot.slane %v1939_v21, 1  ;;  %v1916_v3 = vshrl.u32 %v5497_v11, 16  ;;  %v1307_v19 = vadd.f32 %v5278_v17, %v1236_v42 }
 0x1fa   :  { %v1366_v45 = vmax.f32 %v1302_v5, 0.0  ;;  %v1238_v5 = vmax.f32 %v5105_v50, %v5489_v37  ;;  %4382 = vmatpush3.bf16.msra.mxu0 %v4535_v25  ;;  %v1956_v44 = vor.u32 %v1955_v29, %v1951_v55  ;;  %v1937_v25 = vshrl.u32 %v5502_v61, 16 }
 0x1fb   :  { %2193 = vrot.lane.b32.xlu0 %v1508_v16, %s4576_s21  ;;  %v2119_v16 = vsel %vm5371_vm3, %v1914_v34, 0  ;;  %v1237_v34 = vmax.f32 %v5088_v39, %v5449_v18  ;;  %v1241_v21 = vmax.f32 %v5108_v33, %v5492_v27  ;;  %v4538_v39 = vld [vmem:[%s7115_s3 + $0x70] sm:$0xff]   ;;  %v4539_v33 = vld [vmem:[%s7115_s3 + $0xa8] sm:$0xff]  }
 0x1fc   :  { %v5508_v58 = vpop.permute.xlu1 %1074  ;;  %2359 = vrot.lane.b32.xlu1 %v2121_v41, %s4574_s12  ;;  %4296 = vmatpush3.bf16.msra.mxu1 %v4534_v9  ;;  %v1446_v50 = vmul.f32 %v5530_v7, %v1366_v45  ;;  %v1370_v9 = vmax.f32 %v1306_v35, 0.0  ;;  %v1309_v29 = vadd.f32 %v5278_v17, %v1238_v5  ;;  %v1921_v45 = vor.u32 %v1920_v23, %v1916_v3 }
 0x1fd   :  { %v5512_v26 = vpop.permute.xlu0 %1068  ;;  %4297 = vmatprep.subr.bf16.mxu1 %v4536_v2  ;;  %v2125_v18 = vsel %vm5371_vm3, %v1956_v44, 0  ;;  %v1308_v27 = vadd.f32 %v5278_v17, %v1237_v34  ;;  %v1312_v5 = vadd.f32 %v5278_v17, %v1241_v21  ;;  %v4540_v44 = vld [vmem:[%s7115_s3 + $0x78] sm:$0xff]  }
 0x1fe   :  { %v1510_v23 = vpack.c.bf16 %v1446_v50, %v1446_v50  ;;  %v1239_v42 = vmax.f32 %v5118_v36, %v5512_v26  ;;  %v1373_v55 = vmax.f32 %v1309_v29, 0.0  ;;  %v1240_v26 = vmax.f32 %v5095_v47, %v5473_v6 }
 0x1ff   :  { %2189 = vrot.lane.b32.xlu0 %v5497_v11, %s4576_s21  ;;  %v2122_v11 = vsel %vm5371_vm3, %v1935_v60, 0  ;;  %v1371_v60 = vmax.f32 %v1307_v19, 0.0  ;;  %v1372_v3 = vmax.f32 %v1308_v27, 0.0  ;;  %v1376_v6 = vmax.f32 %v1312_v5, 0.0 }
 0x200   :  { %v5524_v41 = vpop.permute.xlu1 %1080  ;;  %2612 = vrot.lane.b32.xlu1 %v1511_v40, %s4576_s21  ;;  %v4537_v40 = vld [vmem:[%s7115_s3 + $0xa0] sm:$0xff]   ;;  %4298 = vmatpush3.bf16.msra.mxu1 %v4536_v2  ;;  %v1450_v2 = vmul.f32 %v5329_v10, %v1370_v9  ;;  %v1310_v19 = vadd.f32 %v5278_v17, %v1239_v42  ;;  %v1946_v9 = vshll.u32 %v1510_v23, 16  ;;  %v1453_v47 = vmul.f32 %v5350_v31, %v1373_v55 }
 0x201   :  { %v5535_v13 = vpop.permute.xlu0 %1078  ;;  %4383 = vmatprep.subr.bf16.mxu0 %v4537_v40  ;;  %4299 = vmatprep.subr.bf16.mxu1 %v4538_v39  ;;  %v1451_v50 = vmul.f32 %v5306_v30, %v1371_v60 }
 0x202   :  { %4384 = vmatpush3.bf16.msra.mxu0 %v4537_v40  ;;  %v4541_v40 = vld [vmem:[%s7115_s3 + $0xb0] sm:$0xff]   ;;  %v1244_v29 = vmax.f32 %v5130_v46, %v5535_v13  ;;  %v1452_v46 = vmul.f32 %v5314_v53, %v1372_v3  ;;  %v1374_v13 = vmax.f32 %v1310_v19, 0.0  ;;  %v5624_v60 = vpack.c.bf16 %v1453_v47, %v1453_v47 }
 0x203   :  { %2355 = vrot.lane.b32.xlu0 %v2119_v16, %s4574_s12  ;;  %v2120_v16 = vsel %vm5371_vm3, %v1921_v45, 0  ;;  %4385 = vmatprep.subr.bf16.mxu0 %v4539_v33  ;;  %v1242_v45 = vmax.f32 %v5115_v52, %v5508_v58  ;;  %v1456_v52 = vmul.f32 %v5367_v63, %v1376_v6 }
 0x204   :  { %v5549_v37 = vpop.permute.xlu1 %1076  ;;  %2195 = vrot.lane.b32.xlu1 %v5502_v61, %s4576_s21  ;;  %v1942_v61 = vor.u32 %v1941_v24, %v1937_v25  ;;  %4300 = vmatpush3.bf16.msra.mxu1 %v4538_v39  ;;  %v5602_v25 = vpack.c.bf16 %v1450_v2, %v1450_v2  ;;  %v1315_v58 = vadd.f32 %v5278_v17, %v1244_v29  ;;  %v1944_v2 = vshrl.u32 %v1510_v23, 16 }
 0x205   :  { %v5557_v43 = vpop.permute.xlu0 %1082  ;;  %4301 = vmatprep.subr.bf16.mxu1 %v4540_v44  ;;  %v1313_v5 = vadd.f32 %v5278_v17, %v1242_v45 }
 0x206   :  { %v2123_v36 = vsel %vm5371_vm3, %v1942_v61, 0  ;;  %4386 = vmatpush3.bf16.msra.mxu0 %v4539_v33  ;;  %v1948_v61 = vrot.slane %v1946_v9, 1  ;;  %v4542_v33 = vld [vmem:[%s7115_s3 + $0xb8] sm:$0xff]  }
 0x207   :  { %2361 = vrot.lane.b32.xlu0 %v2122_v11, %s4574_s12  ;;  %4387 = vmatprep.subr.bf16.mxu0 %v4541_v40  ;;  %v1311_v11 = vadd.f32 %v5278_v17, %v1240_v26  ;;  %v1377_v9 = vmax.f32 %v1313_v5, 0.0 }
 0x208   :  { %v5571_v28 = vpop.permute.xlu1 %1086  ;;  %2624 = vrot.lane.b32.xlu1 %v2125_v18, %s4574_s12  ;;  %4302 = vmatpush3.bf16.msra.mxu1 %v4540_v44  ;;  %v5616_v18 = vpack.c.bf16 %v1451_v50, %v1451_v50  ;;  %v5636_v44 = vpack.c.bf16 %v1452_v46, %v1452_v46  ;;  %v1949_v26 = vor.u32 %v1948_v61, %v1944_v2 }
 0x209   :  { %v5580_v35 = vpop.permute.xlu0 %1084  ;;  %v1248_v27 = vmax.f32 %v5147_v57, %v5571_v28  ;;  %v1375_v55 = vmax.f32 %v1311_v11, 0.0  ;;  %v1245_v57 = vmax.f32 %v5125_v54, %v5524_v41  ;;  %v1246_v50 = vmax.f32 %v5140_v48, %v5557_v43 }
 0x20a   :  { %4388 = vmatpush3.bf16.msra.mxu0 %v4541_v40  ;;  %v5641_v40 = vpack.c.bf16 %v1456_v52, %v1456_v52  ;;  %v1243_v48 = vmax.f32 %v5137_v56, %v5549_v37  ;;  %v2124_v6 = vsel %vm5371_vm3, %v1949_v26, 0  ;;  %v1457_v37 = vmul.f32 %v5413_v14, %v1377_v9 }
 0x20b   :  { %2357 = vrot.lane.b32.xlu0 %v2120_v16, %s4574_s12  ;;  %4389 = vmatprep.subr.bf16.mxu0 %v4542_v33  ;;  %v1319_v3 = vadd.f32 %v5278_v17, %v1248_v27  ;;  %v1316_v41 = vadd.f32 %v5278_v17, %v1245_v57 }
 0x20c   :  { %v5594_v24 = vpop.permute.xlu1 %1092  ;;  %2363 = vrot.lane.b32.xlu1 %v2123_v36, %s4574_s12  ;;  %v1454_v36 = vmul.f32 %v5386_v15, %v1374_v13  ;;  %v1314_v52 = vadd.f32 %v5278_v17, %v1243_v48 }
 0x20d   :  { %v1095_v34 = vpop.permute.xlu0 %1094  ;;  %v1383_v11 = vmax.f32 %v1319_v3, 0.0 }
 0x20e   :  { %v1252_v21 = vmax.f32 %v5160_v51, %v1095_v34  ;;  %4390 = vmatpush3.bf16.msra.mxu0 %v4542_v33  ;;  %v1455_v34 = vmul.f32 %v5361_v20, %v1375_v55  ;;  %v5653_v54 = vpack.c.bf16 %v1454_v36, %v1454_v36  ;;  %v1380_v33 = vmax.f32 %v1316_v41, 0.0 }
 0x20f   :  { %2197 = vrot.lane.b32.xlu0 %v1510_v23, %s4576_s21  ;;  %v1379_v23 = vmax.f32 %v1315_v58, 0.0  ;;  %v1463_v27 = vmul.f32 %v5440_v12, %v1383_v11 }
 0x210   :  { %v5612_v39 = vpop.permute.xlu1 %1102  ;;  %2257 = vrot.lane.b32.xlu1 %v5602_v25, %s4575_s0  ;;  %v1323_v42 = vadd.f32 %v5278_v17, %v1252_v21  ;;  %v1317_v21 = vadd.f32 %v5278_v17, %v1246_v50  ;;  %v5669_v56 = vpack.c.bf16 %v1455_v34, %v1455_v34 }
 0x211   :  { %v5619_v51 = vpop.permute.xlu0 %1090  ;;  %v1459_v29 = vmul.f32 %v5394_v22, %v1379_v23  ;;  %v1256_v13 = vmax.f32 %v5167_v0, %v5612_v39  ;;  %v1251_v0 = vmax.f32 %v5157_v62, %v5594_v24  ;;  %v1378_v24 = vmax.f32 %v1314_v52, 0.0 }
 0x212   :  { %v1387_v19 = vmax.f32 %v1323_v42, 0.0  ;;  %v1381_v58 = vmax.f32 %v1317_v21, 0.0 }
 0x213   :  { %2259 = vrot.lane.b32.xlu0 %v5616_v18, %s4575_s0  ;;  %v5683_v39 = vpack.c.bf16 %v1459_v29, %v1459_v29  ;;  %v1327_v55 = vadd.f32 %v5278_v17, %v1256_v13  ;;  %v1322_v57 = vadd.f32 %v5278_v17, %v1251_v0  ;;  %v1458_v9 = vmul.f32 %v5459_v38, %v1378_v24  ;;  %v7252_v0 = vld [vmem:[#allocation20_spill] sm:$0xff] }
 0x214   :  { %v1099_v16 = vpop.permute.xlu1 %1098  ;;  %2263 = vrot.lane.b32.xlu1 %v5624_v60, %s4575_s0  ;;  %v1467_v46 = vmul.f32 %v5306_v30, %v1387_v19 }
 0x215   :  { %v1097_v28 = vpop.permute.xlu0 %1096  ;;  %v1254_v5 = vmax.f32 %v5177_v1, %v1099_v16  ;;  %v1461_v1 = vmul.f32 %v5471_v4, %v1381_v58  ;;  %v5703_v16 = vpack.c.bf16 %v1463_v27, %v1463_v27  ;;  %v1391_v23 = vmax.f32 %v1327_v55, 0.0  ;;  %v7253_v27 = vld [vmem:[#allocation21_spill] sm:$0xff] }
 0x216   :  { %v1253_v45 = vmax.f32 %v5180_v32, %v1097_v28  ;;  %v1247_v32 = vmax.f32 %v5150_v49, %v5580_v35  ;;  %v1531_v2 = vpack.c.bf16 %v1467_v46, %v1467_v46  ;;  %v5691_v49 = vpack.c.bf16 %v1457_v37, %v1457_v37 }
 0x217   :  { %2261 = vrot.lane.b32.xlu0 %v5636_v44, %s4575_s0  ;;  %v1460_v35 = vmul.f32 %v5432_v8, %v1380_v33  ;;  %v1325_v50 = vadd.f32 %v5278_v17, %v1254_v5  ;;  %v1386_v48 = vmax.f32 %v1322_v57, 0.0  ;;  %v5717_v29 = vpack.c.bf16 %v1461_v1, %v1461_v1  ;;  %v7254_v1 = vld [vmem:[#allocation23_spill] sm:$0xff] }
 0x218   :  { %v5649_v47 = vpop.permute.xlu1 %1110  ;;  %2269 = vrot.lane.b32.xlu1 %v5641_v40, %s4575_s0  ;;  %v1324_v42 = vadd.f32 %v5278_v17, %v1253_v45  ;;  %v1318_v36 = vadd.f32 %v5278_v17, %v1247_v32  ;;  %v1981_v3 = vshll.u32 %v1531_v2, 16  ;;  %v1471_v11 = vmul.f32 %v5361_v20, %v1391_v23 }
 0x219   :  { %v5658_v43 = vpop.permute.xlu0 %1104  ;;  %v5712_v34 = vpack.c.bf16 %v1460_v35, %v1460_v35  ;;  %v1389_v45 = vmax.f32 %v1325_v50, 0.0  ;;  %v5727_v37 = vpack.c.bf16 %v1458_v9, %v1458_v9  ;;  %v1466_v52 = vmul.f32 %v5329_v10, %v1386_v48  ;;  %v7255_v50 = vld [vmem:[#allocation22_spill] sm:$0xff] }
 0x21a   :  { %v1388_v26 = vmax.f32 %v1324_v42, 0.0  ;;  %v1382_v41 = vmax.f32 %v1318_v36, 0.0  ;;  %v1983_v46 = vrot.slane %v1981_v3, 1  ;;  %v1260_v58 = vmax.f32 %v7252_v0, %v5649_v47 }
 0x21b   :  { %2365 = vrot.lane.b32.xlu0 %v2124_v6, %s4574_s12  ;;  %v1257_v42 = vmax.f32 %v7253_v27, %v5658_v43  ;;  %v1535_v55 = vpack.c.bf16 %v1471_v11, %v1471_v11  ;;  %v1469_v5 = vmul.f32 %v5350_v31, %v1389_v45  ;;  %v1530_v36 = vpack.c.bf16 %v1466_v52, %v1466_v52 }
 0x21c   :  { %v5672_v61 = vpop.permute.xlu1 %1106  ;;  %2265 = vrot.lane.b32.xlu1 %v5653_v54, %s4575_s0  ;;  %v1468_v21 = vmul.f32 %v5314_v53, %v1388_v26  ;;  %v1462_v33 = vmul.f32 %v5530_v7, %v1382_v41  ;;  %v1979_v53 = vshrl.u32 %v1531_v2, 16  ;;  %v1331_v47 = vadd.f32 %v5278_v17, %v1260_v58 }
 0x21d   :  { %v5681_v30 = vpop.permute.xlu0 %1100  ;;  %v1328_v43 = vadd.f32 %v5278_v17, %v1257_v42  ;;  %v1533_v23 = vpack.c.bf16 %v1469_v5, %v1469_v5  ;;  %v1258_v3 = vmax.f32 %v7255_v50, %v5672_v61  ;;  %v2009_v9 = vshll.u32 %v1535_v55, 16 }
 0x21e   :  { %v1532_v20 = vpack.c.bf16 %v1468_v21, %v1468_v21  ;;  %v1984_v35 = vor.u32 %v1983_v46, %v1979_v53  ;;  %v5743_v10 = vpack.c.bf16 %v1462_v33, %v1462_v33  ;;  %v1255_v31 = vmax.f32 %v7254_v1, %v5681_v30 }
 0x21f   :  { %2267 = vrot.lane.b32.xlu0 %v5669_v56, %s4575_s0  ;;  %v1974_v21 = vshll.u32 %v1530_v36, 16  ;;  %v1392_v30 = vmax.f32 %v1328_v43, 0.0  ;;  %v1395_v46 = vmax.f32 %v1331_v47, 0.0  ;;  %v1329_v61 = vadd.f32 %v5278_v17, %v1258_v3 }
 0x220   :  { %v5693_v62 = vpop.permute.xlu1 %1118  ;;  %2275 = vrot.lane.b32.xlu1 %v5683_v39, %s4575_s0  ;;  %v1988_v26 = vshll.u32 %v1532_v20, 16  ;;  %v1326_v11 = vadd.f32 %v5278_v17, %v1255_v31  ;;  %v2011_v33 = vrot.slane %v2009_v9, 1  ;;  %v1995_v52 = vshll.u32 %v1533_v23, 16  ;;  %v7256_v9 = vld [vmem:[#allocation26_spill] sm:$0xff] }
 0x221   :  { %v5700_v28 = vpop.permute.xlu0 %1112  ;;  %v1986_v0 = vshrl.u32 %v1532_v20, 16  ;;  %v2007_v27 = vshrl.u32 %v1535_v55, 16  ;;  %v1976_v42 = vrot.slane %v1974_v21, 1  ;;  %v1472_v5 = vmul.f32 %v5367_v63, %v1392_v30 }
 0x222   :  { %v1990_v45 = vrot.slane %v1988_v26, 1  ;;  %v1972_v47 = vshrl.u32 %v1530_v36, 16  ;;  %v1475_v17 = vmul.f32 %v5394_v22, %v1395_v46  ;;  %v1393_v1 = vmax.f32 %v1329_v61, 0.0  ;;  %v7257_v61 = vld [vmem:[#allocation28_spill] sm:$0xff] }
 0x223   :  { %2271 = vrot.lane.b32.xlu0 %v5691_v49, %s4575_s0  ;;  %v2012_v31 = vor.u32 %v2011_v33, %v2007_v27  ;;  %v1997_v26 = vrot.slane %v1995_v52, 1  ;;  %v1993_v3 = vshrl.u32 %v1533_v23, 16  ;;  %v1261_v21 = vmax.f32 %v7256_v9, %v5700_v28  ;;  %v7258_v27 = vld [vmem:[#allocation27_spill] sm:$0xff] }
 0x224   :  { %v5708_v19 = vpop.permute.xlu1 %1114  ;;  %2618 = vrot.lane.b32.xlu1 %v5703_v16, %s4575_s0  ;;  %v1991_v43 = vor.u32 %v1990_v45, %v1986_v0  ;;  %v1473_v30 = vmul.f32 %v5413_v14, %v1393_v1 }
 0x225   :  { %v5715_v6 = vpop.permute.xlu0 %1108  ;;  %v1998_v45 = vor.u32 %v1997_v26, %v1993_v3  ;;  %v7260_v3 = vld [vmem:[#allocation30_spill] sm:$0xff] }
 0x226   :  { %v2130_v22 = vsel %vm5371_vm3, %v1991_v43, 0  ;;  %v1259_v33 = vmax.f32 %v7257_v61, %v5715_v6  ;;  %v1537_v0 = vpack.c.bf16 %v1473_v30, %v1473_v30 }
 0x227   :  { %2277 = vrot.lane.b32.xlu0 %v5712_v34, %s4575_s0 }
 0x228   :  { %v5723_v13 = vpop.permute.xlu1 %1126  ;;  %2279 = vrot.lane.b32.xlu1 %v5717_v29, %s4575_s0 }
 0x229   :  { %v5731_v32 = vpop.permute.xlu0 %1116 }
 0x22b   :  { %2273 = vrot.lane.b32.xlu0 %v5727_v37, %s4575_s0 }
 0x22c   :  { %v5740_v24 = vpop.permute.xlu1 %1122  ;;  %2203 = vrot.lane.b32.xlu1 %v1531_v2, %s4576_s21  ;;  %v2129_v2 = vsel %vm5371_vm3, %v1984_v35, 0  ;;  %v1390_v35 = vmax.f32 %v1326_v11, 0.0  ;;  %v2133_v11 = vsel %vm5371_vm3, %v2012_v31, 0 }
 0x22d   :  { %v5745_v57 = vpop.permute.xlu0 %1128 }
 0x22e   :  { %v1470_v63 = vmul.f32 %v5386_v15, %v1390_v35  ;;  %v2131_v35 = vsel %vm5371_vm3, %v1998_v45, 0 }
 0x22f   :  { %2281 = vrot.lane.b32.xlu0 %v5743_v10, %s4575_s0 }
 0x230   :  { %v5757_v41 = vpop.permute.xlu1 %1134  ;;  %2371 = vrot.lane.b32.xlu1 %v2129_v2, %s4574_s12  ;;  %v1536_v2 = vpack.c.bf16 %v1472_v5, %v1472_v5  ;;  %v1534_v28 = vpack.c.bf16 %v1470_v63, %v1470_v63  ;;  %v1263_v63 = vmax.f32 %v7260_v3, %v5731_v32 }
 0x231   :  { %v5760_v48 = vpop.permute.xlu0 %1124 }
 0x232   :  { %v2016_v52 = vshll.u32 %v1536_v2, 16 }
 0x233   :  { %2205 = vrot.lane.b32.xlu0 %v1532_v20, %s4576_s21 }
 0x234   :  { %v5765_v53 = vpop.permute.xlu1 %1130  ;;  %2211 = vrot.lane.b32.xlu1 %v1535_v55, %s4576_s21  ;;  %v1977_v55 = vor.u32 %v1976_v42, %v1972_v47  ;;  %v1262_v42 = vmax.f32 %v7258_v27, %v5708_v19  ;;  %v2018_v26 = vrot.slane %v2016_v52, 1  ;;  %v2002_v19 = vshll.u32 %v1534_v28, 16 }
 0x235   :  { %v5768_v58 = vpop.permute.xlu0 %1136 }
 0x236   :  { %v2128_v15 = vsel %vm5371_vm3, %v1977_v55, 0 }
 0x237   :  { %2201 = vrot.lane.b32.xlu0 %v1530_v36, %s4576_s21  ;;  %v1539_v36 = vpack.c.bf16 %v1475_v17, %v1475_v17  ;;  %v7259_v17 = vld [vmem:[#allocation25_spill] sm:$0xff] }
 0x238   :  { %v5773_v50 = vpop.permute.xlu1 %1142  ;;  %2207 = vrot.lane.b32.xlu1 %v1533_v23, %s4576_s21  ;;  %v5795_v23 = vld [vmem:[%s7113_s2] ss:$0 sm:$0xff]  ;;  %v1264_v6 = vmax.f32 %v7259_v17, %v5693_v62 }
 0x239   :  { %v5776_v20 = vpop.permute.xlu0 %1132  ;;  %v1332_v14 = vadd.f32 %v5795_v23, %v1261_v21  ;;  %v2037_v43 = vshll.u32 %v1539_v36, 16  ;;  %v1330_v31 = vadd.f32 %v5795_v23, %v1259_v33  ;;  %v1333_v55 = vadd.f32 %v5795_v23, %v1262_v42 }
 0x23a   :  { %v2023_v21 = vshll.u32 %v1537_v0, 16  ;;  %v1335_v30 = vadd.f32 %v5795_v23, %v1264_v6  ;;  %v2035_v45 = vshrl.u32 %v1539_v36, 16  ;;  %v2004_v33 = vrot.slane %v2002_v19, 1 }
 0x23b   :  { %2373 = vrot.lane.b32.xlu0 %v2130_v22, %s4574_s12  ;;  %v1396_v1 = vmax.f32 %v1332_v14, 0.0  ;;  %v2039_v9 = vrot.slane %v2037_v43, 1  ;;  %v2014_v22 = vshrl.u32 %v1536_v2, 16  ;;  %v1394_v14 = vmax.f32 %v1330_v31, 0.0  ;;  %v7261_v43 = vld [vmem:[#allocation29_spill] sm:$0xff] }
 0x23c   :  { %v5787_v46 = vpop.permute.xlu1 %1138  ;;  %2379 = vrot.lane.b32.xlu1 %v2133_v11, %s4574_s12  ;;  %v1397_v32 = vmax.f32 %v1333_v55, 0.0  ;;  %v1334_v52 = vadd.f32 %v5795_v23, %v1263_v63  ;;  %v2025_v42 = vrot.slane %v2023_v21, 1  ;;  %v1268_v17 = vmax.f32 %v7261_v43, %v5723_v13  ;;  %v7262_v43 = vld [vmem:[#allocation32_spill] sm:$0xff] }
 0x23d   :  { %v5802_v5 = vpop.permute.xlu0 %1144  ;;  %v2019_v61 = vor.u32 %v2018_v26, %v2014_v22  ;;  %v2040_v27 = vor.u32 %v2039_v9, %v2035_v45 }
 0x23e   :  { %v1477_v19 = vmul.f32 %v5471_v4, %v1397_v32  ;;  %v1398_v55 = vmax.f32 %v1334_v52, 0.0 }
 0x23f   :  { %2369 = vrot.lane.b32.xlu0 %v2128_v15, %s4574_s12  ;;  %v1476_v15 = vmul.f32 %v5432_v8, %v1396_v1  ;;  %v2021_v8 = vshrl.u32 %v1537_v0, 16  ;;  %v1474_v1 = vmul.f32 %v5459_v38, %v1394_v14  ;;  %v2134_v31 = vsel %vm5371_vm3, %v2019_v61, 0 }
 0x240   :  { %v5807_v47 = vpop.permute.xlu1 %1150  ;;  %2375 = vrot.lane.b32.xlu1 %v2131_v35, %s4574_s12  ;;  %v1399_v35 = vmax.f32 %v1335_v30, 0.0  ;;  %v2137_v13 = vsel %vm5371_vm3, %v2040_v27, 0  ;;  %v1541_v22 = vpack.c.bf16 %v1477_v19, %v1477_v19  ;;  %v1478_v30 = vmul.f32 %v5530_v7, %v1398_v55 }
 0x241   :  { %v5819_v62 = vpop.permute.xlu0 %1140  ;;  %v1540_v6 = vpack.c.bf16 %v1476_v15, %v1476_v15  ;;  %v1538_v9 = vpack.c.bf16 %v1474_v1, %v1474_v1  ;;  %v7263_v1 = vld [vmem:[#allocation33_spill] sm:$0xff] }
 0x242   :  { %v1479_v63 = vmul.f32 %v5440_v12, %v1399_v35  ;;  %v1542_v52 = vpack.c.bf16 %v1478_v30, %v1478_v30  ;;  %v2051_v27 = vshll.u32 %v1541_v22, 16 }
 0x243   :  { %2213 = vrot.lane.b32.xlu0 %v1536_v2, %s4576_s21  ;;  %v2000_v2 = vshrl.u32 %v1534_v28, 16  ;;  %v2044_v21 = vshll.u32 %v1540_v6, 16  ;;  %v2030_v32 = vshll.u32 %v1538_v9, 16 }
 0x244   :  { %2219 = vrot.lane.b32.xlu1 %v1539_v36, %s4576_s21  ;;  %v5856_v12 = vpack.c.bf16 %v1479_v63, %v1479_v63  ;;  %v7265_v63 = vld [vmem:[#allocation34_spill] sm:$0xff] }
 0x245   :  { %v5821_v11 = vpop.permute.xlu1 %1146  ;;  %v2005_v26 = vor.u32 %v2004_v33, %v2000_v2  ;;  %v2046_v33 = vrot.slane %v2044_v21, 1  ;;  %v4552_v2 = vld [vmem:[%s7114_s5 + $0x10] sm:$0xff]  ;;  %v2032_v55 = vrot.slane %v2030_v32, 1 }
 0x246   :  { %v5835_v3 = vpop.permute.xlu0 %1148 }
 0x247   :  { %2209 = vrot.lane.b32.xlu0 %v1534_v28, %s4576_s21  ;;  %v2026_v28 = vor.u32 %v2025_v42, %v2021_v8  ;;  %v2132_v4 = vsel %vm5371_vm3, %v2005_v26, 0  ;;  %v2042_v42 = vshrl.u32 %v1540_v6, 16 }
 0x248   :  { %2215 = vrot.lane.b32.xlu1 %v1537_v0, %s4576_s21  ;;  %v1339_v0 = vadd.f32 %v5795_v23, %v1268_v17  ;;  %v1269_v17 = vmax.f32 %v7262_v43, %v5745_v57 }
 0x249   :  { %v5829_v36 = vpop.permute.xlu1 %2177  ;;  %v2135_v45 = vsel %vm5371_vm3, %v2026_v28, 0  ;;  %v2047_v19 = vor.u32 %v2046_v33, %v2042_v42  ;;  %v2028_v28 = vshrl.u32 %v1538_v9, 16  ;;  %v7268_v42 = vld [vmem:[#allocation14_spill] sm:$0xff] }
 0x24a   :  { %v1403_v15 = vmax.f32 %v1339_v0, 0.0  ;;  %v5852_v14 = vpop.permute.xlu0 %2175  ;;  %v1340_v57 = vadd.f32 %v5795_v23, %v1269_v17 }
 0x24b   :  { %2381 = vrot.lane.b32.xlu0 %v2134_v31, %s4574_s12  ;;  %v1272_v31 = vmax.f32 %v7263_v1, %v5757_v41  ;;  %v2049_v41 = vshrl.u32 %v1541_v22, 16  ;;  %v2033_v32 = vor.u32 %v2032_v55, %v2028_v28  ;;  %v7270_v28 = vld [vmem:[#allocation6_spill] sm:$0xff] }
 0x24c   :  { %2387 = vrot.lane.b32.xlu1 %v2137_v13, %s4574_s12  ;;  %v1483_v35 = vmul.f32 %v4552_v2, %v1403_v15  ;;  %v2058_v13 = vshll.u32 %v1542_v52, 16 }
 0x24d   :  { %v5842_v38 = vpop.permute.xlu1 %2173  ;;  %v1343_v30 = vadd.f32 %v5795_v23, %v1272_v31  ;;  %v2056_v31 = vshrl.u32 %v1542_v52, 16 }
 0x24e   :  { %v5874_v0 = vpack.c.bf16 %v1483_v35, %v1483_v35  ;;  %v2060_v35 = vrot.slane %v2058_v13, 1 }
 0x24f   :  { %2377 = vrot.lane.b32.xlu0 %v2132_v4, %s4574_s12  ;;  %v1267_v4 = vmax.f32 %v7265_v63, %v5760_v48  ;;  %v1276_v63 = vmax.f32 %v7270_v28, %v5773_v50  ;;  %v4553_v50 = vld [vmem:[%s7114_s5 + $0x18] sm:$0xff] }
 0x250   :  { %2383 = vrot.lane.b32.xlu1 %v2135_v45, %s4574_s12  ;;  %7264 = vst [vmem:[#allocation20_spill] sm:$0xff] %v5874_v0  ;;  %v7266_v45 = vld [vmem:[#allocation35_spill] sm:$0xff] }
 0x251   :  { %v5854_v61 = vpop.permute.xlu1 %2343  ;;  %v1270_v15 = vmax.f32 %v7266_v45, %v5765_v53  ;;  %v1404_v53 = vmax.f32 %v1340_v57, 0.0  ;;  %v1338_v17 = vadd.f32 %v5795_v23, %v1267_v4  ;;  %v2061_v4 = vor.u32 %v2060_v35, %v2056_v31  ;;  %v7272_v35 = vld [vmem:[#allocation10_spill] sm:$0xff] }
 0x253   :  { %2221 = vrot.lane.b32.xlu0 %v1540_v6, %s4576_s21  ;;  %v2053_v6 = vrot.slane %v2051_v27, 1  ;;  %v7267_v27 = vld [vmem:[#allocation9_spill] sm:$0xff]  ;;  %v1341_v55 = vadd.f32 %v5795_v23, %v1270_v15  ;;  %v1402_v45 = vmax.f32 %v1338_v17, 0.0  ;;  %v5932_v17 = vld [vmem:[%s7114_s5] sm:$0xff] }
 0x254   :  { %2614 = vrot.lane.b32.xlu1 %v5856_v12, %s4576_s21  ;;  %v1218_v2 = vmax.f32 %v7268_v42, %v7267_v27  ;;  %v7271_v15 = vld [vmem:[#allocation5_spill] sm:$0xff]  ;;  %v4554_v27 = vld [vmem:[%s7114_s5 + $0x30] sm:$0xff] }
 0x255   :  { %v5866_v8 = vpop.permute.xlu0 %2183  ;;  %v2054_v48 = vor.u32 %v2053_v6, %v2049_v41 }
 0x256   :  { %v5870_v26 = vpop.permute.xlu1 %2185  ;;  %v1289_v13 = vadd.f32 %v5795_v23, %v1218_v2  ;;  %v1405_v2 = vmax.f32 %v1341_v55, 0.0 }
 0x257   :  { %2217 = vrot.lane.b32.xlu0 %v1538_v9, %s4576_s21  ;;  %v2138_v9 = vsel %vm5371_vm3, %v2047_v19, 0  ;;  %v1407_v19 = vmax.f32 %v1343_v30, 0.0  ;;  %v2139_v57 = vsel %vm5371_vm3, %v2054_v48, 0  ;;  %v1484_v30 = vmul.f32 %v4553_v50, %v1404_v53 }
 0x258   :  { %2223 = vrot.lane.b32.xlu1 %v1541_v22, %s4576_s21  ;;  %v7269_v22 = vld [vmem:[#allocation4_spill] sm:$0xff]  ;;  %v1347_v48 = vadd.f32 %v5795_v23, %v1276_v63  ;;  %v1353_v53 = vmax.f32 %v1289_v13, 0.0  ;;  %v4556_v13 = vld [vmem:[%s7114_s5 + $0x20] sm:$0xff] }
 0x259   :  { %v5879_v21 = vpop.permute.xlu0 %2179  ;;  %v1273_v43 = vmax.f32 %v7269_v22, %v5768_v58  ;;  %v2136_v58 = vsel %vm5371_vm3, %v2033_v32, 0  ;;  %v1487_v42 = vmul.f32 %v4554_v27, %v1407_v19  ;;  %v1274_v22 = vmax.f32 %v7272_v35, %v5787_v46  ;;  %v5938_v46 = vld [vmem:[%s7115_s3] sm:$0xff]  }
 0x25a   :  { %v5884_v33 = vpop.permute.xlu1 %2181  ;;  %v5940_v19 = vpack.c.bf16 %v1484_v30, %v1484_v30  ;;  %4331 = vmatprep.subr.bf16.mxu1 %v5938_v46  ;;  %v1433_v30 = vmul.f32 %v5932_v17, %v1353_v53 }
 0x25b   :  { %2389 = vrot.lane.b32.xlu0 %v2138_v9, %s4574_s12  ;;  %v1344_v41 = vadd.f32 %v5795_v23, %v1273_v43  ;;  %v1271_v9 = vmax.f32 %v7271_v15, %v5776_v20  ;;  %v2140_v20 = vsel %vm5371_vm3, %v2061_v4, 0  ;;  %v1411_v4 = vmax.f32 %v1347_v48, 0.0  ;;  %v7277_v48 = vld [vmem:[#allocation11_spill] sm:$0xff] }
 0x25c   :  { %2287 = vrot.lane.b32.xlu1 %v5874_v0, %s4575_s0  ;;  %7273 = vst [vmem:[#allocation21_spill] sm:$0xff] %v5940_v19  ;;  %v1275_v35 = vmax.f32 %v7277_v48, %v5819_v62  ;;  %v4559_v62 = vld [vmem:[%s7114_s5 + $0x28] sm:$0xff]  ;;  %v7289_v0 = vld [vmem:[#allocation17_spill] sm:$0xff] }
 0x25d   :  { %v5896_v1 = vpop.permute.xlu0 %2345  ;;  %v1408_v31 = vmax.f32 %v1344_v41, 0.0  ;;  %v1342_v28 = vadd.f32 %v5795_v23, %v1271_v9  ;;  %v1345_v41 = vadd.f32 %v5795_v23, %v1274_v22 }
 0x25e   :  { %v5901_v6 = vpop.permute.xlu1 %2347 }
 0x25f   :  { %2385 = vrot.lane.b32.xlu0 %v2136_v58, %s4574_s12  ;;  %v5948_v58 = vpack.c.bf16 %v1487_v42, %v1487_v42  ;;  %v1406_v27 = vmax.f32 %v1342_v28, 0.0  ;;  %v7276_v42 = vld [vmem:[#allocation7_spill] sm:$0xff]  ;;  %v5981_v28 = vpack.c.bf16 %v1433_v30, %v1433_v30  ;;  %v1346_v30 = vadd.f32 %v5795_v23, %v1275_v35 }
 0x260   :  { %2391 = vrot.lane.b32.xlu1 %v2139_v57, %s4574_s12  ;;  %v1485_v57 = vmul.f32 %v4556_v13, %v1405_v2  ;;  %v1277_v2 = vmax.f32 %v7276_v42, %v5802_v5  ;;  %v7287_v35 = vld [vmem:[#allocation19_spill] sm:$0xff] }
 0x261   :  { %v5916_v32 = vpop.permute.xlu0 %2341  ;;  %7274 = vst [vmem:[#allocation23_spill] sm:$0xff] %v5948_v58 }
 0x262   :  { %v5924_v43 = vpop.permute.xlu1 %2191  ;;  %v5973_v53 = vpack.c.bf16 %v1485_v57, %v1485_v57  ;;  %v1486_v57 = vmul.f32 %v4559_v62, %v1406_v27  ;;  %v7285_v62 = vld [vmem:[#allocation38_spill] sm:$0xff] }
 0x263   :  { %2225 = vrot.lane.b32.xlu0 %v1542_v52, %s4576_s21  ;;  %v4555_v52 = vld [vmem:[%s7114_s5 + $0x8] sm:$0xff] }
 0x264   :  { %2393 = vrot.lane.b32.xlu1 %v2140_v20, %s4574_s12  ;;  %v1482_v55 = vmul.f32 %v4555_v52, %v1402_v45  ;;  %v4557_v45 = vld [vmem:[%s7114_s5 + $0x38] sm:$0xff]  ;;  %7278 = vst [vmem:[#allocation26_spill] sm:$0xff] %v5973_v53  ;;  %v4558_v20 = vld [vmem:[%s7114_s5 + $0x50] sm:$0xff]  ;;  %v1409_v52 = vmax.f32 %v1345_v41, 0.0 }
 0x265   :  { %v5946_v63 = vpop.permute.xlu0 %2351  ;;  %v1488_v15 = vmul.f32 %v4557_v45, %v1408_v31  ;;  %v1491_v31 = vmul.f32 %v4558_v20, %v1411_v4  ;;  %v1348_v4 = vadd.f32 %v5795_v23, %v1277_v2  ;;  %v7280_v41 = vld [vmem:[#allocation8_spill] sm:$0xff] }
 0x266   :  { %v5954_v50 = vpop.permute.xlu1 %2353  ;;  %v5965_v9 = vpack.c.bf16 %v1482_v55, %v1482_v55  ;;  %v2065_v55 = vshll.u32 %v5856_v12, 16  ;;  %v1280_v45 = vmax.f32 %v7280_v41, %v5807_v47  ;;  %v1250_v41 = vmax.f32 %v7287_v35, %v5619_v51  ;;  %v7291_v51 = vld [vmem:[#allocation12_spill] sm:$0xff] }
 0x267   :  { %2289 = vrot.lane.b32.xlu0 %v5940_v19, %s4575_s0  ;;  %v5985_v5 = vpack.c.bf16 %v1488_v15, %v1488_v15  ;;  %v5998_v48 = vpack.c.bf16 %v1491_v31, %v1491_v31  ;;  %v4560_v15 = vld [vmem:[%s7114_s5 + $0x40] sm:$0xff]  ;;  %v1855_v31 = vshll.u32 %v5981_v28, 16  ;;  %v7288_v19 = vld [vmem:[#allocation39_spill] sm:$0xff] }
 0x268   :  { %2295 = vrot.lane.b32.xlu1 %v5948_v58, %s4575_s0  ;;  %7275 = vst [vmem:[#allocation22_spill] sm:$0xff] %v5965_v9  ;;  %v1489_v20 = vmul.f32 %v4560_v15, %v1409_v52  ;;  %v2067_v2 = vrot.slane %v2065_v55, 1  ;;  %v7286_v58 = vld [vmem:[#allocation16_spill] sm:$0xff]  ;;  %v1234_v52 = vmax.f32 %v7289_v0, %v7288_v19  ;;  %v1410_v55 = vmax.f32 %v1346_v30, 0.0  ;;  %v7295_v30 = vld [vmem:[#allocation18_spill] sm:$0xff] }
 0x269   :  { %v5971_v22 = vpop.permute.xlu0 %2187  ;;  %7279 = vst [vmem:[#allocation28_spill] sm:$0xff] %v5985_v5  ;;  %7282 = vst [vmem:[#allocation25_spill] sm:$0xff] %v5998_v48  ;;  %v1233_v47 = vmax.f32 %v7286_v58, %v7285_v62  ;;  %v1351_v58 = vadd.f32 %v5795_v23, %v1280_v45  ;;  %v1278_v15 = vmax.f32 %v7291_v51, %v5821_v11  ;;  %v1857_v45 = vrot.slane %v1855_v31, 1  ;;  %v7296_v11 = vld [vmem:[#allocation2_spill] sm:$0xff] }
 0x26a   :  { %v5978_v13 = vpop.permute.xlu1 %2349  ;;  %v6026_v35 = vpack.c.bf16 %v1489_v20, %v1489_v20  ;;  %v6037_v51 = vmax.f32 %v7296_v11, %v7295_v30 }
 0x26b   :  { %2285 = vrot.lane.b32.xlu0 %v5965_v9, %s4575_s0  ;;  %v1415_v20 = vmax.f32 %v1351_v58, 0.0 }
 0x26c   :  { %2291 = vrot.lane.b32.xlu1 %v5973_v53, %s4575_s0  ;;  %v7283_v53 = vld [vmem:[#allocation36_spill] sm:$0xff]  ;;  %7293 = vst [vmem:[#allocation33_spill] sm:$0xff] %v6026_v35  ;;  %7297 = vst [vmem:[#allocation35_spill] sm:$0xff] %v6037_v51 }
 0x26d   :  { %v5996_v42 = vpop.permute.xlu0 %2193  ;;  %v1279_v9 = vmax.f32 %v7283_v53, %v5835_v3  ;;  %v2063_v3 = vshrl.u32 %v5856_v12, 16  ;;  %v6019_v53 = vpack.c.bf16 %v1486_v57, %v1486_v57  ;;  %v1304_v12 = vadd.f32 %v5795_v23, %v1233_v47 }
 0x26e   :  { %7281 = vst [vmem:[#allocation27_spill] sm:$0xff] %v5996_v42  ;;  %v6005_v27 = vpop.permute.xlu1 %2359  ;;  %v1321_v57 = vadd.f32 %v5795_v23, %v1250_v41  ;;  %v1349_v41 = vadd.f32 %v5795_v23, %v1278_v15  ;;  %v7299_v15 = vld [vmem:[#allocation24_spill] sm:$0xff] }
 0x26f   :  { %7284 = vst [vmem:[#allocation30_spill] sm:$0xff] %v6005_v27  ;;  %2297 = vrot.lane.b32.xlu0 %v5985_v5, %s4575_s0  ;;  %7290 = vst [vmem:[#allocation29_spill] sm:$0xff] %v6019_v53  ;;  %v1412_v5 = vmax.f32 %v1348_v4, 0.0  ;;  %v1350_v0 = vadd.f32 %v5795_v23, %v1279_v9  ;;  %v1853_v9 = vshrl.u32 %v5981_v28, 16  ;;  %v1305_v4 = vadd.f32 %v5795_v23, %v1234_v52  ;;  %v6071_v27 = vld [vmem:[%s7114_s5 + $0x78] sm:$0xff] }
 0x270   :  { %2303 = vrot.lane.b32.xlu1 %v5998_v48, %s4575_s0  ;;  %v2068_v48 = vor.u32 %v2067_v2, %v2063_v3  ;;  %v4561_v2 = vld [vmem:[%s7114_s5 + $0x48] sm:$0xff]  ;;  %v4562_v3 = vld [vmem:[%s7114_s5 + $0x58] sm:$0xff]  ;;  %v1368_v58 = vmax.f32 %v1304_v12, 0.0  ;;  %7303 = vst [vmem:[#allocation14_spill] sm:$0xff] %v6071_v27 }
 0x271   :  { %v6024_v62 = vpop.permute.xlu0 %2189  ;;  %v1490_v47 = vmul.f32 %v4561_v2, %v1410_v55  ;;  %v1492_v30 = vmul.f32 %v4562_v3, %v1412_v5  ;;  %v1414_v11 = vmax.f32 %v1350_v0, 0.0  ;;  %v6058_v55 = vor.u32 %v1857_v45, %v1853_v9  ;;  %v7300_v2 = vld [vmem:[#allocation3_spill] sm:$0xff]  ;;  %v7301_v5 = vld [vmem:[#allocation37_spill] sm:$0xff] }
 0x272   :  { %7292 = vst [vmem:[#allocation32_spill] sm:$0xff] %v6024_v62  ;;  %v6029_v19 = vpop.permute.xlu1 %2612  ;;  %v2141_v52 = vsel %vm5371_vm3, %v2068_v48, 0  ;;  %v6062_v62 = vmax.f32 %v7300_v2, %v7299_v15  ;;  %v7302_v0 = vld [vmem:[#allocation13_spill] sm:$0xff]  ;;  %v1576_v48 = vshrl.u32 %v5616_v18, 16  ;;  %v1369_v12 = vmax.f32 %v1305_v4, 0.0 }
 0x273   :  { %7294 = vst [vmem:[#allocation34_spill] sm:$0xff] %v6029_v19  ;;  %2293 = vrot.lane.b32.xlu0 %v6019_v53, %s4575_s0  ;;  %v1385_v19 = vmax.f32 %v1321_v57, 0.0  ;;  %v6066_v3 = vmax.f32 %v7302_v0, %v7301_v5  ;;  %v4563_v57 = vld [vmem:[%s7114_s5 + $0x70] sm:$0xff]  ;;  %v6079_v9 = vpack.c.bf16 %v1490_v47, %v1490_v47  ;;  %v6083_v2 = vpack.c.bf16 %v1492_v30, %v1492_v30 }
 0x274   :  { %2299 = vrot.lane.b32.xlu1 %v6026_v35, %s4575_s0  ;;  %v1569_v35 = vshrl.u32 %v5602_v25, 16  ;;  %v1495_v45 = vmul.f32 %v4563_v57, %v1415_v20  ;;  %v1494_v5 = vmul.f32 %v5530_v7, %v1414_v11  ;;  %v1448_v4 = vmul.f32 %v6071_v27, %v1368_v58  ;;  %v7308_v11 = vld [vmem:[#allocation31_spill] sm:$0xff] }
 0x275   :  { %v6047_v31 = vpop.permute.xlu0 %2355  ;;  %7304 = vst [vmem:[#allocation4_spill] sm:$0xff] %v6079_v9  ;;  %7306 = vst [vmem:[#allocation5_spill] sm:$0xff] %v6083_v2  ;;  %v1465_v42 = vmul.f32 %v5932_v17, %v1385_v19  ;;  %v1583_v20 = vshrl.u32 %v5636_v44, 16  ;;  %v1578_v7 = vrot.slane %v1576_v48, 7  ;;  %v1611_v30 = vshrl.u32 %v5641_v40, 16  ;;  %v4564_v48 = vld [vmem:[%s7114_s5 + $0x60] sm:$0xff] }
 0x276   :  { %v6053_v53 = vpop.permute.xlu1 %2195  ;;  %v1571_v0 = vrot.slane %v1569_v35, 7  ;;  %v1572_v35 = vshll.u32 %v5602_v25, 16  ;;  %v1449_v19 = vmul.f32 %v5932_v17, %v1369_v12  ;;  %v1266_v58 = vmax.f32 %v7308_v11, %v5740_v24 }
 0x277   :  { %7298 = vst [vmem:[#allocation9_spill] sm:$0xff] %v6053_v53  ;;  %2626 = vrot.lane.b32.xlu0 %v2141_v52, %s4574_s12  ;;  %v1413_v52 = vmax.f32 %v1349_v41, 0.0  ;;  %v1590_v53 = vshrl.u32 %v5624_v60, 16  ;;  %v1604_v41 = vshrl.u32 %v5669_v56, 16  ;;  %v6105_v57 = vpack.c.bf16 %v1495_v45, %v1495_v45 }
 0x278   :  { %1088 = vrot.lane.b32.xlu1 %v6037_v51, %s4575_s0  ;;  %v6112_v27 = vpack.c.bf16 %v1494_v5, %v1494_v5  ;;  %v6117_v12 = vpack.c.bf16 %v1448_v4, %v1448_v4  ;;  %v6119_v24 = vpack.c.bf16 %v1465_v42, %v1465_v42  ;;  %v1585_v45 = vrot.slane %v1583_v20, 7 }
 0x279   :  { %v6081_v15 = vpop.permute.xlu0 %2361  ;;  %v1493_v47 = vmul.f32 %v4564_v48, %v1413_v52  ;;  %v1586_v11 = vshll.u32 %v5636_v44, 16  ;;  %v1606_v48 = vrot.slane %v1604_v41, 7  ;;  %v1613_v5 = vrot.slane %v1611_v30, 7 }
 0x27a   :  { %7305 = vst [vmem:[#allocation6_spill] sm:$0xff] %v6081_v15  ;;  %v6087_v51 = vpop.permute.xlu1 %2624  ;;  %v1597_v44 = vshrl.u32 %v5653_v54, 16  ;;  %v1967_v41 = vshll.u32 %v6119_v24, 16 }
 0x27b   :  { %7307 = vst [vmem:[#allocation10_spill] sm:$0xff] %v6087_v51  ;;  %2301 = vrot.lane.b32.xlu0 %v6079_v9, %s4575_s0  ;;  %v1579_v9 = vshll.u32 %v5616_v18, 16  ;;  %v1574_v51 = vor.u32 %v1572_v35, %v1571_v0  ;;  %v1337_v18 = vadd.f32 %v5795_v23, %v1266_v58  ;;  %v6139_v0 = vpack.c.bf16 %v1449_v19, %v1449_v19 }
 0x27c   :  { %2305 = vrot.lane.b32.xlu1 %v6083_v2, %s4575_s0  ;;  %v1592_v2 = vrot.slane %v1590_v53, 7  ;;  %v6128_v53 = vpack.c.bf16 %v1493_v47, %v1493_v47  ;;  %v1607_v23 = vshll.u32 %v5669_v56, 16  ;;  %v1588_v47 = vor.u32 %v1586_v11, %v1585_v45 }
 0x27d   :  { %v6110_v25 = vpop.permute.xlu0 %2357  ;;  %v1581_v52 = vor.u32 %v1579_v9, %v1578_v7  ;;  %v1614_v35 = vshll.u32 %v5641_v40, 16  ;;  %v1600_v45 = vshll.u32 %v5653_v54, 16  ;;  %v1618_v11 = vshrl.u32 %v5691_v49, 16 }
 0x27e   :  { %7309 = vst [vmem:[#allocation7_spill] sm:$0xff] %v6110_v25  ;;  %v6115_v15 = vpop.permute.xlu1 %2363  ;;  %v1593_v25 = vshll.u32 %v5624_v60, 16  ;;  %v1821_v60 = vsel %vm6132_vm7, 0, %v1574_v51  ;;  %v6152_v19 = vor.u32 %v1607_v23, %v1606_v48  ;;  %v1401_v51 = vmax.f32 %v1337_v18, 0.0 }
 0x27f   :  { %2620 = vrot.lane.b32.xlu0 %v6105_v57, %s4575_s0  ;;  %v2401_v7 = vsel %vm2395_vm6, %v1821_v60, %v5842_v38  ;;  %v1822_v30 = vsel %vm6132_vm7, 0, %v1581_v52  ;;  %v1616_v38 = vor.u32 %v1614_v35, %v1613_v5  ;;  %v1969_v18 = vrot.slane %v1967_v41, 1 }
 0x280   :  { %2309 = vrot.lane.b32.xlu1 %v6112_v27, %s4575_s0  ;;  %v1595_v4 = vor.u32 %v1593_v25, %v1592_v2  ;;  %v2404_v40 = vsel %vm2395_vm6, %v1822_v30, %v5852_v14  ;;  %v1599_v2 = vrot.slane %v1597_v44, 7  ;;  %v1823_v54 = vsel %vm6132_vm7, 0, %v1588_v47 }
 0x281   :  { %v6137_v9 = vpop.permute.xlu0 %2197  ;;  %v1632_v44 = vshrl.u32 %v5683_v39, 16  ;;  %v1481_v23 = vmul.f32 %v5932_v17, %v1401_v51  ;;  %v1965_v47 = vshrl.u32 %v6119_v24, 16  ;;  %v1827_v35 = vsel %vm6132_vm7, 0, %v1616_v38 }
 0x282   :  { %v2258_v20 = vpop.permute.xlu1 %2257  ;;  %v1824_v25 = vsel %vm6132_vm7, 0, %v1595_v4  ;;  %v1602_v4 = vor.u32 %v1600_v45, %v1599_v2  ;;  %v1639_v17 = vshrl.u32 %v5712_v34, 16  ;;  %v1646_v45 = vshrl.u32 %v5717_v29, 16 }
 0x283   :  { %2307 = vrot.lane.b32.xlu0 %v6128_v53, %s4575_s0  ;;  %v2484_v56 = vsel %vm2480_vm8, %v2401_v7, %v2258_v20  ;;  %v1826_v7 = vsel %vm6132_vm7, 0, %v6152_v19  ;;  %v1970_v19 = vor.u32 %v1969_v18, %v1965_v47  ;;  %v1634_v51 = vrot.slane %v1632_v44, 7 }
 0x284   :  { %2171 = vrot.lane.b32.xlu1 %v5981_v28, %s4576_s21  ;;  %v2410_v28 = vsel %vm2395_vm6, %v1824_v25, %v5879_v21  ;;  %v6170_v14 = vsel %vm2537_vm9, %v2484_v56, %v5916_v32  ;;  %v7312_v21 = vsel %vm5371_vm3, %v6058_v55, 0  ;;  %v1620_v55 = vrot.slane %v1618_v11, 7 }
 0x285   :  { %v2260_v58 = vpop.permute.xlu0 %2259  ;;  %v1635_v25 = vshll.u32 %v5683_v39, 16  ;;  %v1641_v39 = vrot.slane %v1639_v17, 7  ;;  %v1642_v44 = vshll.u32 %v5712_v34, 16  ;;  %v4545_v34 = vld [vmem:[%s7115_s3 + $0x10] sm:$0xff]  }
 0x286   :  { %v2486_v52 = vsel %vm2480_vm8, %v2404_v40, %v2260_v58  ;;  %v2264_v48 = vpop.permute.xlu1 %2263  ;;  %v1621_v40 = vshll.u32 %v5691_v49, 16  ;;  %v6209_v58 = vpack.c.bf16 %v1481_v23, %v1481_v23  ;;  %v1648_v23 = vrot.slane %v1646_v45, 7 }
 0x287   :  { %1120 = vrot.lane.b32.xlu0 %v6062_v62, %s4575_s0  ;;  %v2543_v5 = vsel %vm2537_vm9, %v2486_v52, %v5854_v61  ;;  %v2490_v60 = vsel %vm2480_vm8, %v2410_v28, %v2264_v48  ;;  %v2407_v61 = vsel %vm2395_vm6, %v1823_v54, %v5829_v36  ;;  %v1625_v52 = vshrl.u32 %v5727_v37, 16 }
 0x288   :  { %2339 = vrot.lane.b32.xlu1 %v7312_v21, %s4574_s12  ;;  %v4047_v32 = vcombine.low %v6170_v14, %v2543_v5  ;;  %v2547_v36 = vsel %vm2537_vm9, %v2490_v60, %v5901_v6  ;;  %v4544_v6 = vld [vmem:[%s7115_s3 + $0x8] sm:$0xff]   ;;  %v1960_v28 = vshll.u32 %v6117_v12, 16  ;;  %v1637_v54 = vor.u32 %v1635_v25, %v1634_v51 }
 0x289   :  { %v2262_v20 = vpop.permute.xlu0 %2261  ;;  %v1663_v45 = vshll.u32 %v5703_v16, 16 }
 0x28a   :  { %v2488_v41 = vsel %vm2480_vm8, %v2407_v61, %v2262_v20  ;;  %v2270_v30 = vpop.permute.xlu1 %2269  ;;  %4303 = vmatprep.mubr.bf16.mxu1 %v4047_v32  ;;  %v1660_v32 = vshrl.u32 %v5703_v16, 16 }
 0x28b   :  { %v2545_v56 = vsel %vm2537_vm9, %v2488_v41, %v5896_v1  ;;  %2255 = vrot.lane.b32.xlu0 %v6139_v0, %s4575_s0  ;;  %v1825_v1 = vsel %vm6132_vm7, 0, %v1602_v4 }
 0x28c   :  { %v6202_v38 = vcombine.low %v2543_v5, %v2545_v56  ;;  %2199 = vrot.lane.b32.xlu1 %v6119_v24, %s4576_s21  ;;  %v4048_v2 = vcombine.low %v2545_v56, %v2547_v36  ;;  %v2413_v11 = vsel %vm2395_vm6, %v1825_v1, %v5884_v33  ;;  %v1623_v24 = vor.u32 %v1621_v40, %v1620_v55  ;;  %v4546_v40 = vld [vmem:[%s7115_s3 + $0x18] sm:$0xff]  }
 0x28d   :  { %v6215_v49 = vpop.permute.xlu0 %2365  ;;  %v2419_v5 = vsel %vm2395_vm6, %v1827_v35, %v5870_v26  ;;  %v2127_v33 = vsel %vm5371_vm3, %v1970_v19, 0  ;;  %v2416_v26 = vsel %vm2395_vm6, %v1826_v7, %v5866_v8  ;;  %v1962_v35 = vrot.slane %v1960_v28, 1 }
 0x28e   :  { %v2266_v48 = vpop.permute.xlu1 %2265  ;;  %4304 = vmatmul.mubr.bf16.vlgmr.msra.gmra.mrb[0].mxu1 %v4048_v2  ;;  %4391 = vmatprep.mubr.bf16.mxu0 %v6202_v38  ;;  %v2496_v60 = vsel %vm2480_vm8, %v2419_v5, %v2270_v30  ;;  %v1828_v4 = vsel %vm6132_vm7, 0, %v1623_v24  ;;  %v1644_v55 = vor.u32 %v1642_v44, %v1641_v39  ;;  %v1649_v8 = vshll.u32 %v5717_v29, 16  ;;  %v7314_v5 = vld [vmem:[#allocation27_spill] sm:$0xff] }
 0x28f   :  { %v2492_v18 = vsel %vm2480_vm8, %v2413_v11, %v2266_v48  ;;  %1152 = vrot.lane.b32.xlu0 %v6066_v3, %s4575_s0  ;;  %4332 = vmatpush3.bf16.msra.mxu1 %v5938_v46  ;;  %v2553_v7 = vsel %vm2537_vm9, %v2496_v60, %v5954_v50  ;;  %v1653_v30 = vshrl.u32 %v5743_v10, 16  ;;  %v1958_v56 = vshrl.u32 %v6117_v12, 16 }
 0x290   :  { %v2549_v21 = vsel %vm2537_vm9, %v2492_v18, %v5978_v13  ;;  %2367 = vrot.lane.b32.xlu1 %v2127_v33, %s4574_s12  ;;  %4333 = vmatprep.subr.bf16.mxu1 %v4544_v6  ;;  %v1627_v13 = vrot.slane %v1625_v52, 7  ;;  %v2422_v29 = vsel %vm2395_vm6, %v1828_v4, %v5971_v22  ;;  %v1628_v50 = vshll.u32 %v5727_v37, 16 }
 0x291   :  { %v6238_v61 = vcombine.low %v2547_v36, %v2549_v21  ;;  %v2268_v46 = vpop.permute.xlu0 %2267  ;;  %v1662_v19 = vrot.slane %v1660_v32, 7  ;;  %v1830_v2 = vsel %vm6132_vm7, 0, %v1637_v54  ;;  %v1963_v22 = vor.u32 %v1962_v35, %v1958_v56 }
 0x292   :  { %v2494_v20 = vsel %vm2480_vm8, %v2416_v26, %v2268_v46  ;;  %v2276_v47 = vpop.permute.xlu1 %2275  ;;  %v2428_v37 = vsel %vm2395_vm6, %v1830_v2, %v5924_v43  ;;  %v1831_v24 = vsel %vm6132_vm7, 0, %v1644_v55  ;;  %v1655_v52 = vrot.slane %v1653_v30, 7  ;;  %v7316_v26 = vld [vmem:[#allocation30_spill] sm:$0xff] }
 0x293   :  { %v2551_v41 = vsel %vm2537_vm9, %v2494_v20, %v5946_v63  ;;  %2283 = vrot.lane.b32.xlu0 %v6209_v58, %s4575_s0  ;;  %4392 = vmatmul.mubr.bf16.vlgmr.msra.gmra.mrb[64].mxu0 %v6238_v61  ;;  %v1651_v63 = vor.u32 %v1649_v8, %v1648_v23  ;;  %v2502_v48 = vsel %vm2480_vm8, %v2428_v37, %v2276_v47  ;;  %v1656_v54 = vshll.u32 %v5743_v10, 16  ;;  %v7317_v23 = vld [vmem:[#allocation6_spill] sm:$0xff]  ;;  %v7319_v47 = vld [vmem:[#allocation32_spill] sm:$0xff] }
 0x294   :  { %v4049_v17 = vcombine.low %v2549_v21, %v2551_v41  ;;  %v6255_v36 = vcombine.low %v2551_v41, %v2553_v7  ;;  %4334 = vmatpush3.bf16.msra.mxu1 %v4544_v6  ;;  %v1630_v6 = vor.u32 %v1628_v50, %v1627_v13  ;;  %v2431_v43 = vsel %vm2395_vm6, %v1831_v24, %v7314_v5 }
 0x295   :  { %v2272_v51 = vpop.permute.xlu0 %2271  ;;  %4335 = vmatprep.subr.bf16.mxu1 %v4545_v34  ;;  %v1665_v39 = vor.u32 %v1663_v45, %v1662_v19  ;;  %v1832_v16 = vsel %vm6132_vm7, 0, %v1651_v63  ;;  %v2126_v21 = vsel %vm5371_vm3, %v1963_v22, 0  ;;  %v2559_v32 = vsel %vm2537_vm9, %v2502_v48, %v7316_v26  ;;  %v4549_v22 = vld [vmem:[%s7115_s3 + $0x30] sm:$0xff]   ;;  %v4550_v48 = vld [vmem:[%s7115_s3 + $0x38] sm:$0xff]  }
 0x296   :  { %7313 = vst [vmem:[#allocation11_spill] sm:$0xff] %v6255_v36  ;;  %v2498_v1 = vsel %vm2480_vm8, %v2422_v29, %v2272_v51  ;;  %v2619_v25 = vpop.permute.xlu1 %2618  ;;  %4307 = vmatprep.mubr.bf16.mxu1 %v4049_v17  ;;  %4395 = vmatprep.mubr.bf16.mxu0 %v6255_v36  ;;  %v1829_v10 = vsel %vm6132_vm7, 0, %v1630_v6  ;;  %v1658_v4 = vor.u32 %v1656_v54, %v1655_v52  ;;  %v7321_v29 = vld [vmem:[#allocation7_spill] sm:$0xff] }
 0x297   :  { %v2555_v11 = vsel %vm2537_vm9, %v2498_v1, %v6047_v31  ;;  %3163 = vrot.lane.b32.xlu0 %v6117_v12, %s4576_s21  ;;  %v4547_v31 = vld [vmem:[%s7115_s3 + $0x20] sm:$0xff]   ;;  %v7315_v12 = vld [vmem:[#allocation9_spill] sm:$0xff]  ;;  %v2425_v35 = vsel %vm2395_vm6, %v1829_v10, %v7319_v47  ;;  %v1834_v41 = vsel %vm6132_vm7, 0, %v1665_v39  ;;  %v7327_v10 = vld [vmem:[#allocation20_spill] sm:$0xff] }
 0x298   :  { %v4050_v28 = vcombine.low %v2553_v7, %v2555_v11  ;;  %4336 = vmatpush3.bf16.msra.mxu1 %v4545_v34  ;;  %v2434_v33 = vsel %vm2395_vm6, %v1832_v16, %v7315_v12  ;;  %v4548_v7 = vld [vmem:[%s7115_s3 + $0x28] sm:$0xff]   ;;  %v1833_v19 = vsel %vm6132_vm7, 0, %v1658_v4  ;;  %v6356_v39 = vld [vmem:[%s7115_s3 + $0x80] sm:$0xff]   ;;  %v1688_v4 = vshrl.u32 %v7327_v10, 16  ;;  %v7328_v47 = vld [vmem:[#allocation21_spill] sm:$0xff] }
 0x299   :  { %v2278_v18 = vpop.permute.xlu0 %2277  ;;  %4337 = vmatprep.subr.bf16.mxu1 %v4546_v40  ;;  %v2437_v2 = vsel %vm2395_vm6, %v1833_v19, %v6137_v9  ;;  %7326 = vst [vmem:[#allocation19_spill] sm:$0xff] %v6356_v39  ;;  %v7331_v19 = vld [vmem:[#allocation26_spill] sm:$0xff] }
 0x29a   :  { %v2504_v44 = vsel %vm2480_vm8, %v2431_v43, %v2278_v18  ;;  %v2280_v60 = vpop.permute.xlu1 %2279  ;;  %4308 = vmatmul.mubr.bf16.gmra.mrb[4].mxu1 %v4050_v28 }
 0x29b   :  { %v2561_v46 = vsel %vm2537_vm9, %v2504_v44, %v7317_v23  ;;  %v2506_v34 = vsel %vm2480_vm8, %v2434_v33, %v2280_v60  ;;  %3175 = vrot.lane.b32.xlu0 %v2126_v21, %s4574_s12 }
 0x29c   :  { %v2563_v13 = vsel %vm2537_vm9, %v2506_v34, %v6115_v15  ;;  %v6301_v20 = vcombine.low %v2559_v32, %v2561_v46  ;;  %4338 = vmatpush3.bf16.msra.mxu1 %v4546_v40  ;;  %v7320_v15 = vld [vmem:[#allocation34_spill] sm:$0xff] }
 0x29d   :  { %v2274_v55 = vpop.permute.xlu0 %2273  ;;  %v4052_v8 = vcombine.low %v2561_v46, %v2563_v13  ;;  %4339 = vmatprep.subr.bf16.mxu1 %v4547_v31  ;;  %v2630_v56 = vsel %vm2395_vm6, %v1834_v41, %v7320_v15  ;;  %v7329_v41 = vld [vmem:[#allocation23_spill] sm:$0xff]  ;;  %v1691_v15 = vshll.u32 %v7327_v10, 16 }
 0x29e   :  { %7318 = vst [vmem:[#allocation8_spill] sm:$0xff] %v6301_v20  ;;  %v2500_v30 = vsel %vm2480_vm8, %v2425_v35, %v2274_v55  ;;  %v6311_v17 = vpop.permute.xlu1 %2203  ;;  %v2635_v63 = vsel %vm2480_vm8, %v2630_v56, %v2619_v25  ;;  %v7323_v25 = vld [vmem:[#allocation10_spill] sm:$0xff]  ;;  %v1695_v35 = vshrl.u32 %v7328_v47, 16 }
 0x29f   :  { %v2557_v50 = vsel %vm2537_vm9, %v2500_v30, %v7321_v29  ;;  %v6333_v45 = vsel %vm2537_vm9, %v2635_v63, %v7323_v25  ;;  %v1716_v30 = vshrl.u32 %v7329_v41, 16  ;;  %v7330_v29 = vld [vmem:[#allocation22_spill] sm:$0xff]  ;;  %v1702_v63 = vshrl.u32 %v7331_v19, 16 }
 0x2a0   :  { %v4051_v51 = vcombine.low %v2557_v50, %v2559_v32  ;;  %v6320_v40 = vcombine.low %v2555_v11, %v2557_v50  ;;  %4340 = vmatpush3.bf16.msra.mxu1 %v4547_v31  ;;  %7324 = vst [vmem:[#allocation38_spill] sm:$0xff] %v6333_v45  ;;  %v1697_v56 = vrot.slane %v1695_v35, 7  ;;  %v1681_v50 = vshrl.u32 %v7330_v29, 16 }
 0x2a1   :  { %v2282_v1 = vpop.permute.xlu0 %2281  ;;  %4341 = vmatprep.subr.bf16.mxu1 %v4548_v7  ;;  %v1704_v10 = vrot.slane %v1702_v63, 7 }
 0x2a2   :  { %7322 = vst [vmem:[#allocation36_spill] sm:$0xff] %v6320_v40  ;;  %v2508_v37 = vsel %vm2480_vm8, %v2437_v2, %v2282_v1  ;;  %v6328_v6 = vpop.permute.xlu1 %2371  ;;  %4311 = vmatprep.mubr.bf16.mxu1 %v4051_v51  ;;  %4396 = vmatmul.mubr.bf16.gmra.mrb[68].mxu0 %v6320_v40  ;;  %v1698_v1 = vshll.u32 %v7328_v47, 16  ;;  %v7334_v40 = vld [vmem:[#allocation33_spill] sm:$0xff] }
 0x2a3   :  { %v2565_v9 = vsel %vm2537_vm9, %v2508_v37, %v6215_v49  ;;  %4312 = vmatmul.mubr.bf16.gmra.mrb[8].mxu1 %v4052_v8  ;;  %4399 = vmatprep.mubr.bf16.mxu0 %v6301_v20  ;;  %v1690_v8 = vrot.slane %v1688_v4, 7  ;;  %v1719_v4 = vshll.u32 %v7329_v41, 16  ;;  %v1730_v36 = vshrl.u32 %v7334_v40, 16 }
 0x2a4   :  { %v4053_v11 = vcombine.low %v2565_v9, %v6333_v45  ;;  %v6339_v24 = vcombine.low %v2563_v13, %v2565_v9  ;;  %4342 = vmatpush3.bf16.msra.mxu1 %v4548_v7  ;;  %v1718_v9 = vrot.slane %v1716_v30, 7  ;;  %v1705_v30 = vshll.u32 %v7331_v19, 16 }
 0x2a5   :  { %v6341_v52 = vpop.permute.xlu0 %2205  ;;  %4343 = vmatprep.subr.bf16.mxu1 %v4549_v22  ;;  %v1693_v2 = vor.u32 %v1691_v15, %v1690_v8 }
 0x2a6   :  { %7325 = vst [vmem:[#allocation16_spill] sm:$0xff] %v6339_v24  ;;  %v6346_v28 = vpop.permute.xlu1 %2211  ;;  %4315 = vmatprep.mubr.bf16.mxu1 %v4053_v11  ;;  %v1700_v11 = vor.u32 %v1698_v1, %v1697_v56  ;;  %v1721_v20 = vor.u32 %v1719_v4, %v1718_v9  ;;  %v7333_v56 = vld [vmem:[#allocation29_spill] sm:$0xff] }
 0x2a7   :  { %v1838_v45 = vsel %vm6132_vm7, 0, %v1693_v2  ;;  %v7335_v4 = vld [vmem:[#allocation25_spill] sm:$0xff] }
 0x2a8   :  { %4344 = vmatpush3.bf16.msra.mxu1 %v4549_v22  ;;  %v7332_v22 = vld [vmem:[#allocation28_spill] sm:$0xff]  ;;  %v2446_v47 = vsel %vm2395_vm6, %v1838_v45, %v6311_v17  ;;  %v1839_v41 = vsel %vm6132_vm7, 0, %v1700_v11  ;;  %v1744_v59 = vshrl.u32 %v7335_v4, 16  ;;  %v1712_v11 = vshll.u32 %v7333_v56, 16 }
 0x2a9   :  { %v6348_v49 = vpop.permute.xlu0 %2201  ;;  %4345 = vmatprep.subr.bf16.mxu1 %v4550_v48  ;;  %v1723_v37 = vshrl.u32 %v7332_v22, 16  ;;  %v1726_v1 = vshll.u32 %v7332_v22, 16 }
 0x2aa   :  { %v6350_v5 = vpop.permute.xlu1 %2207  ;;  %4400 = vmatmul.mubr.bf16.gmra.mrb[72].mxu0 %v6339_v24  ;;  %v1684_v24 = vshll.u32 %v7330_v29, 16  ;;  %v2449_v29 = vsel %vm2395_vm6, %v1839_v41, %v6341_v52 }
 0x2ab   :  { %v1725_v8 = vrot.slane %v1723_v37, 7  ;;  %v1707_v37 = vor.u32 %v1705_v30, %v1704_v10 }
 0x2ac   :  { %4346 = vmatpush3.bf16.msra.mxu1 %v4550_v48  ;;  %v1683_v48 = vrot.slane %v1681_v50, 7  ;;  %v1709_v50 = vshrl.u32 %v7333_v56, 16 }
 0x2ad   :  { %v2374_v43 = vpop.permute.xlu0 %2373  ;;  %4419 = vmatprep.subr.bf16.mxu1 %v6356_v39  ;;  %v1728_v45 = vor.u32 %v1726_v1, %v1725_v8  ;;  %v1840_v8 = vsel %vm6132_vm7, 0, %v1707_v37 }
 0x2ae   :  { %v6359_v16 = vpop.permute.xlu1 %2379  ;;  %v1686_v63 = vor.u32 %v1684_v24, %v1683_v48  ;;  %v1711_v39 = vrot.slane %v1709_v50, 7  ;;  %v7336_v50 = vld [vmem:[#allocation5_spill] sm:$0xff] }
 0x2af   :  { %v1843_v30 = vsel %vm6132_vm7, 0, %v1728_v45  ;;  %v1751_v56 = vshrl.u32 %v7336_v50, 16 }
 0x2b0   :  { %v1837_v52 = vsel %vm6132_vm7, 0, %v1686_v63  ;;  %v1714_v1 = vor.u32 %v1712_v11, %v1711_v39  ;;  %v1747_v11 = vshll.u32 %v7335_v4, 16 }
 0x2b1   :  { %v6361_v18 = vpop.permute.xlu0 %2369  ;;  %v2443_v10 = vsel %vm2395_vm6, %v1837_v52, %v6348_v49 }
 0x2b2   :  { %v6363_v31 = vpop.permute.xlu1 %2375 }
 0x2b5   :  { %v6365_v12 = vpop.permute.xlu0 %2213 }
 0x2b6   :  { %v6367_v33 = vpop.permute.xlu1 %2219  ;;  %v2461_v45 = vsel %vm2395_vm6, %v1843_v30, %v6365_v12  ;;  %v1841_v12 = vsel %vm6132_vm7, 0, %v1714_v1 }
 0x2b9   :  { %v6369_v54 = vpop.permute.xlu0 %2209 }
 0x2ba   :  { %v6371_v44 = vpop.permute.xlu1 %2215 }
 0x2bd   :  { %v6373_v60 = vpop.permute.xlu0 %2381 }
 0x2be   :  { %v6375_v21 = vpop.permute.xlu1 %2387 }
 0x2c1   :  { %v6377_v26 = vpop.permute.xlu0 %2377 }
 0x2c2   :  { %v6379_v32 = vpop.permute.xlu1 %2383 }
 0x2c5   :  { %v6381_v23 = vpop.permute.xlu0 %2221 }
 0x2c6   :  { %v6383_v46 = vpop.permute.xlu1 %2614 }
 0x2c9   :  { %v6385_v34 = vpop.permute.xlu0 %2217 }
 0x2ca   :  { %v6388_v13 = vpop.permute.xlu1 %2223 }
 0x2cd   :  { %v6391_v55 = vpop.permute.xlu0 %2389 }
 0x2ce   :  { %v2288_v7 = vpop.permute.xlu1 %2287 }
 0x2cf   :  { %v2514_v2 = vsel %vm2480_vm8, %v2446_v47, %v2288_v7  ;;  %v1842_v7 = vsel %vm6132_vm7, 0, %v1721_v20  ;;  %v1732_v47 = vrot.slane %v1730_v36, 7  ;;  %v2452_v20 = vsel %vm2395_vm6, %v1840_v8, %v6350_v5 }
 0x2d0   :  { %v2571_v24 = vsel %vm2537_vm9, %v2514_v2, %v6328_v6  ;;  %v1733_v6 = vshll.u32 %v7334_v40, 16  ;;  %v2458_v49 = vsel %vm2395_vm6, %v1842_v7, %v6346_v28  ;;  %v7337_v2 = vld [vmem:[#allocation4_spill] sm:$0xff]  ;;  %v1746_v7 = vrot.slane %v1744_v59, 7 }
 0x2d1   :  { %v6397_v51 = vpop.permute.xlu0 %2385  ;;  %v1737_v5 = vshrl.u32 %v7337_v2, 16  ;;  %v2455_v8 = vsel %vm2395_vm6, %v1841_v12, %v6369_v54  ;;  %v1758_v54 = vshrl.u32 %v6128_v53, 16 }
 0x2d2   :  { %v6401_v25 = vpop.permute.xlu1 %2391  ;;  %v1735_v28 = vor.u32 %v1733_v6, %v1732_v47  ;;  %v1765_v47 = vshrl.u32 %v6112_v27, 16  ;;  %v1749_v6 = vor.u32 %v1747_v11, %v1746_v7 }
 0x2d3   :  { %v1739_v59 = vrot.slane %v1737_v5, 7  ;;  %v1760_v11 = vrot.slane %v1758_v54, 7 }
 0x2d4   :  { %v1844_v4 = vsel %vm6132_vm7, 0, %v1735_v28 }
 0x2d5   :  { %v6404_v35 = vpop.permute.xlu0 %2225 }
 0x2d6   :  { %v6409_v15 = vpop.permute.xlu1 %2393 }
 0x2d9   :  { %v2290_v17 = vpop.permute.xlu0 %2289 }
 0x2da   :  { %v2516_v19 = vsel %vm2480_vm8, %v2449_v29, %v2290_v17  ;;  %v2296_v9 = vpop.permute.xlu1 %2295 }
 0x2db   :  { %v2573_v22 = vsel %vm2537_vm9, %v2516_v19, %v2374_v43  ;;  %v2522_v29 = vsel %vm2480_vm8, %v2458_v49, %v2296_v9 }
 0x2dc   :  { %v6432_v48 = vcombine.low %v2571_v24, %v2573_v22  ;;  %v2579_v9 = vsel %vm2537_vm9, %v2522_v29, %v6359_v16  ;;  %v1772_v16 = vshrl.u32 %v6105_v57, 16 }
 0x2dd   :  { %v2286_v43 = vpop.permute.xlu0 %2285 }
 0x2de   :  { %v2512_v41 = vsel %vm2480_vm8, %v2443_v10, %v2286_v43  ;;  %v2292_v63 = vpop.permute.xlu1 %2291  ;;  %v1753_v10 = vrot.slane %v1751_v56, 7  ;;  %v2464_v43 = vsel %vm2395_vm6, %v1844_v4, %v6371_v44  ;;  %v1774_v44 = vrot.slane %v1772_v16, 7 }
 0x2df   :  { %v6449_v36 = vsel %vm2537_vm9, %v2512_v41, %v6361_v18  ;;  %v2518_v40 = vsel %vm2480_vm8, %v2452_v20, %v2292_v63  ;;  %v1740_v20 = vshll.u32 %v7337_v2, 16  ;;  %v1767_v2 = vrot.slane %v1765_v47, 7 }
 0x2e0   :  { %v2575_v37 = vsel %vm2537_vm9, %v2518_v40, %v6363_v31  ;;  %v4054_v17 = vcombine.low %v6449_v36, %v2571_v24  ;;  %v1754_v24 = vshll.u32 %v7336_v50, 16  ;;  %v1562_v4 = vshrl.u32 %v6139_v0, 16 }
 0x2e1   :  { %v2298_v39 = vpop.permute.xlu0 %2297  ;;  %v4055_v19 = vcombine.low %v2573_v22, %v2575_v37  ;;  %v1742_v49 = vor.u32 %v1740_v20, %v1739_v59  ;;  %v1761_v59 = vshll.u32 %v6128_v53, 16 }
 0x2e2   :  { %v2524_v18 = vsel %vm2480_vm8, %v2461_v45, %v2298_v39  ;;  %v2304_v52 = vpop.permute.xlu1 %2303  ;;  %4316 = vmatmul.mubr.bf16.gmra.mrb[12].mxu1 %v4054_v17  ;;  %v1756_v56 = vor.u32 %v1754_v24, %v1753_v10  ;;  %v1846_v45 = vsel %vm6132_vm7, 0, %v1749_v6  ;;  %v1775_v39 = vshll.u32 %v6105_v57, 16 }
 0x2e3   :  { %v2581_v31 = vsel %vm2537_vm9, %v2524_v18, %v6373_v60  ;;  %4319 = vmatprep.mubr.bf16.mxu1 %v4055_v19  ;;  %v1768_v19 = vshll.u32 %v6112_v27, 16  ;;  %v1845_v18 = vsel %vm6132_vm7, 0, %v1742_v49  ;;  %v6505_v27 = vld [vmem:[%s7113_s2] ss:$0 sm:$0xff]  ;;  %v1763_v6 = vor.u32 %v1761_v59, %v1760_v11 }
 0x2e4   :  { %v6468_v22 = vcombine.low %v2579_v9, %v2581_v31 }
 0x2e5   :  { %v2294_v60 = vpop.permute.xlu0 %2293 }
 0x2e6   :  { %v2520_v30 = vsel %vm2480_vm8, %v2455_v8, %v2294_v60  ;;  %v2300_v50 = vpop.permute.xlu1 %2299 }
 0x2e7   :  { %v2577_v41 = vsel %vm2537_vm9, %v2520_v30, %v6377_v26  ;;  %v2526_v63 = vsel %vm2480_vm8, %v2464_v43, %v2300_v50  ;;  %v2470_v26 = vsel %vm2395_vm6, %v1846_v45, %v6367_v33  ;;  %v2467_v33 = vsel %vm2395_vm6, %v1845_v18, %v6385_v34 }
 0x2e8   :  { %v2583_v1 = vsel %vm2537_vm9, %v2526_v63, %v6379_v32  ;;  %v4056_v40 = vcombine.low %v2577_v41, %v2579_v9  ;;  %v6486_v5 = vcombine.low %v2575_v37, %v2577_v41  ;;  %v7338_v32 = vld [vmem:[#allocation35_spill] sm:$0xff]  ;;  %v1847_v37 = vsel %vm6132_vm7, 0, %v1756_v56 }
 0x2e9   :  { %v2627_v29 = vpop.permute.xlu0 %2626  ;;  %v4057_v17 = vcombine.low %v2581_v31, %v2583_v1  ;;  %v2530_v10 = vsel %vm2480_vm8, %v2470_v26, %v2304_v52  ;;  %v1777_v9 = vor.u32 %v1775_v39, %v1774_v44  ;;  %v1770_v31 = vor.u32 %v1768_v19, %v1767_v2 }
 0x2ea   :  { %v1089_v28 = vpop.permute.xlu1 %1088  ;;  %4320 = vmatmul.mubr.bf16.gmra.mrb[16].mxu1 %v4056_v40  ;;  %v2473_v24 = vsel %vm2395_vm6, %v1847_v37, %v6381_v23  ;;  %v2587_v34 = vsel %vm2537_vm9, %v2530_v10, %v6375_v21  ;;  %v7339_v21 = vld [vmem:[#allocation14_spill] sm:$0xff]  ;;  %v1848_v40 = vsel %vm6132_vm7, 0, %v1763_v6  ;;  %v1564_v44 = vrot.slane %v1562_v4, 7  ;;  %v7340_v6 = vld [vmem:[#allocation19_spill] sm:$0xff] }
 0x2eb   :  { %v1249_v7 = vmax.f32 %v7338_v32, %v1089_v28  ;;  %4323 = vmatprep.mubr.bf16.mxu1 %v4057_v17  ;;  %v1850_v20 = vsel %vm6132_vm7, 0, %v1777_v9  ;;  %v1849_v30 = vsel %vm6132_vm7, 0, %v1770_v31  ;;  %v2476_v2 = vsel %vm2395_vm6, %v1848_v40, %v6388_v13  ;;  %v7343_v40 = vld [vmem:[#allocation36_spill] sm:$0xff] }
 0x2ec   :  { %v1565_v28 = vshll.u32 %v6139_v0, 16  ;;  %v1674_v32 = vshrl.u32 %v6209_v58, 16 }
 0x2ed   :  { %v1320_v57 = vadd.f32 %v6505_v27, %v1249_v7  ;;  %v2302_v12 = vpop.permute.xlu0 %2301 }
 0x2ee   :  { %v2528_v52 = vsel %vm2480_vm8, %v2467_v33, %v2302_v12  ;;  %v2306_v8 = vpop.permute.xlu1 %2305  ;;  %v1567_v19 = vor.u32 %v1565_v28, %v1564_v44  ;;  %v7344_v44 = vld [vmem:[#allocation8_spill] sm:$0xff] }
 0x2ef   :  { %v1384_v16 = vmax.f32 %v1320_v57, 0.0  ;;  %v2585_v47 = vsel %vm2537_vm9, %v2528_v52, %v6397_v51  ;;  %v2532_v60 = vsel %vm2480_vm8, %v2473_v24, %v2306_v8  ;;  %v2633_v51 = vsel %vm2395_vm6, %v1850_v20, %v6383_v46 }
 0x2f0   :  { %v2589_v23 = vsel %vm2537_vm9, %v2532_v60, %v6391_v55  ;;  %v4058_v43 = vcombine.low %v2585_v47, %v2587_v34  ;;  %v6520_v53 = vcombine.low %v2583_v1, %v2585_v47  ;;  %v2479_v55 = vsel %vm2395_vm6, %v1849_v30, %v6404_v35 }
 0x2f1   :  { %v1464_v50 = vmul.f32 %v7339_v21, %v1384_v16  ;;  %v2621_v56 = vpop.permute.xlu0 %2620  ;;  %v6527_v54 = vcombine.low %v2587_v34, %v2589_v23  ;;  %v1820_v0 = vsel %vm6132_vm7, 0, %v1567_v19  ;;  %v1677_v57 = vshll.u32 %v6209_v58, 16 }
 0x2f2   :  { %v2310_v41 = vpop.permute.xlu1 %2309  ;;  %4324 = vmatmul.mubr.bf16.gmra.mrb[20].mxu1 %v4058_v43  ;;  %v2637_v49 = vsel %vm2480_vm8, %v2633_v51, %v2621_v56 }
 0x2f3   :  { %v6533_v63 = vpack.c.bf16 %v1464_v50, %v1464_v50  ;;  %v2536_v1 = vsel %vm2480_vm8, %v2479_v55, %v2310_v41  ;;  %v6544_v35 = vsel %vm2537_vm9, %v2637_v49, %v2627_v29  ;;  %v4568_v49 = vld [vmem:[%s7115_s3 + $0x90] sm:$0xff]  }
 0x2f4   :  { %v2593_v17 = vsel %vm2537_vm9, %v2536_v1, %v6409_v15  ;;  %v7342_v1 = vld [vmem:[#allocation11_spill] sm:$0xff] }
 0x2f5   :  { %3169 = vrot.lane.b32.xlu1 %v6533_v63, %s4575_s0  ;;  %v2308_v46 = vpop.permute.xlu0 %2307  ;;  %v4060_v29 = vcombine.low %v2593_v17, %v6544_v35  ;;  %v1667_v28 = vshrl.u32 %v6533_v63, 16 }
 0x2f6   :  { %v2534_v45 = vsel %vm2480_vm8, %v2476_v2, %v2308_v46  ;;  %v2172_v26 = vpop.permute.xlu1 %2171  ;;  %v7345_v2 = vld [vmem:[#allocation16_spill] sm:$0xff]  ;;  %v4571_v46 = vld [vmem:[%s7115_s3 + $0xa8] sm:$0xff]  }
 0x2f7   :  { %v2591_v39 = vsel %vm2537_vm9, %v2534_v45, %v6401_v25  ;;  %v1676_v25 = vrot.slane %v1674_v32, 7  ;;  %v2398_v10 = vsel %vm2395_vm6, %v1820_v0, %v2172_v26  ;;  %v4573_v45 = vld [vmem:[%s7115_s3 + $0xb8] sm:$0xff]   ;;  %v1669_v26 = vrot.slane %v1667_v28, 7  ;;  %v7346_v0 = vld [vmem:[#allocation38_spill] sm:$0xff] }
 0x2f8   :  { %v4059_v13 = vcombine.low %v2589_v23, %v2591_v39  ;;  %v6553_v7 = vcombine.low %v2591_v39, %v2593_v17  ;;  %v4572_v17 = vld [vmem:[%s7115_s3 + $0xb0] sm:$0xff]   ;;  %v1670_v39 = vshll.u32 %v6533_v63, 16 }
 0x2f9   :  { %v1121_v37 = vpop.permute.xlu0 %1120  ;;  %v1679_v24 = vor.u32 %v1677_v57, %v1676_v25 }
 0x2fa   :  { %v1265_v18 = vmax.f32 %v6062_v62, %v1121_v37  ;;  %v2340_v15 = vpop.permute.xlu1 %2339  ;;  %4327 = vmatprep.mubr.bf16.mxu1 %v4059_v13  ;;  %v1672_v19 = vor.u32 %v1670_v39, %v1669_v26 }
 0x2fb   :  { %4328 = vmatmul.mubr.bf16.gmra.mrb[24].mxu1 %v4060_v29  ;;  %v1836_v16 = vsel %vm6132_vm7, 0, %v1679_v24 }
 0x2fc   :  { %v1336_v11 = vadd.f32 %v6505_v27, %v1265_v18  ;;  %v1835_v32 = vsel %vm6132_vm7, 0, %v1672_v19 }
 0x2fd   :  { %v2256_v9 = vpop.permute.xlu0 %2255 }
 0x2fe   :  { %v1400_v33 = vmax.f32 %v1336_v11, 0.0  ;;  %v2482_v31 = vsel %vm2480_vm8, %v2398_v10, %v2256_v9  ;;  %v2200_v59 = vpop.permute.xlu1 %2199 }
 0x2ff   :  { %v2539_v12 = vsel %vm2537_vm9, %v2482_v31, %v2340_v15  ;;  %v2440_v60 = vsel %vm2395_vm6, %v1836_v16, %v2200_v59 }
 0x300   :  { %v1480_v62 = vmul.f32 %v7339_v21, %v1400_v33  ;;  %v4069_v52 = vcombine.low %v2539_v12, %v6170_v14 }
 0x301   :  { %v1153_v8 = vpop.permute.xlu0 %1152 }
 0x302   :  { %v1544_v4 = vpack.c.bf16 %v1480_v62, %v1480_v62  ;;  %v1281_v34 = vmax.f32 %v6066_v3, %v1153_v8  ;;  %4347 = vmatprep.mubr.bf16.mxu1 %v4069_v52  ;;  %v2368_v3 = vpop.permute.xlu1 %2367 }
 0x303   :  { %4348 = vmatmul.mubr.bf16.vlgmr.msra.gmra.mrb[0].mxu1 %v6202_v38 }
 0x304   :  { %v1352_v58 = vadd.f32 %v6505_v27, %v1281_v34  ;;  %3165 = vrot.lane.b32.xlu1 %v1544_v4, %s4576_s21  ;;  %4351 = vmatprep.mubr.bf16.mxu1 %v6238_v61  ;;  %v2072_v47 = vshll.u32 %v1544_v4, 16  ;;  %v2070_v38 = vshrl.u32 %v1544_v4, 16  ;;  %v4567_v27 = vld [vmem:[%s7115_s3 + $0x88] sm:$0xff]  }
 0x305   :  { %v2284_v14 = vpop.permute.xlu0 %2283  ;;  %4427 = vmatpush3.bf16.msra.mxu1 %v7340_v6 }
 0x306   :  { %v1416_v23 = vmax.f32 %v1352_v58, 0.0  ;;  %v2510_v43 = vsel %vm2480_vm8, %v2440_v60, %v2284_v14  ;;  %v2074_v20 = vrot.slane %v2072_v47, 1  ;;  %4420 = vmatprep.subr.bf16.mxu1 %v4567_v27 }
 0x307   :  { %v2567_v30 = vsel %vm2537_vm9, %v2510_v43, %v2368_v3 }
 0x308   :  { %v1496_v61 = vmul.f32 %v7339_v21, %v1416_v23  ;;  %v2075_v50 = vor.u32 %v2074_v20, %v2070_v38  ;;  %v4076_v56 = vcombine.low %v2567_v30, %v6449_v36  ;;  %v4569_v36 = vld [vmem:[%s7115_s3 + $0x98] sm:$0xff]   ;;  %v4570_v21 = vld [vmem:[%s7115_s3 + $0xa0] sm:$0xff]  }
 0x309   :  { %4428 = vmatpush3.bf16.msra.mxu1 %v4567_v27  ;;  %v3164_v13 = vpop.permute.xlu0 %3163 }
 0x30a   :  { %v6582_v51 = vpack.c.bf16 %v1496_v61, %v1496_v61  ;;  %v2142_v41 = vsel %vm5371_vm3, %v2075_v50, 0  ;;  %4421 = vmatprep.subr.bf16.mxu1 %v4568_v49 }
 0x30b   :  { %3177 = vrot.lane.b32.xlu1 %v2142_v41, %s4574_s12  ;;  %4352 = vmatmul.mubr.bf16.gmra.mrb[4].mxu1 %v7342_v1 }
 0x30c   :  { %4355 = vmatprep.mubr.bf16.mxu1 %v7343_v40  ;;  %3171 = vrot.lane.b32.xlu0 %v6582_v51, %s4575_s0  ;;  %v1779_v63 = vshrl.u32 %v6582_v51, 16  ;;  %v1782_v33 = vshll.u32 %v6582_v51, 16 }
 0x30d   :  { %4429 = vmatpush3.bf16.msra.mxu1 %v4568_v49 }
 0x30e   :  { %4422 = vmatprep.subr.bf16.mxu1 %v4569_v36  ;;  %v1781_v10 = vrot.slane %v1779_v63, 7 }
 0x310   :  { %v1784_v12 = vor.u32 %v1782_v33, %v1781_v10 }
 0x311   :  { %4430 = vmatpush3.bf16.msra.mxu1 %v4569_v36 }
 0x312   :  { %4423 = vmatprep.subr.bf16.mxu1 %v4570_v21  ;;  %v1851_v24 = vsel %vm6132_vm7, 0, %v1784_v12  ;;  %v6731_v12 = vld [vmem:[%s7116_s4] ss:$0 sm:$0xff] }
 0x313   :  { %4356 = vmatmul.mubr.bf16.gmra.mrb[8].mxu1 %v7344_v44 }
 0x314   :  { %4359 = vmatprep.mubr.bf16.mxu1 %v7345_v2 }
 0x315   :  { %4431 = vmatpush3.bf16.msra.mxu1 %v4570_v21 }
 0x316   :  { %4424 = vmatprep.subr.bf16.mxu1 %v4571_v46 }
 0x319   :  { %4432 = vmatpush3.bf16.msra.mxu1 %v4571_v46 }
 0x31a   :  { %4425 = vmatprep.subr.bf16.mxu1 %v4572_v17 }
 0x31b   :  { %4360 = vmatmul.mubr.bf16.gmra.mrb[12].mxu1 %v4076_v56 }
 0x31c   :  { %4363 = vmatprep.mubr.bf16.mxu1 %v6432_v48 }
 0x31d   :  { %4433 = vmatpush3.bf16.msra.mxu1 %v4572_v17 }
 0x31e   :  { %4426 = vmatprep.subr.bf16.mxu1 %v4573_v45 }
 0x321   :  { %4434 = vmatpush3.bf16.msra.mxu1 %v4573_v45 }
 0x323   :  { %4364 = vmatmul.mubr.bf16.gmra.mrb[16].mxu1 %v6486_v5 }
 0x324   :  { %4367 = vmatprep.mubr.bf16.mxu1 %v6468_v22 }
 0x32b   :  { %4368 = vmatmul.mubr.bf16.gmra.mrb[20].mxu1 %v6520_v53 }
 0x32c   :  { %4371 = vmatprep.mubr.bf16.mxu1 %v6527_v54 }
 0x333   :  { %4372 = vmatmul.mubr.bf16.gmra.mrb[24].mxu1 %v6553_v7 }
 0x334   :  { %4407 = vmatprep.mubr.bf16.mxu1 %v6486_v5  ;;  %v3181_v5 = vsel %vm2395_vm6, %v1835_v32, %v3164_v13 }
 0x33b   :  { %4408 = vmatmul.mubr.bf16.vlgmr.msra.gmra.mrb[16].mxu1 %v6468_v22 }
 0x33c   :  { %4411 = vmatprep.mubr.bf16.mxu1 %v6520_v53  ;;  %v3176_v53 = vpop.permute.xlu0 %3175 }
 0x343   :  { %4412 = vmatmul.mubr.bf16.gmra.mrb[20].mxu1 %v6527_v54 }
 0x344   :  { %4415 = vmatprep.mubr.bf16.mxu1 %v6553_v7 }
 0x366   :  { %v4393_v37 = vpop.f32.mrb[64].mxu0 }
 0x367   :  { %v3170_v22 = vpop.permute.xlu1 %3169  ;;  %v3300_v29 = vpop.f32.mrb[65].mxu0 }
 0x368   :  { %v3186_v54 = vsel %vm2480_vm8, %v3181_v5, %v3170_v22  ;;  %v4394_v18 = vpop.f32.mrb[66].mxu0 }
 0x369   :  { %v3190_v7 = vsel %vm2537_vm9, %v3186_v54, %v3176_v53  ;;  %v3303_v15 = vpop.f32.mrb[67].mxu0 }
 0x36a   :  { %v4107_v11 = vcombine.low %v7346_v0, %v3190_v7 }
 0x36c   :  { %4403 = vmatprep.mubr.bf16.mxu0 %v4107_v11 }
 0x36d   :  { %4404 = vmatmul.mubr.bf16.gmra.mrb[76].mxu0 %v6432_v48 }
 0x375   :  { %v4397_v25 = vpop.f32.mrb[68].mxu0 }
 0x376   :  { %v3316_v9 = vpop.f32.mrb[69].mxu0  ;;  %v3166_v62 = vpop.permute.xlu1 %3165 }
 0x377   :  { %v4398_v31 = vpop.f32.mrb[70].mxu0  ;;  %v3184_v52 = vsel %vm2395_vm6, %v1851_v24, %v3166_v62 }
 0x378   :  { %v3319_v57 = vpop.f32.mrb[71].mxu0 }
 0x37d   :  { %v4401_v59 = vpop.f32.mrb[72].mxu0  ;;  %v3178_v48 = vpop.permute.xlu1 %3177 }
 0x37e   :  { %v3332_v8 = vpop.f32.mrb[73].mxu0  ;;  %v3172_v4 = vpop.permute.xlu0 %3171 }
 0x37f   :  { %v3188_v34 = vsel %vm2480_vm8, %v3184_v52, %v3172_v4  ;;  %v4402_v16 = vpop.f32.mrb[74].mxu0 }
 0x380   :  { %v3192_v58 = vsel %vm2537_vm9, %v3188_v34, %v3178_v48  ;;  %v3335_v47 = vpop.f32.mrb[75].mxu0 }
 0x381   :  { %v4108_v60 = vcombine.low %v6544_v35, %v3192_v58 }
 0x383   :  { %4416 = vmatmul.mubr.bf16.gmra.mrb[24].mxu1 %v4108_v60 }
 0x3d6   :  { %v4349_v14 = vpop.f32.mrb[0].mxu1 }
 0x3d7   :  { %v6639_v6 = vadd.f32 %v4393_v37, %v4349_v14  ;;  %v3050_v42 = vpop.f32.mrb[1].mxu1 }
 0x3d8   :  { %v6641_v23 = vadd.f32 %v3300_v29, %v3050_v42  ;;  %v4350_v3 = vpop.f32.mrb[2].mxu1 }
 0x3d9   :  { %v6643_v43 = vadd.f32 %v4394_v18, %v4350_v3  ;;  %v3053_v38 = vpop.f32.mrb[3].mxu1  ;;  %3471 = vrot.lane.b32.xlu0 %v6639_v6, %s4575_s0 }
 0x3da   :  { %v6647_v20 = vadd.f32 %v3303_v15, %v3053_v38 }
 0x3db   :  { %3473 = vrot.lane.b32.xlu1 %v6643_v43, %s4575_s0 }
 0x3dd   :  { %3467 = vrot.lane.b32.xlu0 %v6641_v23, %s4575_s0 }
 0x3de   :  { %v4353_v35 = vpop.f32.mrb[4].mxu1 }
 0x3df   :  { %v6653_v27 = vadd.f32 %v4397_v25, %v4353_v35  ;;  %3469 = vrot.lane.b32.xlu1 %v6647_v20, %s4575_s0  ;;  %v3066_v30 = vpop.f32.mrb[5].mxu1 }
 0x3e0   :  { %v6657_v61 = vadd.f32 %v3316_v9, %v3066_v30  ;;  %v4354_v50 = vpop.f32.mrb[6].mxu1 }
 0x3e1   :  { %v6659_v56 = vadd.f32 %v4398_v31, %v4354_v50  ;;  %v3069_v51 = vpop.f32.mrb[7].mxu1  ;;  %3479 = vrot.lane.b32.xlu0 %v6653_v27, %s4575_s0 }
 0x3e2   :  { %v6663_v41 = vadd.f32 %v3319_v57, %v3069_v51 }
 0x3e3   :  { %3481 = vrot.lane.b32.xlu1 %v6659_v56, %s4575_s0 }
 0x3e5   :  { %3475 = vrot.lane.b32.xlu0 %v6657_v61, %s4575_s0 }
 0x3e6   :  { %v4357_v49 = vpop.f32.mrb[8].mxu1 }
 0x3e7   :  { %v6669_v1 = vadd.f32 %v4401_v59, %v4357_v49  ;;  %3477 = vrot.lane.b32.xlu1 %v6663_v41, %s4575_s0  ;;  %v3082_v40 = vpop.f32.mrb[9].mxu1 }
 0x3e8   :  { %v6673_v36 = vadd.f32 %v3332_v8, %v3082_v40  ;;  %v4358_v21 = vpop.f32.mrb[10].mxu1 }
 0x3e9   :  { %v6675_v44 = vadd.f32 %v4402_v16, %v4358_v21  ;;  %v3085_v2 = vpop.f32.mrb[11].mxu1  ;;  %3487 = vrot.lane.b32.xlu0 %v6669_v1, %s4575_s0 }
 0x3ea   :  { %v6679_v46 = vadd.f32 %v3335_v47, %v3085_v2 }
 0x3eb   :  { %3489 = vrot.lane.b32.xlu1 %v6675_v44, %s4575_s0 }
 0x3ed   :  { %3483 = vrot.lane.b32.xlu0 %v6673_v36, %s4575_s0 }
 0x3ee   :  { %v4361_v17 = vpop.f32.mrb[12].mxu1 }
 0x3ef   :  { %3485 = vrot.lane.b32.xlu1 %v6679_v46, %s4575_s0  ;;  %v3098_v45 = vpop.f32.mrb[13].mxu1 }
 0x3f0   :  { %v4362_v28 = vpop.f32.mrb[14].mxu1 }
 0x3f1   :  { %v3101_v26 = vpop.f32.mrb[15].mxu1 }
 0x40e   :  { %v6687_v39 = vpop.f32.mrb[16].mxu1 }
 0x40f   :  { %v6689_v19 = vpop.f32.mrb[17].mxu1 }
 0x410   :  { %v6691_v13 = vpop.f32.mrb[18].mxu1 }
 0x411   :  { %v6693_v32 = vpop.f32.mrb[19].mxu1 }
 0x416   :  { %v6695_v37 = vpop.f32.mrb[20].mxu1 }
 0x417   :  { %v6697_v5 = vpop.f32.mrb[21].mxu1 }
 0x418   :  { %v6699_v22 = vpop.f32.mrb[22].mxu1 }
 0x419   :  { %v6701_v29 = vpop.f32.mrb[23].mxu1 }
 0x440   :  { %v4405_v53 = vpop.f32.mrb[76].mxu0 }
 0x441   :  { %v6703_v54 = vadd.f32 %v4405_v53, %v4361_v17  ;;  %v3348_v18 = vpop.f32.mrb[77].mxu0 }
 0x442   :  { %v6705_v7 = vadd.f32 %v3348_v18, %v3098_v45  ;;  %v4406_v15 = vpop.f32.mrb[78].mxu0 }
 0x443   :  { %v6707_v0 = vadd.f32 %v4406_v15, %v4362_v28  ;;  %3495 = vrot.lane.b32.xlu0 %v6703_v54, %s4575_s0  ;;  %v3351_v11 = vpop.f32.mrb[79].mxu0 }
 0x444   :  { %v6711_v63 = vadd.f32 %v3351_v11, %v3101_v26 }
 0x445   :  { %3497 = vrot.lane.b32.xlu1 %v6707_v0, %s4575_s0 }
 0x447   :  { %3491 = vrot.lane.b32.xlu0 %v6705_v7, %s4575_s0 }
 0x449   :  { %3493 = vrot.lane.b32.xlu1 %v6711_v63, %s4575_s0 }
 0x44b   :  { %3503 = vrot.lane.b32.xlu0 %v6687_v39, %s4575_s0  ;;  %v3472_v25 = vpop.permute.xlu0 %3471 }
 0x44c   :  { %v3553_v10 = vmax.f32 %v6639_v6, %v3472_v25 }
 0x44d   :  { %v3474_v9 = vpop.permute.xlu1 %3473  ;;  %3505 = vrot.lane.b32.xlu1 %v6691_v13, %s4575_s0 }
 0x44e   :  { %v3554_v33 = vmax.f32 %v6643_v43, %v3474_v9  ;;  %v3582_v57 = vsel %vm2480_vm8, %v3553_v10, -inf }
 0x44f   :  { %3499 = vrot.lane.b32.xlu0 %v6689_v19, %s4575_s0  ;;  %v3468_v31 = vpop.permute.xlu0 %3467 }
 0x450   :  { %v3583_v62 = vsel %vm2480_vm8, %v3554_v33, -inf  ;;  %v3551_v24 = vmax.f32 %v6641_v23, %v3468_v31 }
 0x451   :  { %v3584_v59 = vmax.f32 %v3582_v57, %v3583_v62  ;;  %v3470_v52 = vpop.permute.xlu1 %3469  ;;  %3501 = vrot.lane.b32.xlu1 %v6693_v32, %s4575_s0 }
 0x452   :  { %v3552_v8 = vmax.f32 %v6647_v20, %v3470_v52  ;;  %v3579_v34 = vsel %vm2480_vm8, %v3551_v24, -inf }
 0x453   :  { %v3629_v4 = vadd.f32 %v6731_v12, %v3584_v59  ;;  %3511 = vrot.lane.b32.xlu0 %v6695_v37, %s4575_s0  ;;  %v3480_v48 = vpop.permute.xlu0 %3479 }
 0x454   :  { %v3580_v16 = vsel %vm2480_vm8, %v3552_v8, -inf  ;;  %v3557_v58 = vmax.f32 %v6653_v27, %v3480_v48 }
 0x455   :  { %v3643_v47 = vmax.f32 %v3629_v4, 0.0  ;;  %v3581_v60 = vmax.f32 %v3579_v34, %v3580_v16  ;;  %v3482_v14 = vpop.permute.xlu1 %3481  ;;  %3513 = vrot.lane.b32.xlu1 %v6699_v22, %s4575_s0 }
 0x456   :  { %v3558_v6 = vmax.f32 %v6659_v56, %v3482_v14  ;;  %v6747_v42 = vpop.f32.mrb[24].mxu1  ;;  %v3588_v20 = vsel %vm2480_vm8, %v3557_v58, -inf }
 0x457   :  { %v3657_v23 = vpack.c.bf16 %v3643_v47, %v3643_v47  ;;  %v3628_v3 = vadd.f32 %v6731_v12, %v3581_v60  ;;  %3507 = vrot.lane.b32.xlu0 %v6697_v5, %s4575_s0  ;;  %v6752_v43 = vpop.f32.mrb[25].mxu1  ;;  %v3476_v38 = vpop.permute.xlu0 %3475 }
 0x458   :  { %v3589_v35 = vsel %vm2480_vm8, %v3558_v6, -inf  ;;  %v3555_v27 = vmax.f32 %v6657_v61, %v3476_v38  ;;  %v6757_v30 = vpop.f32.mrb[26].mxu1 }
 0x459   :  { %v3642_v50 = vmax.f32 %v3628_v3, 0.0  ;;  %v3590_v56 = vmax.f32 %v3588_v20, %v3589_v35  ;;  %v3478_v51 = vpop.permute.xlu1 %3477  ;;  %3509 = vrot.lane.b32.xlu1 %v6701_v29, %s4575_s0  ;;  %v6761_v49 = vpop.f32.mrb[27].mxu1  ;;  %v6763_v40 = vunpack.c.l.b16 %v3657_v23 }
 0x45a   :  { %v3556_v21 = vmax.f32 %v6663_v41, %v3478_v51  ;;  %v3585_v45 = vsel %vm2480_vm8, %v3555_v27, -inf }
 0x45b   :  { %v3656_v2 = vpack.c.bf16 %v3642_v50, %v3642_v50  ;;  %v3631_v17 = vadd.f32 %v6731_v12, %v3590_v56  ;;  %3515 = vrot.lane.b32.xlu0 %v6752_v43, %s4575_s0  ;;  %v3488_v61 = vpop.permute.xlu0 %3487  ;;  %v3698_v25 = vrot.slane %v6763_v40, 7  ;;  %v3761_v16 = vrot.slane %v6763_v40, 1 }
 0x45c   :  { %v3586_v28 = vsel %vm2480_vm8, %v3556_v21, -inf  ;;  %v3561_v26 = vmax.f32 %v6669_v1, %v3488_v61  ;;  %v3817_v23 = vrot.slane %v6763_v40, 3 }
 0x45d   :  { %v6772_v53 = vunpack.c.l.b16 %v3656_v2  ;;  %v3587_v18 = vmax.f32 %v3585_v45, %v3586_v28  ;;  %v3490_v15 = vpop.permute.xlu1 %3489  ;;  %3517 = vrot.lane.b32.xlu1 %v6761_v49, %s4575_s0  ;;  %v3645_v41 = vmax.f32 %v3631_v17, 0.0  ;;  %v3873_v45 = vrot.slane %v6763_v40, 5 }
 0x45e   :  { %v3562_v11 = vmax.f32 %v6675_v44, %v3490_v15  ;;  %v3594_v1 = vsel %vm2480_vm8, %v3561_v26, -inf }
 0x45f   :  { %v3630_v10 = vadd.f32 %v6731_v12, %v3587_v18  ;;  %3519 = vrot.lane.b32.xlu0 %v6747_v42, %s4575_s0  ;;  %v3484_v9 = vpop.permute.xlu0 %3483  ;;  %v3700_v57 = vsel %vm3699_vm10, %v3698_v25, %v6772_v53  ;;  %v3659_v59 = vpack.c.bf16 %v3645_v41, %v3645_v41  ;;  %v3760_v34 = vrot.slane %v6772_v53, 2 }
 0x460   :  { %v3595_v33 = vsel %vm2480_vm8, %v3562_v11, -inf  ;;  %v3559_v31 = vmax.f32 %v6673_v36, %v3484_v9  ;;  %v3816_v14 = vrot.slane %v6772_v53, 4  ;;  %v3872_v56 = vrot.slane %v6772_v53, 6 }
 0x461   :  { %v3644_v62 = vmax.f32 %v3630_v10, 0.0  ;;  %v3596_v24 = vmax.f32 %v3594_v1, %v3595_v33  ;;  %v3486_v44 = vpop.permute.xlu1 %3485  ;;  %3521 = vrot.lane.b32.xlu1 %v6757_v30, %s4575_s0  ;;  %v6797_v6 = vunpack.c.l.b16 %v3659_v59 }
 0x462   :  { %v3560_v52 = vmax.f32 %v6679_v46, %v3486_v44  ;;  %v3591_v48 = vsel %vm2480_vm8, %v3559_v31, -inf  ;;  %v3762_v46 = vsel %vm3699_vm10, %v3761_v16, %v3760_v34  ;;  %v3818_v27 = vsel %vm3699_vm10, %v3817_v23, %v3816_v14 }
 0x463   :  { %v3658_v8 = vpack.c.bf16 %v3644_v62, %v3644_v62  ;;  %v3633_v4 = vadd.f32 %v6731_v12, %v3596_v24  ;;  %v3704_v21 = vrot.slane %v6797_v6, 5  ;;  %v3764_v2 = vrot.slane %v6797_v6, 7 }
 0x464   :  { %v3592_v36 = vsel %vm2480_vm8, %v3560_v52, -inf  ;;  %v3874_v41 = vsel %vm3699_vm10, %v3873_v45, %v3872_v56  ;;  %v3821_v62 = vrot.slane %v6797_v6, 1  ;;  %v3877_v24 = vrot.slane %v6797_v6, 3 }
 0x465   :  { %v6794_v58 = vunpack.c.l.b16 %v3658_v8  ;;  %v3647_v47 = vmax.f32 %v3633_v4, 0.0  ;;  %v3593_v60 = vmax.f32 %v3591_v48, %v3592_v36  ;;  %v3843_v45 = vrot.slane %v6763_v40, 4 }
 0x467   :  { %v3661_v3 = vpack.c.bf16 %v3647_v47, %v3647_v47  ;;  %v3632_v38 = vadd.f32 %v6731_v12, %v3593_v60  ;;  %v3701_v20 = vrot.slane %v6794_v58, 6  ;;  %v3763_v35 = vsel %vm3702_vm11, %v6794_v58, %v3762_v46 }
 0x468   :  { %v3765_v26 = vsel %vm3705_vm12, %v3764_v2, %v3763_v35  ;;  %v3819_v15 = vrot.slane %v6794_v58, 2  ;;  %v3875_v11 = vrot.slane %v6794_v58, 4  ;;  %v3786_v35 = vrot.slane %v6772_v53, 3 }
 0x469   :  { %v3646_v50 = vmax.f32 %v3632_v38, 0.0  ;;  %v3703_v51 = vsel %vm3702_vm11, %v3701_v20, %v3700_v57  ;;  %v6810_v17 = vunpack.c.l.b16 %v3661_v3  ;;  %v3730_v38 = vrot.slane %v6772_v53, 1 }
 0x46a   :  { %v3706_v28 = vsel %vm3705_vm12, %v3704_v21, %v3703_v51  ;;  %v3820_v1 = vsel %vm3702_vm11, %v3819_v15, %v3818_v27  ;;  %v3876_v33 = vsel %vm3702_vm11, %v3875_v11, %v3874_v41  ;;  %v3842_v27 = vrot.slane %v6772_v53, 5 }
 0x46b   :  { %v3660_v61 = vpack.c.bf16 %v3646_v50, %v3646_v50  ;;  %v3710_v10 = vrot.slane %v6810_v17, 3  ;;  %v3768_v59 = vrot.slane %v6810_v17, 5  ;;  %v3824_v52 = vrot.slane %v6810_v17, 7 }
 0x46c   :  { %v3822_v4 = vsel %vm3705_vm12, %v3821_v62, %v3820_v1  ;;  %v3878_v48 = vsel %vm3705_vm12, %v3877_v24, %v3876_v33  ;;  %v3881_v36 = vrot.slane %v6810_v17, 1  ;;  %v3732_v56 = vrot.slane %v6794_v58, 7 }
 0x46d   :  { %v6815_v18 = vunpack.c.l.b16 %v3660_v61  ;;  %v3787_v51 = vrot.slane %v6763_v40, 2  ;;  %v3789_v21 = vrot.slane %v6794_v58, 1  ;;  %v3731_v53 = vsel %vm3699_vm10, %v6763_v40, %v3730_v38 }
 0x46e   :  { %v3844_v41 = vsel %vm3699_vm10, %v3843_v45, %v3842_v27  ;;  %v3845_v11 = vrot.slane %v6794_v58, 3 }
 0x46f   :  { %v3707_v25 = vrot.slane %v6815_v18, 4  ;;  %v3766_v9 = vrot.slane %v6815_v18, 6  ;;  %v3879_v31 = vrot.slane %v6815_v18, 2  ;;  %v3823_v16 = vsel %vm3708_vm13, %v6815_v18, %v3822_v4 }
 0x470   :  { %v6845_v60 = vsel %vm3711_vm14, %v3824_v52, %v3823_v16  ;;  %v3788_v15 = vsel %vm3699_vm10, %v3787_v51, %v3786_v35  ;;  %v3792_v24 = vrot.slane %v6815_v18, 7  ;;  %v3846_v4 = vsel %vm3702_vm11, %v3845_v11, %v3844_v41 }
 0x471   :  { %v3709_v57 = vsel %vm3708_vm13, %v3707_v25, %v3706_v28  ;;  %v3767_v8 = vsel %vm3708_vm13, %v3766_v9, %v3765_v26  ;;  %v3880_v47 = vsel %vm3708_vm13, %v3879_v31, %v3878_v48  ;;  %v3734_v9 = vrot.slane %v6797_v6, 6 }
 0x472   :  { %v6830_v44 = vsel %vm3711_vm14, %v3710_v10, %v3709_v57  ;;  %v6839_v34 = vsel %vm3711_vm14, %v3768_v59, %v3767_v8  ;;  %v6848_v14 = vsel %vm3711_vm14, %v3881_v36, %v3880_v47  ;;  %v3790_v1 = vsel %vm3702_vm11, %v3789_v21, %v3788_v15 }
 0x473   :  { %v3736_v31 = vrot.slane %v6815_v18, 5  ;;  %v3847_v59 = vrot.slane %v6797_v6, 2  ;;  %v3849_v48 = vrot.slane %v6815_v18, 1  ;;  %v3738_v47 = vrot.slane %v6810_v17, 4 }
 0x4b5   :  { %v3496_v46 = vpop.permute.xlu0 %3495 }
 0x4b6   :  { %v3565_v23 = vmax.f32 %v6703_v54, %v3496_v46  ;;  %v3791_v46 = vsel %vm3705_vm12, %v6797_v6, %v3790_v1  ;;  %v3794_v6 = vrot.slane %v6810_v17, 6 }
 0x4b7   :  { %v3498_v3 = vpop.permute.xlu1 %3497  ;;  %v3793_v27 = vsel %vm3708_vm13, %v3792_v24, %v3791_v46 }
 0x4b8   :  { %v3566_v20 = vmax.f32 %v6707_v0, %v3498_v3  ;;  %v3600_v2 = vsel %vm2480_vm8, %v3565_v23, -inf }
 0x4b9   :  { %v3492_v50 = vpop.permute.xlu0 %3491 }
 0x4ba   :  { %v3601_v54 = vsel %vm2480_vm8, %v3566_v20, -inf  ;;  %v3563_v61 = vmax.f32 %v6705_v7, %v3492_v50  ;;  %v3733_v7 = vsel %vm3702_vm11, %v3732_v56, %v3731_v53  ;;  %v3848_v50 = vsel %vm3705_vm12, %v3847_v59, %v3846_v4 }
 0x4bb   :  { %v3602_v0 = vmax.f32 %v3600_v2, %v3601_v54  ;;  %v3494_v28 = vpop.permute.xlu1 %3493  ;;  %v3735_v8 = vsel %vm3705_vm12, %v3734_v9, %v3733_v7  ;;  %v3850_v21 = vsel %vm3708_vm13, %v3849_v48, %v3848_v50  ;;  %v3795_v53 = vsel %vm3711_vm14, %v3794_v6, %v3793_v27 }
 0x4bc   :  { %v3564_v26 = vmax.f32 %v6711_v63, %v3494_v28  ;;  %v3597_v33 = vsel %vm2480_vm8, %v3563_v61, -inf  ;;  %v3737_v38 = vsel %vm3708_vm13, %v3736_v31, %v3735_v8  ;;  %v3851_v11 = vsel %vm3711_vm14, %v6810_v17, %v3850_v21 }
 0x4bd   :  { %v3635_v25 = vadd.f32 %v6731_v12, %v3602_v0  ;;  %v3504_v10 = vpop.permute.xlu0 %3503  ;;  %v3739_v61 = vsel %vm3711_vm14, %v3738_v47, %v3737_v38 }
 0x4be   :  { %v3598_v40 = vsel %vm2480_vm8, %v3564_v26, -inf  ;;  %v3569_v63 = vmax.f32 %v6687_v39, %v3504_v10 }
 0x4bf   :  { %v3649_v57 = vmax.f32 %v3635_v25, 0.0  ;;  %v3599_v62 = vmax.f32 %v3597_v33, %v3598_v40  ;;  %v3506_v58 = vpop.permute.xlu1 %3505 }
 0x4c0   :  { %v3570_v52 = vmax.f32 %v6691_v13, %v3506_v58  ;;  %v3606_v23 = vsel %vm2480_vm8, %v3569_v63, -inf }
 0x4c1   :  { %v3663_v36 = vpack.c.bf16 %v3649_v57, %v3649_v57  ;;  %v3634_v39 = vadd.f32 %v6731_v12, %v3599_v62  ;;  %v3500_v16 = vpop.permute.xlu0 %3499 }
 0x4c2   :  { %v3607_v3 = vsel %vm2480_vm8, %v3570_v52, -inf  ;;  %v3567_v13 = vmax.f32 %v6689_v19, %v3500_v16 }
 0x4c3   :  { %v3648_v20 = vmax.f32 %v3634_v39, 0.0  ;;  %v3608_v35 = vmax.f32 %v3606_v23, %v3607_v3  ;;  %v3502_v18 = vpop.permute.xlu1 %3501  ;;  %v6892_v56 = vunpack.c.l.b16 %v3663_v36 }
 0x4c4   :  { %v3568_v51 = vmax.f32 %v6693_v32, %v3502_v18  ;;  %v3603_v45 = vsel %vm2480_vm8, %v3567_v13, -inf }
 0x4c5   :  { %v3662_v2 = vpack.c.bf16 %v3648_v20, %v3648_v20  ;;  %v3637_v19 = vadd.f32 %v6731_v12, %v3608_v35  ;;  %v3512_v54 = vpop.permute.xlu0 %3511  ;;  %v3742_v10 = vrot.slane %v6892_v56, 1  ;;  %v3798_v7 = vrot.slane %v6892_v56, 3 }
 0x4c6   :  { %v3604_v0 = vsel %vm2480_vm8, %v3568_v51, -inf  ;;  %v3573_v28 = vmax.f32 %v6695_v37, %v3512_v54  ;;  %v3854_v9 = vrot.slane %v6892_v56, 5 }
 0x4c7   :  { %v6903_v32 = vunpack.c.l.b16 %v3662_v2  ;;  %v3651_v26 = vmax.f32 %v3637_v19, 0.0  ;;  %v3605_v15 = vmax.f32 %v3603_v45, %v3604_v0  ;;  %v3514_v41 = vpop.permute.xlu1 %3513 }
 0x4c8   :  { %v3574_v25 = vmax.f32 %v6699_v22, %v3514_v41  ;;  %v3612_v31 = vsel %vm2480_vm8, %v3573_v28, -inf }
 0x4c9   :  { %v3665_v1 = vpack.c.bf16 %v3651_v26, %v3651_v26  ;;  %v3636_v37 = vadd.f32 %v6731_v12, %v3605_v15  ;;  %v3508_v33 = vpop.permute.xlu0 %3507  ;;  %v3740_v40 = vrot.slane %v6903_v32, 3  ;;  %v3796_v63 = vrot.slane %v6903_v32, 5 }
 0x4ca   :  { %v3613_v17 = vsel %vm2480_vm8, %v3574_v25, -inf  ;;  %v3571_v22 = vmax.f32 %v6697_v5, %v3508_v33  ;;  %v3852_v57 = vrot.slane %v6903_v32, 7  ;;  %v3713_v36 = vrot.slane %v6903_v32, 2 }
 0x4cb   :  { %v6918_v62 = vunpack.c.l.b16 %v3665_v1  ;;  %v3650_v58 = vmax.f32 %v3636_v37, 0.0  ;;  %v3614_v24 = vmax.f32 %v3612_v31, %v3613_v17  ;;  %v3510_v59 = vpop.permute.xlu1 %3509  ;;  %v3741_v52 = vsel %vm3714_vm15, %v3740_v40, %v3739_v61 }
 0x4cc   :  { %v3572_v8 = vmax.f32 %v6701_v29, %v3510_v59  ;;  %v3754_v4 = vpack.c.b16 %v3741_v52, %v3741_v52  ;;  %v3797_v48 = vsel %vm3714_vm15, %v3796_v63, %v3795_v53  ;;  %v3609_v5 = vsel %vm2480_vm8, %v3571_v22, -inf }
 0x4cd   :  { %v3664_v39 = vpack.c.bf16 %v3650_v58, %v3650_v58  ;;  %v3639_v16 = vadd.f32 %v6731_v12, %v3614_v24  ;;  %v3516_v47 = vpop.permute.xlu0 %3515  ;;  %v3853_v46 = vsel %vm3714_vm15, %v3852_v57, %v3851_v11  ;;  %v3810_v29 = vpack.c.b16 %v3797_v48, %v3797_v48 }
 0x4ce   :  { %v3610_v23 = vsel %vm2480_vm8, %v3572_v8, -inf  ;;  %v3575_v3 = vmax.f32 %v6752_v43, %v3516_v47  ;;  %3756 = vrot.lane.b32.xlu0 %v3754_v4, %s4575_s0  ;;  %v3866_v13 = vpack.c.b16 %v3853_v46, %v3853_v46  ;;  %v3744_v27 = vrot.slane %v6918_v62, 7 }
 0x4cf   :  { %v6930_v38 = vunpack.c.l.b16 %v3664_v39  ;;  %v3653_v20 = vmax.f32 %v3639_v16, 0.0  ;;  %v3611_v35 = vmax.f32 %v3609_v5, %v3610_v23  ;;  %v3518_v18 = vpop.permute.xlu1 %3517  ;;  %v3801_v6 = vrot.slane %v6918_v62, 1 }
 0x4d0   :  { %v3615_v50 = vsel %vm2480_vm8, %v3575_v3, -inf  ;;  %v3576_v51 = vmax.f32 %v6761_v49, %v3518_v18  ;;  %v6938_v43 = vsel %vm3714_vm15, %v3713_v36, %v6830_v44  ;;  %v3826_v57 = vrot.slane %v6903_v32, 6 }
 0x4d1   :  { %v3667_v21 = vpack.c.bf16 %v3653_v20, %v3653_v20  ;;  %v3638_v2 = vadd.f32 %v6731_v12, %v3611_v35  ;;  %v3520_v19 = vpop.permute.xlu0 %3519  ;;  %v3743_v54 = vsel %vm3699_vm10, %v6930_v38, %v3742_v10  ;;  %v3799_v61 = vrot.slane %v6930_v38, 2 }
 0x4d2   :  { %v3616_v45 = vsel %vm2480_vm8, %v3576_v51, -inf  ;;  %v3577_v0 = vmax.f32 %v6747_v42, %v3520_v19  ;;  %3812 = vrot.lane.b32.xlu0 %v3810_v29, %s4575_s0  ;;  %v3745_v49 = vsel %vm3702_vm11, %v3744_v27, %v3743_v54  ;;  %v3855_v44 = vrot.slane %v6930_v38, 4 }
 0x4d3   :  { %v6949_v28 = vunpack.c.l.b16 %v3667_v21  ;;  %v3652_v53 = vmax.f32 %v3638_v2, 0.0  ;;  %v3617_v26 = vmax.f32 %v3615_v50, %v3616_v45  ;;  %v3522_v15 = vpop.permute.xlu1 %3521  ;;  %v3800_v41 = vsel %vm3699_vm10, %v3799_v61, %v3798_v7 }
 0x4d4   :  { %v3578_v11 = vmax.f32 %v6757_v30, %v3522_v15  ;;  %v3802_v25 = vsel %vm3702_vm11, %v3801_v6, %v3800_v41  ;;  %v3856_v10 = vsel %vm3699_vm10, %v3855_v44, %v3854_v9  ;;  %v3857_v42 = vrot.slane %v6918_v62, 3 }
 0x4d5   :  { %v3666_v1 = vpack.c.bf16 %v3652_v53, %v3652_v53  ;;  %v3640_v37 = vadd.f32 %v6731_v12, %v3617_v26  ;;  %v3618_v33 = vsel %vm2480_vm8, %v3577_v0, -inf  ;;  %v3748_v63 = vrot.slane %v6949_v28, 5 }
 0x4d6   :  { %v3619_v40 = vsel %vm2480_vm8, %v3578_v11, -inf  ;;  %3868 = vrot.lane.b32.xlu0 %v3866_v13, %s4575_s0  ;;  %v3858_v7 = vsel %vm3702_vm11, %v3857_v42, %v3856_v10  ;;  %v3770_v9 = vrot.slane %v6903_v32, 4  ;;  %v3804_v22 = vrot.slane %v6949_v28, 7 }
 0x4d7   :  { %v6962_v30 = vunpack.c.l.b16 %v3666_v1  ;;  %v3654_v31 = vmax.f32 %v3640_v37, 0.0  ;;  %v3620_v17 = vmax.f32 %v3618_v33, %v3619_v40  ;;  %v6970_v58 = vsel %vm3714_vm15, %v6903_v32, %v6848_v14 }
 0x4d8   :  { %v3716_v24 = vrot.slane %v6930_v38, 7  ;;  %v6981_v39 = vsel %vm3714_vm15, %v3770_v9, %v6839_v34  ;;  %v6985_v14 = vsel %vm3714_vm15, %v3826_v57, %v6845_v60  ;;  %v3861_v5 = vrot.slane %v6949_v28, 1 }
 0x4d9   :  { %v3668_v59 = vpack.c.bf16 %v3654_v31, %v3654_v31  ;;  %v3641_v52 = vadd.f32 %v6731_v12, %v3620_v17  ;;  %v3746_v8 = vrot.slane %v6962_v30, 6  ;;  %v3803_v4 = vsel %vm3705_vm12, %v6962_v30, %v3802_v25 }
 0x4da   :  { %v3805_v48 = vsel %vm3708_vm13, %v3804_v22, %v3803_v4  ;;  %v3859_v36 = vrot.slane %v6962_v30, 2  ;;  %v3718_v23 = vrot.slane %v6918_v62, 6  ;;  %v3717_v20 = vsel %vm3699_vm10, %v3716_v24, %v6892_v56 }
 0x4db   :  { %v6987_v32 = vunpack.c.l.b16 %v3668_v59  ;;  %v3655_v12 = vmax.f32 %v3641_v52, 0.0  ;;  %v3747_v16 = vsel %vm3705_vm12, %v3746_v8, %v3745_v49  ;;  %v3720_v35 = vrot.slane %v6962_v30, 5 }
 0x4dc   :  { %v3749_v47 = vsel %vm3708_vm13, %v3748_v63, %v3747_v16  ;;  %v3860_v46 = vsel %vm3705_vm12, %v3859_v36, %v3858_v7  ;;  %v3772_v18 = vrot.slane %v6892_v56, 2  ;;  %v3719_v6 = vsel %vm3702_vm11, %v3718_v23, %v3717_v20 }
 0x4dd   :  { %v3669_v3 = vpack.c.bf16 %v3655_v12, %v3655_v12  ;;  %v3750_v34 = vrot.slane %v6987_v32, 4  ;;  %v3806_v29 = vrot.slane %v6987_v32, 6  ;;  %v3862_v60 = vsel %vm3708_vm13, %v3861_v5, %v3860_v46 }
 0x4de   :  { %v3863_v13 = vsel %vm3711_vm14, %v6987_v32, %v3862_v60  ;;  %v3721_v21 = vsel %vm3705_vm12, %v3720_v35, %v3719_v6  ;;  %v3722_v2 = vrot.slane %v6949_v28, 4  ;;  %v3724_v19 = vrot.slane %v6987_v32, 3 }
 0x4df   :  { %v3697_v27 = vunpack.c.l.b16 %v3669_v3  ;;  %v3751_v50 = vsel %vm3711_vm14, %v3750_v34, %v3749_v47  ;;  %v3807_v51 = vsel %vm3711_vm14, %v3806_v29, %v3805_v48  ;;  %v3773_v54 = vrot.slane %v6930_v38, 1 }
 0x4e0   :  { %v3723_v44 = vsel %vm3708_vm13, %v3722_v2, %v3721_v21  ;;  %v3776_v26 = vrot.slane %v6962_v30, 7  ;;  %v3828_v1 = vrot.slane %v6892_v56, 4  ;;  %v3884_v37 = vrot.slane %v6892_v56, 6 }
 0x4e1   :  { %v3752_v61 = vrot.slane %v3697_v27, 3  ;;  %v3808_v45 = vrot.slane %v3697_v27, 5  ;;  %v3864_v0 = vrot.slane %v3697_v27, 7  ;;  %v3726_v49 = vrot.slane %v3697_v27, 2 }
 0x4e2   :  { %v3774_v53 = vsel %vm3699_vm10, %v3773_v54, %v3772_v18  ;;  %v3725_v25 = vsel %vm3711_vm14, %v3724_v19, %v3723_v44  ;;  %v3778_v40 = vrot.slane %v6949_v28, 6  ;;  %v3780_v63 = vrot.slane %v6987_v32, 5  ;;  %v3952_v54 = vld [vmem:[%s7117_s6 + $0x8] sm:$0xff] }
 0x4e3   :  { %v3753_v15 = vsel %vm3714_vm15, %v3752_v61, %v3751_v50  ;;  %v3809_v41 = vsel %vm3714_vm15, %v3808_v45, %v3807_v51  ;;  %v3865_v11 = vsel %vm3714_vm15, %v3864_v0, %v3863_v13  ;;  %v7018_v42 = vsel %vm3714_vm15, %v3726_v49, %v3725_v25 }
 0x4e4   :  { %v3755_v10 = vpack.c.b16 %v3753_v15, %v3753_v15  ;;  %v3775_v33 = vsel %vm3702_vm11, %v6918_v62, %v3774_v53  ;;  %v3782_v7 = vrot.slane %v3697_v27, 4  ;;  %v3811_v31 = vpack.c.b16 %v3809_v41, %v3809_v41 }
 0x4e5   :  { %v3777_v17 = vsel %vm3705_vm12, %v3776_v26, %v3775_v33  ;;  %v3829_v9 = vrot.slane %v6930_v38, 3  ;;  %v3833_v22 = vrot.slane %v6962_v30, 1  ;;  %v3831_v56 = vrot.slane %v6918_v62, 2  ;;  %v3955_v26 = vld [vmem:[%s7117_s6 + $0x10] sm:$0xff] }
 0x4e6   :  { %3758 = vrot.lane.b32.xlu1 %v3755_v10, %s4575_s0  ;;  %v3779_v57 = vsel %vm3708_vm13, %v3778_v40, %v3777_v17  ;;  %v3836_v24 = vrot.slane %v6987_v32, 7  ;;  %v3885_v59 = vrot.slane %v6930_v38, 5  ;;  %v3887_v4 = vrot.slane %v6918_v62, 4 }
 0x4e7   :  { %v3781_v52 = vsel %vm3711_vm14, %v3780_v63, %v3779_v57  ;;  %v3830_v8 = vsel %vm3699_vm10, %v3829_v9, %v3828_v1  ;;  %v3889_v48 = vrot.slane %v6962_v30, 3  ;;  %v3838_v16 = vrot.slane %v3697_v27, 6 }
 0x4e8   :  { %v3783_v36 = vsel %vm3714_vm15, %v3782_v7, %v3781_v52  ;;  %v3832_v12 = vsel %vm3702_vm11, %v3831_v56, %v3830_v8  ;;  %v3886_v5 = vsel %vm3699_vm10, %v3885_v59, %v3884_v37  ;;  %v3891_v46 = vrot.slane %v6949_v28, 2  ;;  %v3958_v37 = vld [vmem:[%s7117_s6 + $0x18] sm:$0xff] }
 0x4e9   :  { %v3834_v47 = vsel %vm3705_vm12, %v3833_v22, %v3832_v12  ;;  %v3888_v38 = vsel %vm3702_vm11, %v3887_v4, %v3886_v5  ;;  %v3893_v23 = vrot.slane %v6987_v32, 1  ;;  %v3867_v3 = vpack.c.b16 %v3865_v11, %v3865_v11 }
 0x4ea   :  { %3814 = vrot.lane.b32.xlu1 %v3811_v31, %s4575_s0  ;;  %v3835_v62 = vsel %vm3708_vm13, %v6949_v28, %v3834_v47  ;;  %v3890_v30 = vsel %vm3705_vm12, %v3889_v48, %v3888_v38  ;;  %v3728_v28 = vpack.c.b16 %v6938_v43, %v6938_v43  ;;  %v3784_v35 = vpack.c.b16 %v6981_v39, %v6981_v39 }
 0x4eb   :  { %v3837_v34 = vsel %vm3711_vm14, %v3836_v24, %v3835_v62  ;;  %v3892_v29 = vsel %vm3708_vm13, %v3891_v46, %v3890_v30  ;;  %v3896_v43 = vpack.c.b16 %v6970_v58, %v6970_v58  ;;  %v3840_v39 = vpack.c.b16 %v6985_v14, %v6985_v14 }
 0x4ec   :  { %v3839_v60 = vsel %vm3714_vm15, %v3838_v16, %v3837_v34  ;;  %v3894_v13 = vsel %vm3711_vm14, %v3893_v23, %v3892_v29  ;;  %v3729_v0 = vpack.c.b16 %v7018_v42, %v7018_v42  ;;  %v3785_v49 = vpack.c.b16 %v3783_v36, %v3783_v36 }
 0x4ed   :  { %v3895_v20 = vsel %vm3714_vm15, %v3697_v27, %v3894_v13  ;;  %v3949_v27 = vld [vmem:[%s7117_s6] sm:$0xff]  ;;  %v3918_v19 = vsel %vm2480_vm8, %v3896_v43, 0  ;;  %v3841_v25 = vpack.c.b16 %v3839_v60, %v3839_v60 }
 0x4ee   :  { %3870 = vrot.lane.b32.xlu1 %v3867_v3, %s4575_s0  ;;  %v3897_v41 = vpack.c.b16 %v3895_v20, %v3895_v20 }
 0x4f0   :  { %v3920_v42 = vsel %vm2480_vm8, %v3897_v41, 0 }
 0x540   :  { %v3757_v32 = vpop.permute.xlu0 %3756 }
 0x541   :  { %v3900_v50 = vsel %vm2480_vm8, %v3728_v28, %v3757_v32 }
 0x544   :  { %v3813_v18 = vpop.permute.xlu0 %3812 }
 0x545   :  { %v3906_v6 = vsel %vm2480_vm8, %v3784_v35, %v3813_v18 }
 0x546   :  { %v4118_v21 = vcombine.low %v3900_v50, %v3906_v6 }
 0x548   :  { %v3950_v55 = vsel %vm7062_vm4, %v4118_v21, %v3949_v27  ;;  %v3869_v2 = vpop.permute.xlu0 %3868 }
 0x549   :  { %3951 = vst [vmem:[%s7117_s6] sm:$0xff] %v3950_v55  ;;  %v3912_v58 = vsel %vm2480_vm8, %v3840_v39, %v3869_v2 }
 0x54a   :  { %v4119_v61 = vcombine.low %v3912_v58, %v3918_v19 }
 0x54c   :  { %v3953_v14 = vsel %vm7062_vm4, %v4119_v61, %v3952_v54 }
 0x54d   :  { %3954 = vst [vmem:[%s7117_s6 + $0x8] sm:$0xff] %v3953_v14 }
 0x558   :  { %v3759_v45 = vpop.permute.xlu1 %3758 }
 0x559   :  { %v3903_v53 = vsel %vm2480_vm8, %v3729_v0, %v3759_v45 }
 0x55c   :  { %v3815_v44 = vpop.permute.xlu1 %3814 }
 0x55d   :  { %v3909_v15 = vsel %vm2480_vm8, %v3785_v49, %v3815_v44 }
 0x55e   :  { %v4120_v11 = vcombine.low %v3903_v53, %v3909_v15 }
 0x560   :  { %v3956_v10 = vsel %vm7062_vm4, %v4120_v11, %v3955_v26  ;;  %v3871_v1 = vpop.permute.xlu1 %3870 }
 0x561   :  { %3957 = vst [vmem:[%s7117_s6 + $0x10] sm:$0xff] %v3956_v10  ;;  %v3915_v33 = vsel %vm2480_vm8, %v3841_v25, %v3871_v1 }
 0x562   :  { %v4121_v40 = vcombine.low %v3915_v33, %v3920_v42 }
 0x564   :  { %v3959_v63 = vsel %vm7062_vm4, %v4121_v40, %v3958_v37 }
 0x565   :  { %3960 = vst [vmem:[%s7117_s6 + $0x18] sm:$0xff] %v3959_v63 }

</bundles_post_ra>
